<compile_context>
chip_gen: v5e
topology: v5e:2x2
jax: 0.10.0
libtpu: 0.0.40
codegen_flags: <defaults>
</compile_context>

<pallas_src>
import functools

import numpy as np
import jax
import jax.numpy as jnp
from jax.experimental import pallas as pl
from jax.experimental.pallas import tpu as pltpu


# --------------------------- Pallas kernel ---------------------------------
def _decoder_kernel(x_ref, w1_ref, b1_ref, w2_ref, b2_ref, o_ref):
    """One batch tile: two dense (Toeplitz) matmuls + bias + ReLU, all in VMEM.

    x_ref : (BN, C0*H0*W0)   flattened NCHW latent rows
    w1_ref: (C0*H0*W0, C1*H1*W1)   Toeplitz matrix of Tconv layer 1
    b1_ref: (1, C1*H1*W1)
    w2_ref: (C1*H1*W1, C2*H2*W2)   Toeplitz matrix of Tconv layer 2
    b2_ref: (1, C2*H2*W2)
    o_ref : (BN, C2*H2*W2)   lane-dense output slab for this tile
    """
    x = x_ref[...].astype(jnp.float32)                                 # (BN, d0)
    h = jnp.dot(x, w1_ref[...], preferred_element_type=jnp.float32)    # (BN, d1)
    h = jnp.maximum(h + b1_ref[...], 0.0)                              # bias + ReLU
    y = jnp.dot(h, w2_ref[...], preferred_element_type=jnp.float32)    # (BN, d2)
    y = jnp.maximum(y + b2_ref[...], 0.0)
    o_ref[...] = y.astype(o_ref.dtype)


# --------------------------- parameter handling -----------------------------
def init_decoder_params(key, encoder_dim, hidden_1dim, hidden_2dim, kernel=5):
    """PyTorch-layout parameters (ConvTranspose2d weight: (in_ch, out_ch, kH, kW))."""
    k1, k2, k3, k4 = jax.random.split(key, 4)
    bound1 = 1.0 / jnp.sqrt(hidden_2dim * kernel * kernel)
    bound2 = 1.0 / jnp.sqrt(hidden_1dim * kernel * kernel)
    return {
        "w1": jax.random.uniform(k1, (hidden_2dim, hidden_1dim, kernel, kernel),
                                 jnp.float32, -bound1, bound1),
        "b1": jax.random.uniform(k2, (hidden_1dim,), jnp.float32, -bound1, bound1),
        "w2": jax.random.uniform(k3, (hidden_1dim, encoder_dim, kernel, kernel),
                                 jnp.float32, -bound2, bound2),
        "b2": jax.random.uniform(k4, (encoder_dim,), jnp.float32, -bound2, bound2),
    }


def _toeplitz_tconv(w_pt, H, W):
    """Dense matrix T so that  y_flat = x_flat @ T  implements
    ConvTranspose2d(stride=1, padding=0) on a single sample.

    x_flat layout: ci*H*W + ih*W + iw   (row-major NCHW sample)
    y_flat layout: co*Ho*Wo + oh*Wo + ow
    """
    w = np.asarray(w_pt, np.float32)                    # (Cin, Cout, K, K)
    Cin, Cout, K, Kw = w.shape
    assert K == Kw, "fused decoder kernel assumes a square kernel"
    Ho, Wo = H + K - 1, W + K - 1
    T = np.zeros((Cin, H, W, Cout, Ho, Wo), np.float32)
    for ih in range(H):
        for iw in range(W):
            # transposed conv scatters x[:, ih, iw] * w into y[:, ih:ih+K, iw:iw+K]
            T[:, ih, iw, :, ih:ih + K, iw:iw + K] = w
    return T.reshape(Cin * H * W, Cout * Ho * Wo)


def prepare_decoder_params(params, in_hw):
    """One-time conversion to the fused-kernel layout (done at init, not per call).

    in_hw: (H0, W0) spatial size of the latent code (fixed for the AE).
    Returns (prep_arrays, out_chw) where out_chw = (C2, H2, W2) are plain ints.
    """
    H0, W0 = in_hw
    w1, w2 = params["w1"], params["w2"]
    C0, C1, K, _ = w1.shape
    C1b, C2, K2, _ = w2.shape
    assert K2 == K and C1b == C1
    H1, W1 = H0 + K - 1, W0 + K - 1
    H2, W2 = H1 + K - 1, W1 + K - 1

    t1 = _toeplitz_tconv(w1, H0, W0)                    # (C0*H0*W0, C1*H1*W1)
    t2 = _toeplitz_tconv(w2, H1, W1)                    # (C1*H1*W1, C2*H2*W2)
    b1 = np.repeat(np.asarray(params["b1"], np.float32), H1 * W1)[None, :]
    b2 = np.repeat(np.asarray(params["b2"], np.float32), H2 * W2)[None, :]

    prep = {"t1": jnp.asarray(t1), "b1": jnp.asarray(b1),
            "t2": jnp.asarray(t2), "b2": jnp.asarray(b2)}
    return prep, (int(C2), int(H2), int(W2))


# --------------------------- forward wrapper --------------------------------
@functools.partial(jax.jit, static_argnames=("out_chw", "batch_tile"))
def decoder_forward(z_nchw, prep, out_chw, batch_tile=8):
    """z_nchw: (N, hidden_2dim, H0, W0) -> (N, encoder_dim, H0+2(K-1), W0+2(K-1))."""
    N, C0, H0, W0 = z_nchw.shape
    d0 = C0 * H0 * W0
    d1 = prep["t1"].shape[1]
    C2, H2, W2 = out_chw
    d2 = C2 * H2 * W2
    assert prep["t1"].shape[0] == d0 and prep["t2"].shape == (d1, d2)

    # Batch tile: amortize per-grid-step overhead; bn<=8 keeps (bn, .) blocks
    # aligned or trivially padded, and grid>=2 for N>=2*bn gives v7x both cores work.
    bn = min(batch_tile, N)
    n_pad = -(-N // bn) * bn
    x = z_nchw.reshape(N, d0)                           # pure reshape (row-major)
    if n_pad != N:
        x = jnp.pad(x, ((0, n_pad - N), (0, 0)))

    flops = 2 * n_pad * (d0 * d1 + d1 * d2)
    bytes_accessed = 4 * (n_pad * (d0 + d2) + d0 * d1 + d1 * d2 + d1 + d2)

    out = pl.pallas_call(
        _decoder_kernel,
        out_shape=jax.ShapeDtypeStruct((n_pad, d2), z_nchw.dtype),
        grid_spec=pltpu.PrefetchScalarGridSpec(
            num_scalar_prefetch=0,
            grid=(n_pad // bn,),
            in_specs=[
                pl.BlockSpec((bn, d0), lambda n: (n, 0)),    # latent rows
                pl.BlockSpec((d0, d1), lambda n: (0, 0)),    # Toeplitz 1 (resident)
                pl.BlockSpec((1, d1), lambda n: (0, 0)),     # bias 1
                pl.BlockSpec((d1, d2), lambda n: (0, 0)),    # Toeplitz 2 (resident)
                pl.BlockSpec((1, d2), lambda n: (0, 0)),     # bias 2
            ],
            out_specs=pl.BlockSpec((bn, d2), lambda n: (n, 0)),
        ),
        compiler_params=pltpu.CompilerParams(
            dimension_semantics=("parallel",),
            vmem_limit_bytes=32 * 1024 * 1024,   # > v5e 16 MiB default; < v7x 64 MiB
        ),
        cost_estimate=pl.CostEstimate(
            flops=flops, transcendentals=0, bytes_accessed=bytes_accessed),
    )(x, prep["t1"], prep["b1"], prep["t2"], prep["b2"])

    return out[:N].reshape(N, C2, H2, W2)               # pure reshape, no transpose


# ---------------- pure-JAX reference (sanity check) ----------------
def _ref_tconv_relu(x_nhwc, w_pt, b):
    Cin, Cout, K, _ = w_pt.shape
    wflip = jnp.transpose(w_pt[:, :, ::-1, ::-1], (2, 3, 0, 1))  # HWIO
    y = jax.lax.conv_general_dilated(
        x_nhwc, wflip, window_strides=(1, 1),
        padding=[(K - 1, K - 1), (K - 1, K - 1)],
        dimension_numbers=("NHWC", "HWIO", "NHWC"))
    return jnp.maximum(y + b, 0.0)


def _ref_decoder(z_nchw, params):
    x = jnp.transpose(z_nchw, (0, 2, 3, 1))
    x = _ref_tconv_relu(x, params["w1"], params["b1"])
    x = _ref_tconv_relu(x, params["w2"], params["b2"])
    return jnp.transpose(x, (0, 3, 1, 2))


if __name__ == "__main__":
    encoder_dim, hidden_1dim, hidden_2dim, kernel = 4, 8, 4, 5
    N, H0, W0 = 16, 8, 8

    key = jax.random.PRNGKey(0)
    pkey, zkey = jax.random.split(key)
    params = init_decoder_params(pkey, encoder_dim, hidden_1dim, hidden_2dim, kernel)
    prep, out_chw = prepare_decoder_params(params, in_hw=(H0, W0))  # built once

    # latent code in NCHW, channels = hidden_2dim
    z = jax.random.normal(zkey, (N, hidden_2dim, H0, W0), jnp.float32)

    out = jax.block_until_ready(decoder_forward(z, prep, out_chw))
    expect = (N, encoder_dim, H0 + 2 * (kernel - 1), W0 + 2 * (kernel - 1))
    assert out.shape == expect, out.shape

    ref = jax.block_until_ready(_ref_decoder(z, params))
    err = float(jnp.max(jnp.abs(out - ref)))
    assert jnp.allclose(out, ref, atol=5e-4, rtol=1e-4), f"mismatch vs JAX reference (max abs err {err})"

    print("KERNEL_OK")
</pallas_src>

<mosaic_0001>
module attributes {stable_mosaic.version = 11 : i64} {
  func.func @_decoder_kernel(%arg0: i32, %arg1: memref<8x256xf32, #tpu.memory_space<vmem>>, %arg2: memref<256x1152xf32, #tpu.memory_space<vmem>>, %arg3: memref<1x1152xf32, #tpu.memory_space<vmem>>, %arg4: memref<1152x1024xf32, #tpu.memory_space<vmem>>, %arg5: memref<1x1024xf32, #tpu.memory_space<vmem>>, %arg6: memref<8x1024xf32, #tpu.memory_space<vmem>>) attributes {dimension_semantics = [#tpu.dimension_semantics<parallel>], iteration_bounds = array<i64: 2>, scalar_prefetch = 0 : i64, scratch_operands = 0 : i64, tpu.core_type = #tpu.core_type<tc>, window_params = [{transform_indices = @transform_0, window_bounds = array<i64: 8, 256>}, {pipeline_mode = #tpu.pipeline_mode<synchronous>, transform_indices = @transform_1, window_bounds = array<i64: 256, 1152>}, {pipeline_mode = #tpu.pipeline_mode<synchronous>, transform_indices = @transform_2, window_bounds = array<i64: 1, 1152>}, {pipeline_mode = #tpu.pipeline_mode<synchronous>, transform_indices = @transform_3, window_bounds = array<i64: 1152, 1024>}, {pipeline_mode = #tpu.pipeline_mode<synchronous>, transform_indices = @transform_4, window_bounds = array<i64: 1, 1024>}, {transform_indices = @transform_5, window_bounds = array<i64: 8, 1024>}]} {
    %c0 = arith.constant 0 : index
    %c0_0 = arith.constant 0 : index
    %0 = vector.load %arg1[%c0, %c0_0] : memref<8x256xf32, #tpu.memory_space<vmem>>, vector<8x256xf32>
    %c0_1 = arith.constant 0 : index
    %c0_2 = arith.constant 0 : index
    %1 = vector.load %arg2[%c0_1, %c0_2] : memref<256x1152xf32, #tpu.memory_space<vmem>>, vector<256x1152xf32>
    %cst = arith.constant dense<0.000000e+00> : vector<8x1152xf32>
    %2 = tpu.matmul %0, %1, %cst {dimension_numbers = #tpu.dot_dimension_numbers<[1], [0], [0], [1], [0, 0, 1, 1], [], []>} : vector<8x256xf32>, vector<256x1152xf32>, vector<8x1152xf32> -> vector<8x1152xf32>
    %c0_3 = arith.constant 0 : index
    %c0_4 = arith.constant 0 : index
    %3 = vector.load %arg3[%c0_3, %c0_4] : memref<1x1152xf32, #tpu.memory_space<vmem>>, vector<1x1152xf32>
    %4 = vector.broadcast %3 : vector<1x1152xf32> to vector<8x1152xf32>
    %5 = arith.addf %2, %4 : vector<8x1152xf32>
    %cst_5 = arith.constant 0.000000e+00 : f32
    %6 = vector.broadcast %cst_5 : f32 to vector<8x1152xf32>
    %7 = arith.maximumf %5, %6 : vector<8x1152xf32>
    %c0_6 = arith.constant 0 : index
    %c0_7 = arith.constant 0 : index
    %8 = vector.load %arg4[%c0_6, %c0_7] : memref<1152x1024xf32, #tpu.memory_space<vmem>>, vector<1152x1024xf32>
    %cst_8 = arith.constant dense<0.000000e+00> : vector<8x1024xf32>
    %9 = tpu.matmul %7, %8, %cst_8 {dimension_numbers = #tpu.dot_dimension_numbers<[1], [0], [0], [1], [0, 0, 1, 1], [], []>} : vector<8x1152xf32>, vector<1152x1024xf32>, vector<8x1024xf32> -> vector<8x1024xf32>
    %c0_9 = arith.constant 0 : index
    %c0_10 = arith.constant 0 : index
    %10 = vector.load %arg5[%c0_9, %c0_10] : memref<1x1024xf32, #tpu.memory_space<vmem>>, vector<1x1024xf32>
    %11 = vector.broadcast %10 : vector<1x1024xf32> to vector<8x1024xf32>
    %12 = arith.addf %9, %11 : vector<8x1024xf32>
    %cst_11 = arith.constant 0.000000e+00 : f32
    %13 = vector.broadcast %cst_11 : f32 to vector<8x1024xf32>
    %14 = arith.maximumf %12, %13 : vector<8x1024xf32>
    %c0_12 = arith.constant 0 : index
    %c0_13 = arith.constant 0 : index
    %15 = vector.load %arg6[%c0_12, %c0_13] : memref<8x1024xf32, #tpu.memory_space<vmem>>, vector<8x1024xf32>
    tpu.vector_store %arg6[%c0_12, %c0_13], %14 {strides = array<i32>} : memref<8x1024xf32, #tpu.memory_space<vmem>>, vector<8x1024xf32>,
    return
  }
  func.func @transform_0(%arg0: i32) -> (i32, i32) {
    %c0_i32 = arith.constant 0 : i32
    %c0_i32_0 = arith.constant 0 : i32
    return %arg0, %c0_i32 : i32, i32
  }
  func.func @transform_1(%arg0: i32) -> (i32, i32) {
    %c0_i32 = arith.constant 0 : i32
    %c0_i32_0 = arith.constant 0 : i32
    %c0_i32_1 = arith.constant 0 : i32
    return %c0_i32, %c0_i32_0 : i32, i32
  }
  func.func @transform_2(%arg0: i32) -> (i32, i32) {
    %c0_i32 = arith.constant 0 : i32
    %c0_i32_0 = arith.constant 0 : i32
    %c0_i32_1 = arith.constant 0 : i32
    return %c0_i32, %c0_i32_0 : i32, i32
  }
  func.func @transform_3(%arg0: i32) -> (i32, i32) {
    %c0_i32 = arith.constant 0 : i32
    %c0_i32_0 = arith.constant 0 : i32
    %c0_i32_1 = arith.constant 0 : i32
    return %c0_i32, %c0_i32_0 : i32, i32
  }
  func.func @transform_4(%arg0: i32) -> (i32, i32) {
    %c0_i32 = arith.constant 0 : i32
    %c0_i32_0 = arith.constant 0 : i32
    %c0_i32_1 = arith.constant 0 : i32
    return %c0_i32, %c0_i32_0 : i32, i32
  }
  func.func @transform_5(%arg0: i32) -> (i32, i32) {
    %c0_i32 = arith.constant 0 : i32
    %c0_i32_0 = arith.constant 0 : i32
    return %arg0, %c0_i32 : i32, i32
  }
}

</mosaic_0001>

<bundles_post_ra>
// kernel: decoder_forward.1
= control target key start
LH: loop header
LB: loop body
LE: loop exit
PB: predicated region body
PF: predicated region fallthrough
CT: control target
= control target key end

     0   :  { %10 = vsyncpa [#allocation3], 0  ;;  %s4166_s0 = inlined_call_operand.vmem [shape: f32[16,256], index: 0, kind: input, shape index: {}]   ;;  %s4167_s1 = inlined_call_operand.hbm [shape: f32[256,1152], index: 1, kind: input, shape index: {}]   ;;  %s4168_s2 = inlined_call_operand.hbm [shape: f32[1,1152], index: 2, kind: input, shape index: {}]   ;;  %s4169_s3 = inlined_call_operand.hbm [shape: f32[1152,1024], index: 3, kind: input, shape index: {}]   ;;  %s4170_s4 = inlined_call_operand.hbm [shape: f32[1,1024], index: 4, kind: input, shape index: {}]   ;;  %s4171_s5 = inlined_call_operand.vmem [shape: f32[16,1024], index: 5, kind: output, shape index: {}]  }
   0x1   :  { %11 = vsyncpa [#allocation5], 0 }
   0x2   :  { %12 = vsyncpa [#allocation8], 0  ;;  %s3946_s18 = smov 0  }
   0x3 LB: > { %s185_s21 = sshll.u32 %s4168_s2, 4  ;;  %s3955_s22 = sadd.s32 4294967295, %s3906_s18   ;;  %s3906_s18 = sphi %s3946_s18, %s18_s18   ;;  %s186_s21 = int_to_ptr.hbm [resolvable:$true] %s185_s21 }
   0x4   : > { %p3693_p0 = scmp.ge.s32.totalorder %s3906_s18, 1  ;;  %p159_p1 = scmp.lt.s32.totalorder %s3906_s18, 3 }
   0x5   : > { %p3741_p2 = scmp.eq.s32.totalorder %s3955_s22, 0  ;;  %s3908_s24 = smov [#allocation4]  }
   0x6   : > { %p3960_p3 = pnand %p3693_p0, %p159_p1  ;;  %s187_s25 = sshll.u32 %s3908_s24, 4  ;;  %s188_s25 = int_to_ptr.vmem [resolvable:$true] %s187_s25 }
   0x7   : > { %s170_s28 = sshll.u32 %s4167_s1, 4  ;;  %s3909_s30 = smov [#allocation2]   ;;  %s171_s28 = int_to_ptr.hbm [resolvable:$true] %s170_s28 }
   0x8   : > { %p3728_p4 = pneg %p3960_p3  ;;  %s172_s6 = sshll.u32 %s3909_s30, 4  ;;  %s173_s6 = int_to_ptr.vmem [resolvable:$true] %s172_s6 }
   0x9   : > { %s196_s9 = sshll.u32 %s4169_s3, 4  ;;  %s3910_s10 = smov 1152   ;;  %s197_s9 = int_to_ptr.hbm [resolvable:$true] %s196_s9 }
   0xa   : > { %p3971_p5 = pnand %p3741_p2, %p3728_p4  ;;  %s3911_s11 = smov 72  }
   0xb   : > { %s3912_s12 = smov [#allocation6]   ;;  %s3913_s14 = smov 1024  }
   0xc   : > { %3734 = dma.hbm_to_vmem [thread:$0]  (!%p3971_p5), %s186_s21, 144, %s188_s25, [#allocation5]  }
   0xd   : > { %3731 = dma.hbm_to_vmem [thread:$0]  (!%p3971_p5), %s171_s28, 36864, %s173_s6, [#allocation3], %s3910_s10, %s3910_s10, %s3911_s11  }
   0xe   : > { %s198_s13 = sshll.u32 %s3912_s12, 4  ;;  %s3914_s15 = smov 64   ;;  %s199_s13 = int_to_ptr.vmem [resolvable:$true] %s198_s13 }
   0xf   : > { %3737 = dma.hbm_to_vmem [thread:$0]  (!%p3971_p5), %s197_s9, 147456, %s199_s13, [#allocation5], %s3913_s14, %s3913_s14, %s3914_s15  }
  0x10   : > { %s211_s19 = sshll.u32 %s4170_s4, 4  ;;  %s3915_s20 = smov [#allocation7]   ;;  %s212_s19 = int_to_ptr.hbm [resolvable:$true] %s211_s19 }
  0x11   : > { %s213_s21 = sshll.u32 %s3915_s20, 4  ;;  %234 = sbr.rel (%p3960_p3) target bundleno = 1039 (0x40f), region = 40  ;;  %s214_s21 = int_to_ptr.vmem [resolvable:$true] %s213_s21 }
  0x12   : > { %3740 = dma.hbm_to_vmem [thread:$0]  (!%p3971_p5), %s212_s19, 128, %s214_s21, [#allocation8]  }
  0x16   : > { %3893 = dma.done.wait (%p3741_p2), [#allocation3], 36864  }
  0x17   : > { %3895 = vsyncadd (%p3741_p2), [#allocation3], 4294930432 }
  0x18   : > { %3897 = dma.done.wait (%p3741_p2), [#allocation5], 147600  }
  0x19   : > { %3899 = vsyncadd (%p3741_p2), [#allocation5], 4294819696 }
  0x1a   : > { %3901 = dma.done.wait (%p3741_p2), [#allocation8], 128  }
  0x1b   : > { %3903 = vsyncadd (%p3741_p2), [#allocation8], 4294967168  ;;  %v425_v0 = vld [vmem:[#allocation2 + $0x438] sm:$0xff]  ;;  %v426_v1 = vld [vmem:[#allocation2 + $0x440] sm:$0xff]  ;;  %p278_p6 = scmp.lt.s32.totalorder %s3955_s22, 1 }
  0x1c   : > { %v416_v2 = vld [vmem:[#allocation2 + $0x3f0] sm:$0xff]  ;;  %600 = vmatpush.msra.mxu0 %v425_v0  ;;  %640 = vmatpush.msra.mxu2 %v426_v1  ;;  %v569_v3 = vld [vmem:[#allocation2 + $0x8b8] sm:$0xff]  ;;  %v570_v5 = vld [vmem:[#allocation2 + $0x8c0] sm:$0xff] }
  0x1d   : > { %v417_v4 = vld [vmem:[#allocation2 + $0x3f8] sm:$0xff]  ;;  %620 = vmatpush.msra.mxu1 %v569_v3  ;;  %660 = vmatpush.msra.mxu3 %v570_v5  ;;  %v407_v6 = vld [vmem:[#allocation2 + $0x3a8] sm:$0xff]  ;;  %v560_v7 = vld [vmem:[#allocation2 + $0x870] sm:$0xff]  ;;  %s4175_s22 = smov (!%p278_p6, %s3955_s22), 1 }
  0x1e   : > { %v408_v8 = vld [vmem:[#allocation2 + $0x3b0] sm:$0xff]  ;;  %601 = vmatpush.msra.mxu0 %v416_v2  ;;  %641 = vmatpush.msra.mxu2 %v417_v4  ;;  %v561_v9 = vld [vmem:[#allocation2 + $0x878] sm:$0xff]  ;;  %v551_v10 = vld [vmem:[#allocation2 + $0x828] sm:$0xff]  ;;  %s3710_s23 = sshll.u32 %s4175_s22, 4  ;;  %s3711_s27 = sshll.u32 %s4175_s22, 6 }
  0x1f   : > { %621 = vmatpush.msra.mxu1 %v560_v7  ;;  %661 = vmatpush.msra.mxu3 %v561_v9  ;;  %v398_v11 = vld [vmem:[#allocation2 + $0x360] sm:$0xff]  ;;  %v399_v12 = vld [vmem:[#allocation2 + $0x368] sm:$0xff]  ;;  %v552_v13 = vld [vmem:[#allocation2 + $0x830] sm:$0xff]  ;;  %s282_s26 = scalar_lea.vmem %s4166_s0, %s3710_s23  ;;  %s4099_s30 = scalar_lea.vmem %s4171_s5, %s3711_s27 }
  0x20   : > { %602 = vmatpush.msra.mxu0 %v407_v6  ;;  %642 = vmatpush.msra.mxu2 %v408_v8  ;;  %v542_v14 = vld [vmem:[#allocation2 + $0x7e0] sm:$0xff]  ;;  %v543_v15 = vld [vmem:[#allocation2 + $0x7e8] sm:$0xff]  ;;  %v389_v16 = vld [vmem:[#allocation2 + $0x318] sm:$0xff] }
  0x21   : > { %622 = vmatpush.msra.mxu1 %v551_v10  ;;  %662 = vmatpush.msra.mxu3 %v552_v13  ;;  %v390_v17 = vld [vmem:[#allocation2 + $0x320] sm:$0xff]  ;;  %v533_v18 = vld [vmem:[#allocation2 + $0x798] sm:$0xff]  ;;  %v380_v20 = vld [vmem:[#allocation2 + $0x2d0] sm:$0xff] }
  0x22   : > { %603 = vmatpush.msra.mxu0 %v398_v11  ;;  %643 = vmatpush.msra.mxu2 %v399_v12  ;;  %v534_v19 = vld [vmem:[#allocation2 + $0x7a0] sm:$0xff]  ;;  %v381_v21 = vld [vmem:[#allocation2 + $0x2d8] sm:$0xff]  ;;  %v524_v22 = vld [vmem:[#allocation2 + $0x750] sm:$0xff] }
  0x23   : > { %623 = vmatpush.msra.mxu1 %v542_v14  ;;  %663 = vmatpush.msra.mxu3 %v543_v15  ;;  %v525_v23 = vld [vmem:[#allocation2 + $0x758] sm:$0xff]  ;;  %v371_v24 = vld [vmem:[#allocation2 + $0x288] sm:$0xff]  ;;  %v372_v25 = vld [vmem:[#allocation2 + $0x290] sm:$0xff] }
  0x24   : > { %604 = vmatpush.msra.mxu0 %v389_v16  ;;  %644 = vmatpush.msra.mxu2 %v390_v17  ;;  %v515_v26 = vld [vmem:[#allocation2 + $0x708] sm:$0xff]  ;;  %v516_v27 = vld [vmem:[#allocation2 + $0x710] sm:$0xff]  ;;  %v362_v28 = vld [vmem:[#allocation2 + $0x240] sm:$0xff] }
  0x25   : > { %624 = vmatpush.msra.mxu1 %v533_v18  ;;  %664 = vmatpush.msra.mxu3 %v534_v19  ;;  %v363_v29 = vld [vmem:[#allocation2 + $0x248] sm:$0xff]  ;;  %v506_v30 = vld [vmem:[#allocation2 + $0x6c0] sm:$0xff]  ;;  %v353_v32 = vld [vmem:[#allocation2 + $0x1f8] sm:$0xff] }
  0x26   : > { %605 = vmatpush.msra.mxu0 %v380_v20  ;;  %645 = vmatpush.msra.mxu2 %v381_v21  ;;  %v507_v31 = vld [vmem:[#allocation2 + $0x6c8] sm:$0xff]  ;;  %v354_v33 = vld [vmem:[#allocation2 + $0x200] sm:$0xff]  ;;  %v497_v34 = vld [vmem:[#allocation2 + $0x678] sm:$0xff] }
  0x27   : > { %625 = vmatpush.msra.mxu1 %v524_v22  ;;  %665 = vmatpush.msra.mxu3 %v525_v23  ;;  %v498_v35 = vld [vmem:[#allocation2 + $0x680] sm:$0xff]  ;;  %v344_v36 = vld [vmem:[#allocation2 + $0x1b0] sm:$0xff]  ;;  %v345_v37 = vld [vmem:[#allocation2 + $0x1b8] sm:$0xff] }
  0x28   : > { %606 = vmatpush.msra.mxu0 %v371_v24  ;;  %646 = vmatpush.msra.mxu2 %v372_v25  ;;  %v488_v38 = vld [vmem:[#allocation2 + $0x630] sm:$0xff]  ;;  %v489_v39 = vld [vmem:[#allocation2 + $0x638] sm:$0xff]  ;;  %v335_v40 = vld [vmem:[#allocation2 + $0x168] sm:$0xff] }
  0x29   : > { %626 = vmatpush.msra.mxu1 %v515_v26  ;;  %666 = vmatpush.msra.mxu3 %v516_v27  ;;  %v336_v41 = vld [vmem:[#allocation2 + $0x170] sm:$0xff]  ;;  %v479_v42 = vld [vmem:[#allocation2 + $0x5e8] sm:$0xff]  ;;  %v326_v44 = vld [vmem:[#allocation2 + $0x120] sm:$0xff] }
  0x2a   : > { %607 = vmatpush.msra.mxu0 %v362_v28  ;;  %647 = vmatpush.msra.mxu2 %v363_v29  ;;  %v480_v43 = vld [vmem:[#allocation2 + $0x5f0] sm:$0xff]  ;;  %v327_v45 = vld [vmem:[#allocation2 + $0x128] sm:$0xff]  ;;  %v470_v46 = vld [vmem:[#allocation2 + $0x5a0] sm:$0xff] }
  0x2b   : > { %627 = vmatpush.msra.mxu1 %v506_v30  ;;  %667 = vmatpush.msra.mxu3 %v507_v31  ;;  %v471_v47 = vld [vmem:[#allocation2 + $0x5a8] sm:$0xff]  ;;  %v317_v48 = vld [vmem:[#allocation2 + $0xd8] sm:$0xff]  ;;  %v318_v49 = vld [vmem:[#allocation2 + $0xe0] sm:$0xff] }
  0x2c   : > { %608 = vmatpush.msra.mxu0 %v353_v32  ;;  %648 = vmatpush.msra.mxu2 %v354_v33  ;;  %v461_v50 = vld [vmem:[#allocation2 + $0x558] sm:$0xff]  ;;  %v462_v51 = vld [vmem:[#allocation2 + $0x560] sm:$0xff]  ;;  %v308_v52 = vld [vmem:[#allocation2 + $0x90] sm:$0xff] }
  0x2d   : > { %628 = vmatpush.msra.mxu1 %v497_v34  ;;  %668 = vmatpush.msra.mxu3 %v498_v35  ;;  %v309_v53 = vld [vmem:[#allocation2 + $0x98] sm:$0xff]  ;;  %v452_v54 = vld [vmem:[#allocation2 + $0x510] sm:$0xff]  ;;  %v299_v56 = vld [vmem:[#allocation2 + $0x48] sm:$0xff] }
  0x2e   : > { %609 = vmatpush.msra.mxu0 %v344_v36  ;;  %649 = vmatpush.msra.mxu2 %v345_v37  ;;  %v453_v55 = vld [vmem:[#allocation2 + $0x518] sm:$0xff]  ;;  %v300_v57 = vld [vmem:[#allocation2 + $0x50] sm:$0xff]  ;;  %v443_v58 = vld [vmem:[#allocation2 + $0x4c8] sm:$0xff] }
  0x2f   : > { %629 = vmatpush.msra.mxu1 %v488_v38  ;;  %669 = vmatpush.msra.mxu3 %v489_v39  ;;  %v444_v59 = vld [vmem:[#allocation2 + $0x4d0] sm:$0xff]  ;;  %v290_v60 = vld [vmem:[#allocation2] sm:$0xff]  ;;  %v291_v61 = vld [vmem:[#allocation2 + $0x8] sm:$0xff] }
  0x30   : > { %610 = vmatpush.msra.mxu0 %v335_v40  ;;  %650 = vmatpush.msra.mxu2 %v336_v41  ;;  %v427_v62 = vld [vmem:[#allocation2 + $0x448] sm:$0xff]  ;;  %v428_v63 = vld [vmem:[#allocation2 + $0x450] sm:$0xff]  ;;  %v434_v0 = vld [vmem:[#allocation2 + $0x480] sm:$0xff] }
  0x31   : > { %630 = vmatpush.msra.mxu1 %v479_v42  ;;  %670 = vmatpush.msra.mxu3 %v480_v43  ;;  %v435_v1 = vld [vmem:[#allocation2 + $0x488] sm:$0xff]  ;;  %v418_v2 = vld [vmem:[#allocation2 + $0x400] sm:$0xff]  ;;  %v572_v5 = vld [vmem:[#allocation2 + $0x8d0] sm:$0xff] }
  0x32   : > { %611 = vmatpush.msra.mxu0 %v326_v44  ;;  %651 = vmatpush.msra.mxu2 %v327_v45  ;;  %v571_v3 = vld [vmem:[#allocation2 + $0x8c8] sm:$0xff]  ;;  %v409_v6 = vld [vmem:[#allocation2 + $0x3b8] sm:$0xff]  ;;  %v562_v7 = vld [vmem:[#allocation2 + $0x880] sm:$0xff] }
  0x33   : > { %631 = vmatpush.msra.mxu1 %v470_v46  ;;  %671 = vmatpush.msra.mxu3 %v471_v47  ;;  %v419_v4 = vld [vmem:[#allocation2 + $0x408] sm:$0xff]  ;;  %v410_v8 = vld [vmem:[#allocation2 + $0x3c0] sm:$0xff]  ;;  %v400_v10 = vld [vmem:[#allocation2 + $0x370] sm:$0xff] }
  0x34   : > { %612 = vmatpush.msra.mxu0 %v317_v48  ;;  %652 = vmatpush.msra.mxu2 %v318_v49  ;;  %v563_v9 = vld [vmem:[#allocation2 + $0x888] sm:$0xff]  ;;  %v553_v11 = vld [vmem:[#allocation2 + $0x838] sm:$0xff]  ;;  %v554_v13 = vld [vmem:[#allocation2 + $0x840] sm:$0xff] }
  0x35   : > { %632 = vmatpush.msra.mxu1 %v461_v50  ;;  %672 = vmatpush.msra.mxu3 %v462_v51  ;;  %v401_v12 = vld [vmem:[#allocation2 + $0x378] sm:$0xff]  ;;  %v391_v14 = vld [vmem:[#allocation2 + $0x328] sm:$0xff]  ;;  %v544_v15 = vld [vmem:[#allocation2 + $0x7f0] sm:$0xff] }
  0x36   : > { %613 = vmatpush.msra.mxu0 %v308_v52  ;;  %653 = vmatpush.msra.mxu2 %v309_v53  ;;  %v392_v16 = vld [vmem:[#allocation2 + $0x330] sm:$0xff]  ;;  %v545_v17 = vld [vmem:[#allocation2 + $0x7f8] sm:$0xff]  ;;  %v382_v18 = vld [vmem:[#allocation2 + $0x2e0] sm:$0xff] }
  0x37   : > { %633 = vmatpush.msra.mxu1 %v452_v54  ;;  %673 = vmatpush.msra.mxu3 %v453_v55  ;;  %v535_v19 = vld [vmem:[#allocation2 + $0x7a8] sm:$0xff]  ;;  %v536_v21 = vld [vmem:[#allocation2 + $0x7b0] sm:$0xff]  ;;  %v373_v22 = vld [vmem:[#allocation2 + $0x298] sm:$0xff] }
  0x38   : > { %614 = vmatpush.msra.mxu0 %v299_v56  ;;  %654 = vmatpush.msra.mxu2 %v300_v57  ;;  %v383_v20 = vld [vmem:[#allocation2 + $0x2e8] sm:$0xff]  ;;  %v526_v23 = vld [vmem:[#allocation2 + $0x760] sm:$0xff]  ;;  %v364_v26 = vld [vmem:[#allocation2 + $0x250] sm:$0xff] }
  0x39   : > { %634 = vmatpush.msra.mxu1 %v443_v58  ;;  %674 = vmatpush.msra.mxu3 %v444_v59  ;;  %v374_v24 = vld [vmem:[#allocation2 + $0x2a0] sm:$0xff]  ;;  %v527_v25 = vld [vmem:[#allocation2 + $0x768] sm:$0xff]  ;;  %v517_v27 = vld [vmem:[#allocation2 + $0x718] sm:$0xff] }
  0x3a   : > { %615 = vmatpush.msra.mxu0 %v290_v60  ;;  %655 = vmatpush.msra.mxu2 %v291_v61  ;;  %v365_v28 = vld [vmem:[#allocation2 + $0x258] sm:$0xff]  ;;  %v518_v29 = vld [vmem:[#allocation2 + $0x720] sm:$0xff]  ;;  %v355_v30 = vld [vmem:[#allocation2 + $0x208] sm:$0xff] }
  0x3b   : > { %635 = vmatpush.msra.mxu1 %v434_v0  ;;  %675 = vmatpush.msra.mxu3 %v435_v1  ;;  %v508_v31 = vld [vmem:[#allocation2 + $0x6d0] sm:$0xff]  ;;  %v509_v33 = vld [vmem:[#allocation2 + $0x6d8] sm:$0xff]  ;;  %v346_v34 = vld [vmem:[#allocation2 + $0x1c0] sm:$0xff] }
  0x3c   : > { %680 = vmatpush.msrb.mxu0 %v427_v62  ;;  %720 = vmatpush.msrb.mxu2 %v428_v63  ;;  %v356_v32 = vld [vmem:[#allocation2 + $0x210] sm:$0xff]  ;;  %v499_v35 = vld [vmem:[#allocation2 + $0x688] sm:$0xff]  ;;  %v337_v38 = vld [vmem:[#allocation2 + $0x178] sm:$0xff] }
  0x3d   : > { %700 = vmatpush.msrb.mxu1 %v571_v3  ;;  %740 = vmatpush.msrb.mxu3 %v572_v5  ;;  %v347_v36 = vld [vmem:[#allocation2 + $0x1c8] sm:$0xff]  ;;  %v500_v37 = vld [vmem:[#allocation2 + $0x690] sm:$0xff]  ;;  %v490_v39 = vld [vmem:[#allocation2 + $0x640] sm:$0xff] }
  0x3e   : > { %681 = vmatpush.msrb.mxu0 %v418_v2  ;;  %721 = vmatpush.msrb.mxu2 %v419_v4  ;;  %v338_v40 = vld [vmem:[#allocation2 + $0x180] sm:$0xff]  ;;  %v491_v41 = vld [vmem:[#allocation2 + $0x648] sm:$0xff]  ;;  %v328_v42 = vld [vmem:[#allocation2 + $0x130] sm:$0xff] }
  0x3f   : > { %701 = vmatpush.msrb.mxu1 %v562_v7  ;;  %741 = vmatpush.msrb.mxu3 %v563_v9  ;;  %v481_v43 = vld [vmem:[#allocation2 + $0x5f8] sm:$0xff]  ;;  %v482_v45 = vld [vmem:[#allocation2 + $0x600] sm:$0xff]  ;;  %v319_v46 = vld [vmem:[#allocation2 + $0xe8] sm:$0xff] }
  0x40   : > { %682 = vmatpush.msrb.mxu0 %v409_v6  ;;  %722 = vmatpush.msrb.mxu2 %v410_v8  ;;  %v329_v44 = vld [vmem:[#allocation2 + $0x138] sm:$0xff]  ;;  %v472_v47 = vld [vmem:[#allocation2 + $0x5b0] sm:$0xff]  ;;  %v310_v50 = vld [vmem:[#allocation2 + $0xa0] sm:$0xff] }
  0x41   : > { %702 = vmatpush.msrb.mxu1 %v553_v11  ;;  %742 = vmatpush.msrb.mxu3 %v554_v13  ;;  %v320_v48 = vld [vmem:[#allocation2 + $0xf0] sm:$0xff]  ;;  %v473_v49 = vld [vmem:[#allocation2 + $0x5b8] sm:$0xff]  ;;  %v463_v51 = vld [vmem:[#allocation2 + $0x568] sm:$0xff] }
  0x42   : > { %683 = vmatpush.msrb.mxu0 %v400_v10  ;;  %723 = vmatpush.msrb.mxu2 %v401_v12  ;;  %v311_v52 = vld [vmem:[#allocation2 + $0xa8] sm:$0xff]  ;;  %v464_v53 = vld [vmem:[#allocation2 + $0x570] sm:$0xff]  ;;  %v4013_v54 = vld [vmem:[%s282_s26] sm:$0xff] }
  0x43   : > { %703 = vmatpush.msrb.mxu1 %v544_v15  ;;  %743 = vmatpush.msrb.mxu3 %v545_v17  ;;  %v301_v55 = vld [vmem:[#allocation2 + $0x58] sm:$0xff]  ;;  %v454_v56 = vld [vmem:[#allocation2 + $0x520] sm:$0xff]  ;;  %v455_v58 = vld [vmem:[#allocation2 + $0x528] sm:$0xff] }
  0x44   : > { %684 = vmatpush.msrb.mxu0 %v391_v14  ;;  %724 = vmatpush.msrb.mxu2 %v392_v16  ;;  %v302_v57 = vld [vmem:[#allocation2 + $0x60] sm:$0xff]  ;;  %v292_v59 = vld [vmem:[#allocation2 + $0x10] sm:$0xff]  ;;  %v4016_v60 = vld [vmem:[%s282_s26 + $0x8] sm:$0xff] }
  0x45   : > { %704 = vmatpush.msrb.mxu1 %v535_v19  ;;  %744 = vmatpush.msrb.mxu3 %v536_v21  ;;  %v445_v61 = vld [vmem:[#allocation2 + $0x4d8] sm:$0xff]  ;;  %v446_v63 = vld [vmem:[#allocation2 + $0x4e0] sm:$0xff]  ;;  %v436_v2 = vld [vmem:[#allocation2 + $0x490] sm:$0xff] }
  0x46   : > { %685 = vmatpush.msrb.mxu0 %v382_v18  ;;  %725 = vmatpush.msrb.mxu2 %v383_v20  ;;  %v293_v62 = vld [vmem:[#allocation2 + $0x18] sm:$0xff]  ;;  %v430_v0 = vld [vmem:[#allocation2 + $0x460] sm:$0xff]  ;;  %v420_v4 = vld [vmem:[#allocation2 + $0x410] sm:$0xff] }
  0x47   : > { %705 = vmatpush.msrb.mxu1 %v526_v23  ;;  %745 = vmatpush.msrb.mxu3 %v527_v25  ;;  %v429_v1 = vld [vmem:[#allocation2 + $0x458] sm:$0xff]  ;;  %v574_v7 = vld [vmem:[#allocation2 + $0x8e0] sm:$0xff]  ;;  %v411_v8 = vld [vmem:[#allocation2 + $0x3c8] sm:$0xff] }
  0x48   : > { %686 = vmatpush.msrb.mxu0 %v373_v22  ;;  %726 = vmatpush.msrb.mxu2 %v374_v24  ;;  %v437_v3 = vld [vmem:[#allocation2 + $0x498] sm:$0xff]  ;;  %v564_v9 = vld [vmem:[#allocation2 + $0x890] sm:$0xff]  ;;  %v402_v12 = vld [vmem:[#allocation2 + $0x380] sm:$0xff] }
  0x49   : > { %706 = vmatpush.msrb.mxu1 %v517_v27  ;;  %746 = vmatpush.msrb.mxu3 %v518_v29  ;;  %v573_v5 = vld [vmem:[#allocation2 + $0x8d8] sm:$0xff]  ;;  %v412_v10 = vld [vmem:[#allocation2 + $0x3d0] sm:$0xff]  ;;  %v555_v13 = vld [vmem:[#allocation2 + $0x848] sm:$0xff] }
  0x4a   : > { %687 = vmatpush.msrb.mxu0 %v364_v26  ;;  %727 = vmatpush.msrb.mxu2 %v365_v28  ;;  %v421_v6 = vld [vmem:[#allocation2 + $0x418] sm:$0xff]  ;;  %v403_v14 = vld [vmem:[#allocation2 + $0x388] sm:$0xff]  ;;  %v556_v15 = vld [vmem:[#allocation2 + $0x850] sm:$0xff] }
  0x4b   : > { %707 = vmatpush.msrb.mxu1 %v508_v31  ;;  %747 = vmatpush.msrb.mxu3 %v509_v33  ;;  %v565_v11 = vld [vmem:[#allocation2 + $0x898] sm:$0xff]  ;;  %v546_v17 = vld [vmem:[#allocation2 + $0x800] sm:$0xff]  ;;  %v547_v19 = vld [vmem:[#allocation2 + $0x808] sm:$0xff] }
  0x4c   : > { %688 = vmatpush.msrb.mxu0 %v355_v30  ;;  %728 = vmatpush.msrb.mxu2 %v356_v32  ;;  %v393_v16 = vld [vmem:[#allocation2 + $0x338] sm:$0xff]  ;;  %v394_v18 = vld [vmem:[#allocation2 + $0x340] sm:$0xff]  ;;  %v384_v21 = vld [vmem:[#allocation2 + $0x2f0] sm:$0xff] }
  0x4d   : > { %708 = vmatpush.msrb.mxu1 %v499_v35  ;;  %748 = vmatpush.msrb.mxu3 %v500_v37  ;;  %v537_v20 = vld [vmem:[#allocation2 + $0x7b8] sm:$0xff]  ;;  %v538_v23 = vld [vmem:[#allocation2 + $0x7c0] sm:$0xff]  ;;  %v375_v24 = vld [vmem:[#allocation2 + $0x2a8] sm:$0xff] }
  0x4e   : > { %689 = vmatpush.msrb.mxu0 %v346_v34  ;;  %729 = vmatpush.msrb.mxu2 %v347_v36  ;;  %v385_v22 = vld [vmem:[#allocation2 + $0x2f8] sm:$0xff]  ;;  %v528_v25 = vld [vmem:[#allocation2 + $0x770] sm:$0xff]  ;;  %v366_v28 = vld [vmem:[#allocation2 + $0x260] sm:$0xff] }
  0x4f   : > { %709 = vmatpush.msrb.mxu1 %v490_v39  ;;  %749 = vmatpush.msrb.mxu3 %v491_v41  ;;  %v376_v26 = vld [vmem:[#allocation2 + $0x2b0] sm:$0xff]  ;;  %v529_v27 = vld [vmem:[#allocation2 + $0x778] sm:$0xff]  ;;  %v519_v29 = vld [vmem:[#allocation2 + $0x728] sm:$0xff] }
  0x50   : > { %690 = vmatpush.msrb.mxu0 %v337_v38  ;;  %730 = vmatpush.msrb.mxu2 %v338_v40  ;;  %v367_v30 = vld [vmem:[#allocation2 + $0x268] sm:$0xff]  ;;  %v520_v31 = vld [vmem:[#allocation2 + $0x730] sm:$0xff]  ;;  %v357_v32 = vld [vmem:[#allocation2 + $0x218] sm:$0xff] }
  0x51   : > { %710 = vmatpush.msrb.mxu1 %v481_v43  ;;  %750 = vmatpush.msrb.mxu3 %v482_v45  ;;  %v510_v33 = vld [vmem:[#allocation2 + $0x6e0] sm:$0xff]  ;;  %v511_v35 = vld [vmem:[#allocation2 + $0x6e8] sm:$0xff]  ;;  %v348_v36 = vld [vmem:[#allocation2 + $0x1d0] sm:$0xff] }
  0x52   : > { %691 = vmatpush.msrb.mxu0 %v328_v42  ;;  %731 = vmatpush.msrb.mxu2 %v329_v44  ;;  %v358_v34 = vld [vmem:[#allocation2 + $0x220] sm:$0xff]  ;;  %v501_v37 = vld [vmem:[#allocation2 + $0x698] sm:$0xff]  ;;  %v339_v40 = vld [vmem:[#allocation2 + $0x188] sm:$0xff] }
  0x53   : > { %711 = vmatpush.msrb.mxu1 %v472_v47  ;;  %751 = vmatpush.msrb.mxu3 %v473_v49  ;;  %v349_v38 = vld [vmem:[#allocation2 + $0x1d8] sm:$0xff]  ;;  %v502_v39 = vld [vmem:[#allocation2 + $0x6a0] sm:$0xff]  ;;  %v492_v41 = vld [vmem:[#allocation2 + $0x650] sm:$0xff] }
  0x54   : > { %692 = vmatpush.msrb.mxu0 %v319_v46  ;;  %732 = vmatpush.msrb.mxu2 %v320_v48  ;;  %v340_v42 = vld [vmem:[#allocation2 + $0x190] sm:$0xff]  ;;  %v493_v43 = vld [vmem:[#allocation2 + $0x658] sm:$0xff]  ;;  %v330_v44 = vld [vmem:[#allocation2 + $0x140] sm:$0xff] }
  0x55   : > { %712 = vmatpush.msrb.mxu1 %v463_v51  ;;  %752 = vmatpush.msrb.mxu3 %v464_v53  ;;  %v483_v45 = vld [vmem:[#allocation2 + $0x608] sm:$0xff]  ;;  %v484_v47 = vld [vmem:[#allocation2 + $0x610] sm:$0xff]  ;;  %v321_v48 = vld [vmem:[#allocation2 + $0xf8] sm:$0xff] }
  0x56   : > { %693 = vmatpush.msrb.mxu0 %v310_v50  ;;  %733 = vmatpush.msrb.mxu2 %v311_v52  ;;  %v331_v46 = vld [vmem:[#allocation2 + $0x148] sm:$0xff]  ;;  %v474_v49 = vld [vmem:[#allocation2 + $0x5c0] sm:$0xff]  ;;  %v312_v52 = vld [vmem:[#allocation2 + $0xb0] sm:$0xff] }
  0x57   : > { %656 = vmatmul.f32.vlgmr.msra.gmra.mxu2 %v4013_v54  ;;  %713 = vmatpush.msrb.mxu1 %v454_v56  ;;  %v322_v50 = vld [vmem:[#allocation2 + $0x100] sm:$0xff]  ;;  %v475_v51 = vld [vmem:[#allocation2 + $0x5c8] sm:$0xff]  ;;  %v465_v53 = vld [vmem:[#allocation2 + $0x578] sm:$0xff] }
  0x58   : > { %694 = vmatpush.msrb.mxu0 %v301_v55  ;;  %734 = vmatpush.msrb.mxu2 %v302_v57  ;;  %v313_v55 = vld [vmem:[#allocation2 + $0xb8] sm:$0xff]  ;;  %v466_v56 = vld [vmem:[#allocation2 + $0x580] sm:$0xff]  ;;  %v303_v57 = vld [vmem:[#allocation2 + $0x68] sm:$0xff] }
  0x59   : > { %753 = vmatpush.msrb.mxu3 %v455_v58  ;;  %714 = vmatpush.msrb.mxu1 %v445_v61  ;;  %v456_v58 = vld [vmem:[#allocation2 + $0x530] sm:$0xff]  ;;  %v457_v61 = vld [vmem:[#allocation2 + $0x538] sm:$0xff] }
  0x5a   : > { %695 = vmatpush.msrb.mxu0 %v292_v59  ;;  %676 = vmatmul.f32.vlgmr.msra.gmra.mxu3 %v4016_v60  ;;  %v304_v59 = vld [vmem:[#allocation2 + $0x70] sm:$0xff] }
  0x5b   : > { %735 = vmatpush.msrb.mxu2 %v293_v62  ;;  %754 = vmatpush.msrb.mxu3 %v446_v63  ;;  %v294_v62 = vld [vmem:[#allocation2 + $0x20] sm:$0xff]  ;;  %v447_v63 = vld [vmem:[#allocation2 + $0x4e8] sm:$0xff] }
  0x5c   : > { %616 = vmatmul.f32.vlgmr.msra.gmra.mxu0 %v4013_v54  ;;  %715 = vmatpush.msrb.mxu1 %v436_v2  ;;  %v431_v2 = vld [vmem:[#allocation2 + $0x468] sm:$0xff] }
  0x5d   : > { %800 = vmatpush.msra.mxu2 %v430_v0  ;;  %760 = vmatpush.msra.mxu0 %v429_v1  ;;  %v295_v0 = vld [vmem:[#allocation2 + $0x28] sm:$0xff]  ;;  %v448_v1 = vld [vmem:[#allocation2 + $0x4f0] sm:$0xff] }
  0x5e   : > { %755 = vmatpush.msrb.mxu3 %v437_v3  ;;  %636 = vmatmul.f32.vlgmr.msra.gmra.mxu1 %v4016_v60  ;;  %v432_v3 = vld [vmem:[#allocation2 + $0x470] sm:$0xff] }
  0x5f   : > { %761 = vmatpush.msra.mxu0 %v420_v4  ;;  %780 = vmatpush.msra.mxu1 %v573_v5  ;;  %v438_v4 = vld [vmem:[#allocation2 + $0x4a0] sm:$0xff]  ;;  %v439_v5 = vld [vmem:[#allocation2 + $0x4a8] sm:$0xff] }
  0x60   : > { %801 = vmatpush.msra.mxu2 %v421_v6  ;;  %820 = vmatpush.msra.mxu3 %v574_v7  ;;  %v422_v6 = vld [vmem:[#allocation2 + $0x420] sm:$0xff]  ;;  %v575_v7 = vld [vmem:[#allocation2 + $0x8e8] sm:$0xff] }
  0x61   : > { %762 = vmatpush.msra.mxu0 %v411_v8  ;;  %781 = vmatpush.msra.mxu1 %v564_v9  ;;  %v423_v8 = vld [vmem:[#allocation2 + $0x428] sm:$0xff]  ;;  %v576_v9 = vld [vmem:[#allocation2 + $0x8f0] sm:$0xff] }
  0x62   : > { %802 = vmatpush.msra.mxu2 %v412_v10  ;;  %821 = vmatpush.msra.mxu3 %v565_v11  ;;  %v413_v10 = vld [vmem:[#allocation2 + $0x3d8] sm:$0xff]  ;;  %v566_v11 = vld [vmem:[#allocation2 + $0x8a0] sm:$0xff] }
  0x63   : > { %736 = vmatmul.f32.vlgmr.msrb.gmra.mxu2 %v4013_v54  ;;  %763 = vmatpush.msra.mxu0 %v402_v12  ;;  %v414_v12 = vld [vmem:[#allocation2 + $0x3e0] sm:$0xff] }
  0x64   : > { %782 = vmatpush.msra.mxu1 %v555_v13  ;;  %803 = vmatpush.msra.mxu2 %v403_v14  ;;  %v567_v13 = vld [vmem:[#allocation2 + $0x8a8] sm:$0xff]  ;;  %v404_v14 = vld [vmem:[#allocation2 + $0x390] sm:$0xff] }
  0x65   : > { %822 = vmatpush.msra.mxu3 %v556_v15  ;;  %764 = vmatpush.msra.mxu0 %v393_v16  ;;  %v557_v15 = vld [vmem:[#allocation2 + $0x858] sm:$0xff] }
  0x66   : > { %756 = vmatmul.f32.vlgmr.msrb.gmra.mxu3 %v4016_v60  ;;  %783 = vmatpush.msra.mxu1 %v546_v17  ;;  %v405_v16 = vld [vmem:[#allocation2 + $0x398] sm:$0xff]  ;;  %v558_v17 = vld [vmem:[#allocation2 + $0x860] sm:$0xff] }
  0x67   : > { %804 = vmatpush.msra.mxu2 %v394_v18  ;;  %823 = vmatpush.msra.mxu3 %v547_v19  ;;  %v395_v18 = vld [vmem:[#allocation2 + $0x348] sm:$0xff]  ;;  %v548_v19 = vld [vmem:[#allocation2 + $0x810] sm:$0xff] }
  0x68   : > { %696 = vmatmul.f32.vlgmr.msrb.gmra.mxu0 %v4013_v54  ;;  %784 = vmatpush.msra.mxu1 %v537_v20  ;;  %v396_v20 = vld [vmem:[#allocation2 + $0x350] sm:$0xff] }
  0x69   : > { %765 = vmatpush.msra.mxu0 %v384_v21  ;;  %805 = vmatpush.msra.mxu2 %v385_v22  ;;  %v549_v21 = vld [vmem:[#allocation2 + $0x818] sm:$0xff]  ;;  %v386_v22 = vld [vmem:[#allocation2 + $0x300] sm:$0xff] }
  0x6a   : > { %824 = vmatpush.msra.mxu3 %v538_v23  ;;  %716 = vmatmul.f32.vlgmr.msrb.gmra.mxu1 %v4016_v60  ;;  %v539_v23 = vld [vmem:[#allocation2 + $0x7c8] sm:$0xff] }
  0x6b   : > { %766 = vmatpush.msra.mxu0 %v375_v24  ;;  %785 = vmatpush.msra.mxu1 %v528_v25  ;;  %v387_v24 = vld [vmem:[#allocation2 + $0x308] sm:$0xff]  ;;  %v540_v25 = vld [vmem:[#allocation2 + $0x7d0] sm:$0xff] }
  0x6c   : > { %806 = vmatpush.msra.mxu2 %v376_v26  ;;  %825 = vmatpush.msra.mxu3 %v529_v27  ;;  %v377_v26 = vld [vmem:[#allocation2 + $0x2b8] sm:$0xff]  ;;  %v530_v27 = vld [vmem:[#allocation2 + $0x780] sm:$0xff] }
  0x6d   : > { %767 = vmatpush.msra.mxu0 %v366_v28  ;;  %786 = vmatpush.msra.mxu1 %v519_v29  ;;  %v378_v28 = vld [vmem:[#allocation2 + $0x2c0] sm:$0xff]  ;;  %v531_v29 = vld [vmem:[#allocation2 + $0x788] sm:$0xff] }
  0x6e   : > { %807 = vmatpush.msra.mxu2 %v367_v30  ;;  %826 = vmatpush.msra.mxu3 %v520_v31  ;;  %v368_v30 = vld [vmem:[#allocation2 + $0x270] sm:$0xff]  ;;  %v521_v31 = vld [vmem:[#allocation2 + $0x738] sm:$0xff] }
  0x6f   : > { %768 = vmatpush.msra.mxu0 %v357_v32  ;;  %787 = vmatpush.msra.mxu1 %v510_v33  ;;  %v369_v32 = vld [vmem:[#allocation2 + $0x278] sm:$0xff]  ;;  %v522_v33 = vld [vmem:[#allocation2 + $0x740] sm:$0xff] }
  0x70   : > { %808 = vmatpush.msra.mxu2 %v358_v34  ;;  %827 = vmatpush.msra.mxu3 %v511_v35  ;;  %v359_v34 = vld [vmem:[#allocation2 + $0x228] sm:$0xff]  ;;  %v512_v35 = vld [vmem:[#allocation2 + $0x6f0] sm:$0xff] }
  0x71   : > { %769 = vmatpush.msra.mxu0 %v348_v36  ;;  %788 = vmatpush.msra.mxu1 %v501_v37  ;;  %v360_v36 = vld [vmem:[#allocation2 + $0x230] sm:$0xff]  ;;  %v513_v37 = vld [vmem:[#allocation2 + $0x6f8] sm:$0xff] }
  0x72   : > { %809 = vmatpush.msra.mxu2 %v349_v38  ;;  %828 = vmatpush.msra.mxu3 %v502_v39  ;;  %v350_v38 = vld [vmem:[#allocation2 + $0x1e0] sm:$0xff]  ;;  %v503_v39 = vld [vmem:[#allocation2 + $0x6a8] sm:$0xff] }
  0x73   : > { %770 = vmatpush.msra.mxu0 %v339_v40  ;;  %789 = vmatpush.msra.mxu1 %v492_v41  ;;  %v351_v40 = vld [vmem:[#allocation2 + $0x1e8] sm:$0xff]  ;;  %v504_v41 = vld [vmem:[#allocation2 + $0x6b0] sm:$0xff] }
  0x74   : > { %810 = vmatpush.msra.mxu2 %v340_v42  ;;  %829 = vmatpush.msra.mxu3 %v493_v43  ;;  %v341_v42 = vld [vmem:[#allocation2 + $0x198] sm:$0xff]  ;;  %v494_v43 = vld [vmem:[#allocation2 + $0x660] sm:$0xff] }
  0x75   : > { %771 = vmatpush.msra.mxu0 %v330_v44  ;;  %790 = vmatpush.msra.mxu1 %v483_v45  ;;  %v342_v44 = vld [vmem:[#allocation2 + $0x1a0] sm:$0xff]  ;;  %v495_v45 = vld [vmem:[#allocation2 + $0x668] sm:$0xff] }
  0x76   : > { %811 = vmatpush.msra.mxu2 %v331_v46  ;;  %830 = vmatpush.msra.mxu3 %v484_v47  ;;  %v332_v46 = vld [vmem:[#allocation2 + $0x150] sm:$0xff]  ;;  %v485_v47 = vld [vmem:[#allocation2 + $0x618] sm:$0xff] }
  0x77   : > { %772 = vmatpush.msra.mxu0 %v321_v48  ;;  %791 = vmatpush.msra.mxu1 %v474_v49  ;;  %v333_v48 = vld [vmem:[#allocation2 + $0x158] sm:$0xff]  ;;  %v486_v49 = vld [vmem:[#allocation2 + $0x620] sm:$0xff] }
  0x78   : > { %812 = vmatpush.msra.mxu2 %v322_v50  ;;  %831 = vmatpush.msra.mxu3 %v475_v51  ;;  %v323_v50 = vld [vmem:[#allocation2 + $0x108] sm:$0xff]  ;;  %v476_v51 = vld [vmem:[#allocation2 + $0x5d0] sm:$0xff] }
  0x79   : > { %773 = vmatpush.msra.mxu0 %v312_v52  ;;  %792 = vmatpush.msra.mxu1 %v465_v53  ;;  %v324_v52 = vld [vmem:[#allocation2 + $0x110] sm:$0xff]  ;;  %v477_v53 = vld [vmem:[#allocation2 + $0x5d8] sm:$0xff] }
  0x7a   : > { %813 = vmatpush.msra.mxu2 %v313_v55  ;;  %832 = vmatpush.msra.mxu3 %v466_v56  ;;  %v314_v55 = vld [vmem:[#allocation2 + $0xc0] sm:$0xff]  ;;  %v467_v56 = vld [vmem:[#allocation2 + $0x588] sm:$0xff] }
  0x7b   : > { %774 = vmatpush.msra.mxu0 %v303_v57  ;;  %793 = vmatpush.msra.mxu1 %v456_v58  ;;  %v315_v57 = vld [vmem:[#allocation2 + $0xc8] sm:$0xff]  ;;  %v468_v58 = vld [vmem:[#allocation2 + $0x590] sm:$0xff] }
  0x7c   : > { %814 = vmatpush.msra.mxu2 %v304_v59  ;;  %833 = vmatpush.msra.mxu3 %v457_v61  ;;  %v305_v59 = vld [vmem:[#allocation2 + $0x78] sm:$0xff]  ;;  %v458_v61 = vld [vmem:[#allocation2 + $0x540] sm:$0xff] }
  0x7d   : > { %775 = vmatpush.msra.mxu0 %v294_v62  ;;  %794 = vmatpush.msra.mxu1 %v447_v63  ;;  %v306_v62 = vld [vmem:[#allocation2 + $0x80] sm:$0xff]  ;;  %v459_v63 = vld [vmem:[#allocation2 + $0x548] sm:$0xff] }
  0x7e   : > { %815 = vmatpush.msra.mxu2 %v295_v0  ;;  %834 = vmatpush.msra.mxu3 %v448_v1  ;;  %v296_v0 = vld [vmem:[#allocation2 + $0x30] sm:$0xff]  ;;  %v449_v1 = vld [vmem:[#allocation2 + $0x4f8] sm:$0xff] }
  0x7f   : > { %776 = vmatmul.f32.vlgmr.msra.gmra.mxu0 %v4013_v54  ;;  %816 = vmatmul.f32.vlgmr.msra.gmra.mxu2 %v4013_v54 }
  0x80   : > { %840 = vmatpush.msrb.mxu0 %v431_v2  ;;  %880 = vmatpush.msrb.mxu2 %v432_v3  ;;  %v297_v2 = vld [vmem:[#allocation2 + $0x38] sm:$0xff]  ;;  %v450_v3 = vld [vmem:[#allocation2 + $0x500] sm:$0xff] }
  0x81   : > { %795 = vmatpush.msra.mxu1 %v438_v4  ;;  %835 = vmatpush.msra.mxu3 %v439_v5  ;;  %v433_v4 = vld [vmem:[#allocation2 + $0x478] sm:$0xff]  ;;  %v440_v5 = vld [vmem:[#allocation2 + $0x4b0] sm:$0xff] }
  0x82   : > { %796 = vmatmul.f32.vlgmr.msra.gmra.mxu1 %v4016_v60  ;;  %836 = vmatmul.f32.vlgmr.msra.gmra.mxu3 %v4016_v60 }
  0x83   : > { %841 = vmatpush.msrb.mxu0 %v422_v6  ;;  %860 = vmatpush.msrb.mxu1 %v575_v7  ;;  %v441_v6 = vld [vmem:[#allocation2 + $0x4b8] sm:$0xff]  ;;  %v424_v7 = vld [vmem:[#allocation2 + $0x430] sm:$0xff] }
  0x84   : > { %881 = vmatpush.msrb.mxu2 %v423_v8  ;;  %900 = vmatpush.msrb.mxu3 %v576_v9  ;;  %v577_v8 = vld [vmem:[#allocation2 + $0x8f8] sm:$0xff]  ;;  %v1217_v9 = vld [vmem:[#allocation6 + $0x7c0] sm:$0xff] }
  0x85   : > { %842 = vmatpush.msrb.mxu0 %v413_v10  ;;  %861 = vmatpush.msrb.mxu1 %v566_v11  ;;  %v415_v10 = vld [vmem:[#allocation2 + $0x3e8] sm:$0xff]  ;;  %v568_v11 = vld [vmem:[#allocation2 + $0x8b0] sm:$0xff] }
  0x86   : > { %882 = vmatpush.msrb.mxu2 %v414_v12  ;;  %901 = vmatpush.msrb.mxu3 %v567_v13  ;;  %v1209_v12 = vld [vmem:[#allocation6 + $0x780] sm:$0xff]  ;;  %v406_v13 = vld [vmem:[#allocation2 + $0x3a0] sm:$0xff] }
  0x87   : > { %843 = vmatpush.msrb.mxu0 %v404_v14  ;;  %862 = vmatpush.msrb.mxu1 %v557_v15  ;;  %v1089_v14 = vld [vmem:[#allocation6 + $0x3c0] sm:$0xff] }
  0x88   : > { %883 = vmatpush.msrb.mxu2 %v405_v16  ;;  %902 = vmatpush.msrb.mxu3 %v558_v17  ;;  %v559_v15 = vld [vmem:[#allocation2 + $0x868] sm:$0xff] }
  0x89   : > { %844 = vmatpush.msrb.mxu0 %v395_v18  ;;  %863 = vmatpush.msrb.mxu1 %v548_v19  ;;  %v1201_v16 = vld [vmem:[#allocation6 + $0x740] sm:$0xff]  ;;  %v397_v18 = vld [vmem:[#allocation2 + $0x358] sm:$0xff] }
  0x8a   : > { %884 = vmatpush.msrb.mxu2 %v396_v20  ;;  %903 = vmatpush.msrb.mxu3 %v549_v21  ;;  %v1081_v17 = vld [vmem:[#allocation6 + $0x380] sm:$0xff]  ;;  %v550_v20 = vld [vmem:[#allocation2 + $0x820] sm:$0xff] }
  0x8b   : > { %845 = vmatpush.msrb.mxu0 %v386_v22  ;;  %864 = vmatpush.msrb.mxu1 %v539_v23  ;;  %v1073_v19 = vld [vmem:[#allocation6 + $0x340] sm:$0xff] }
  0x8c   : > { %885 = vmatpush.msrb.mxu2 %v387_v24  ;;  %904 = vmatpush.msrb.mxu3 %v540_v25  ;;  %v1193_v21 = vld [vmem:[#allocation6 + $0x700] sm:$0xff]  ;;  %v541_v24 = vld [vmem:[#allocation2 + $0x7d8] sm:$0xff] }
  0x8d   : > { %846 = vmatpush.msrb.mxu0 %v377_v26  ;;  %865 = vmatpush.msrb.mxu1 %v530_v27  ;;  %v388_v22 = vld [vmem:[#allocation2 + $0x310] sm:$0xff]  ;;  %v379_v26 = vld [vmem:[#allocation2 + $0x2c8] sm:$0xff] }
  0x8e   : > { %886 = vmatpush.msrb.mxu2 %v378_v28  ;;  %905 = vmatpush.msrb.mxu3 %v531_v29  ;;  %v1065_v23 = vld [vmem:[#allocation6 + $0x300] sm:$0xff] }
  0x8f   : > { %847 = vmatpush.msrb.mxu0 %v368_v30  ;;  %866 = vmatpush.msrb.mxu1 %v521_v31  ;;  %v1185_v25 = vld [vmem:[#allocation6 + $0x6c0] sm:$0xff]  ;;  %v370_v30 = vld [vmem:[#allocation2 + $0x280] sm:$0xff] }
  0x90   : > { %887 = vmatpush.msrb.mxu2 %v369_v32  ;;  %906 = vmatpush.msrb.mxu3 %v522_v33  ;;  %v1057_v27 = vld [vmem:[#allocation6 + $0x2c0] sm:$0xff] }
  0x91   : > { %848 = vmatpush.msrb.mxu0 %v359_v34  ;;  %867 = vmatpush.msrb.mxu1 %v512_v35  ;;  %v532_v28 = vld [vmem:[#allocation2 + $0x790] sm:$0xff]  ;;  %v523_v32 = vld [vmem:[#allocation2 + $0x748] sm:$0xff]  ;;  %v361_v34 = vld [vmem:[#allocation2 + $0x238] sm:$0xff] }
  0x92   : > { %888 = vmatpush.msrb.mxu2 %v360_v36  ;;  %907 = vmatpush.msrb.mxu3 %v513_v37  ;;  %v1177_v29 = vld [vmem:[#allocation6 + $0x680] sm:$0xff]  ;;  %v514_v36 = vld [vmem:[#allocation2 + $0x700] sm:$0xff] }
  0x93   : > { %849 = vmatpush.msrb.mxu0 %v350_v38  ;;  %868 = vmatpush.msrb.mxu1 %v503_v39  ;;  %v1049_v31 = vld [vmem:[#allocation6 + $0x280] sm:$0xff] }
  0x94   : > { %889 = vmatpush.msrb.mxu2 %v351_v40  ;;  %908 = vmatpush.msrb.mxu3 %v504_v41  ;;  %v1169_v33 = vld [vmem:[#allocation6 + $0x640] sm:$0xff]  ;;  %v505_v40 = vld [vmem:[#allocation2 + $0x6b8] sm:$0xff] }
  0x95   : > { %850 = vmatpush.msrb.mxu0 %v341_v42  ;;  %869 = vmatpush.msrb.mxu1 %v494_v43  ;;  %v1041_v35 = vld [vmem:[#allocation6 + $0x240] sm:$0xff] }
  0x96   : > { %890 = vmatpush.msrb.mxu2 %v342_v44  ;;  %909 = vmatpush.msrb.mxu3 %v495_v45  ;;  %v1161_v37 = vld [vmem:[#allocation6 + $0x600] sm:$0xff] }
  0x97   : > { %851 = vmatpush.msrb.mxu0 %v332_v46  ;;  %870 = vmatpush.msrb.mxu1 %v485_v47  ;;  %v352_v38 = vld [vmem:[#allocation2 + $0x1f0] sm:$0xff]  ;;  %v343_v42 = vld [vmem:[#allocation2 + $0x1a8] sm:$0xff]  ;;  %v334_v46 = vld [vmem:[#allocation2 + $0x160] sm:$0xff] }
  0x98   : > { %891 = vmatpush.msrb.mxu2 %v333_v48  ;;  %910 = vmatpush.msrb.mxu3 %v486_v49  ;;  %v1033_v39 = vld [vmem:[#allocation6 + $0x200] sm:$0xff] }
  0x99   : > { %852 = vmatpush.msrb.mxu0 %v323_v50  ;;  %871 = vmatpush.msrb.mxu1 %v476_v51  ;;  %v1153_v41 = vld [vmem:[#allocation6 + $0x5c0] sm:$0xff]  ;;  %v325_v50 = vld [vmem:[#allocation2 + $0x118] sm:$0xff] }
  0x9a   : > { %892 = vmatpush.msrb.mxu2 %v324_v52  ;;  %911 = vmatpush.msrb.mxu3 %v477_v53  ;;  %v1025_v43 = vld [vmem:[#allocation6 + $0x1c0] sm:$0xff]  ;;  %v478_v52 = vld [vmem:[#allocation2 + $0x5e0] sm:$0xff] }
  0x9b   : > { %853 = vmatpush.msrb.mxu0 %v314_v55  ;;  %872 = vmatpush.msrb.mxu1 %v467_v56  ;;  %v496_v44 = vld [vmem:[#allocation2 + $0x670] sm:$0xff]  ;;  %v487_v48 = vld [vmem:[#allocation2 + $0x628] sm:$0xff] }
  0x9c   : > { %893 = vmatpush.msrb.mxu2 %v315_v57  ;;  %912 = vmatpush.msrb.mxu3 %v468_v58  ;;  %v1145_v45 = vld [vmem:[#allocation6 + $0x580] sm:$0xff]  ;;  %v469_v57 = vld [vmem:[#allocation2 + $0x598] sm:$0xff] }
  0x9d   : > { %854 = vmatpush.msrb.mxu0 %v305_v59  ;;  %873 = vmatpush.msrb.mxu1 %v458_v61  ;;  %v1017_v47 = vld [vmem:[#allocation6 + $0x180] sm:$0xff] }
  0x9e   : > { %894 = vmatpush.msrb.mxu2 %v306_v62  ;;  %913 = vmatpush.msrb.mxu3 %v459_v63  ;;  %v1137_v49 = vld [vmem:[#allocation6 + $0x540] sm:$0xff] }
  0x9f   : > { %855 = vmatpush.msrb.mxu0 %v296_v0  ;;  %874 = vmatpush.msrb.mxu1 %v449_v1  ;;  %v1009_v51 = vld [vmem:[#allocation6 + $0x140] sm:$0xff]  ;;  %v298_v0 = vld [vmem:[#allocation2 + $0x40] sm:$0xff] }
  0xa0   : > { %895 = vmatpush.msrb.mxu2 %v297_v2  ;;  %914 = vmatpush.msrb.mxu3 %v450_v3  ;;  %v1129_v53 = vld [vmem:[#allocation6 + $0x500] sm:$0xff] }
  0xa1   : > { %856 = vmatmul.f32.vlgmr.msrb.gmra.mxu0 %v4013_v54  ;;  %896 = vmatmul.f32.vlgmr.msrb.gmra.mxu2 %v4013_v54  ;;  %v316_v55 = vld [vmem:[#allocation2 + $0xd0] sm:$0xff]  ;;  %v307_v59 = vld [vmem:[#allocation2 + $0x88] sm:$0xff] }
  0xa2   : > { %920 = vmatpush.msra.mxu0 %v433_v4  ;;  %875 = vmatpush.msrb.mxu1 %v440_v5  ;;  %v1001_v56 = vld [vmem:[#allocation6 + $0x100] sm:$0xff]  ;;  %v442_v5 = vld [vmem:[#allocation2 + $0x4c0] sm:$0xff] }
  0xa3   : > { %915 = vmatpush.msrb.mxu3 %v441_v6  ;;  %876 = vmatmul.f32.vlgmr.msrb.gmra.mxu1 %v4016_v60  ;;  %v1121_v58 = vld [vmem:[#allocation6 + $0x4c0] sm:$0xff] }
  0xa4   : > { %916 = vmatmul.f32.vlgmr.msrb.gmra.mxu3 %v4016_v60  ;;  %921 = vmatpush.msra.mxu0 %v424_v7  ;;  %v993_v61 = vld [vmem:[#allocation6 + $0xc0] sm:$0xff] }
  0xa5   : > { %940 = vmatpush.msra.mxu1 %v577_v8  ;;  %2159 = vmatpush.msra.mxu3 %v1217_v9  ;;  %v460_v62 = vld [vmem:[#allocation2 + $0x550] sm:$0xff]  ;;  %v451_v1 = vld [vmem:[#allocation2 + $0x508] sm:$0xff] }
  0xa6   : > { %922 = vmatpush.msra.mxu0 %v415_v10  ;;  %2139 = vmatpush.msra.mxu2 %v1089_v14  ;;  %v1113_v63 = vld [vmem:[#allocation6 + $0x480] sm:$0xff] }
  0xa7   : > { %941 = vmatpush.msra.mxu1 %v568_v11  ;;  %2160 = vmatpush.msra.mxu3 %v1209_v12  ;;  %v985_v2 = vld [vmem:[#allocation6 + $0x80] sm:$0xff] }
  0xa8   : > { %923 = vmatpush.msra.mxu0 %v406_v13  ;;  %2140 = vmatpush.msra.mxu2 %v1081_v17  ;;  %v1345_v3 = vld [vmem:[#allocation6 + $0xbc0] sm:$0xff] }
  0xa9   : > { %942 = vmatpush.msra.mxu1 %v559_v15  ;;  %2161 = vmatpush.msra.mxu3 %v1201_v16  ;;  %v1105_v4 = vld [vmem:[#allocation6 + $0x440] sm:$0xff] }
  0xaa   : > { %924 = vmatpush.msra.mxu0 %v397_v18  ;;  %2141 = vmatpush.msra.mxu2 %v1073_v19  ;;  %v977_v6 = vld [vmem:[#allocation6 + $0x40] sm:$0xff] }
  0xab   : > { %943 = vmatpush.msra.mxu1 %v550_v20  ;;  %2162 = vmatpush.msra.mxu3 %v1193_v21  ;;  %v1337_v7 = vld [vmem:[#allocation6 + $0xb80] sm:$0xff] }
  0xac   : > { %925 = vmatpush.msra.mxu0 %v388_v22  ;;  %2142 = vmatpush.msra.mxu2 %v1065_v23  ;;  %v1097_v8 = vld [vmem:[#allocation6 + $0x400] sm:$0xff] }
  0xad   : > { %944 = vmatpush.msra.mxu1 %v541_v24  ;;  %2163 = vmatpush.msra.mxu3 %v1185_v25  ;;  %v1473_v9 = vld [vmem:[#allocation6 + $0xfc0] sm:$0xff] }
  0xae   : > { %926 = vmatpush.msra.mxu0 %v379_v26  ;;  %2143 = vmatpush.msra.mxu2 %v1057_v27  ;;  %v1329_v10 = vld [vmem:[#allocation6 + $0xb40] sm:$0xff] }
  0xaf   : > { %945 = vmatpush.msra.mxu1 %v532_v28  ;;  %2164 = vmatpush.msra.mxu3 %v1177_v29  ;;  %v1729_v11 = vld [vmem:[#allocation6 + $0x17c0] sm:$0xff] }
  0xb0   : > { %927 = vmatpush.msra.mxu0 %v370_v30  ;;  %2144 = vmatpush.msra.mxu2 %v1049_v31  ;;  %v1465_v12 = vld [vmem:[#allocation6 + $0xf80] sm:$0xff] }
  0xb1   : > { %946 = vmatpush.msra.mxu1 %v523_v32  ;;  %2165 = vmatpush.msra.mxu3 %v1169_v33  ;;  %v969_v13 = vld [vmem:[#allocation6] sm:$0xff] }
  0xb2   : > { %928 = vmatpush.msra.mxu0 %v361_v34  ;;  %2145 = vmatpush.msra.mxu2 %v1041_v35  ;;  %v1321_v14 = vld [vmem:[#allocation6 + $0xb00] sm:$0xff] }
  0xb3   : > { %947 = vmatpush.msra.mxu1 %v514_v36  ;;  %2166 = vmatpush.msra.mxu3 %v1161_v37  ;;  %v1721_v15 = vld [vmem:[#allocation6 + $0x1780] sm:$0xff] }
  0xb4   : > { %929 = vmatpush.msra.mxu0 %v352_v38  ;;  %2146 = vmatpush.msra.mxu2 %v1033_v39  ;;  %v1601_v16 = vld [vmem:[#allocation6 + $0x13c0] sm:$0xff] }
  0xb5   : > { %948 = vmatpush.msra.mxu1 %v505_v40  ;;  %2167 = vmatpush.msra.mxu3 %v1153_v41  ;;  %v1313_v17 = vld [vmem:[#allocation6 + $0xac0] sm:$0xff] }
  0xb6   : > { %930 = vmatpush.msra.mxu0 %v343_v42  ;;  %2147 = vmatpush.msra.mxu2 %v1025_v43  ;;  %v1713_v18 = vld [vmem:[#allocation6 + $0x1740] sm:$0xff]  ;;  %v4035_v42 = vld [vmem:[#allocation4] sm:$0xff] }
  0xb7   : > { %949 = vmatpush.msra.mxu1 %v496_v44  ;;  %2168 = vmatpush.msra.mxu3 %v1145_v45  ;;  %v1449_v19 = vld [vmem:[#allocation6 + $0xf00] sm:$0xff] }
  0xb8   : > { %931 = vmatpush.msra.mxu0 %v334_v46  ;;  %2148 = vmatpush.msra.mxu2 %v1017_v47  ;;  %v1593_v20 = vld [vmem:[#allocation6 + $0x1380] sm:$0xff]  ;;  %v582_v47 = vperm.slane %v4035_v42, 0 }
  0xb9   : > { %950 = vmatpush.msra.mxu1 %v487_v48  ;;  %2169 = vmatpush.msra.mxu3 %v1137_v49  ;;  %v1705_v21 = vld [vmem:[#allocation6 + $0x1700] sm:$0xff] }
  0xba   : > { %932 = vmatpush.msra.mxu0 %v325_v50  ;;  %2149 = vmatpush.msra.mxu2 %v1009_v51  ;;  %v1441_v22 = vld [vmem:[#allocation6 + $0xec0] sm:$0xff]  ;;  %v583_v51 = vperm.slane %v4035_v42, 1 }
  0xbb   : > { %951 = vmatpush.msra.mxu1 %v478_v52  ;;  %2170 = vmatpush.msra.mxu3 %v1129_v53  ;;  %v1585_v23 = vld [vmem:[#allocation6 + $0x1340] sm:$0xff] }
  0xbc   : > { %933 = vmatpush.msra.mxu0 %v316_v55  ;;  %2150 = vmatpush.msra.mxu2 %v1001_v56  ;;  %v1297_v24 = vld [vmem:[#allocation6 + $0xa40] sm:$0xff] }
  0xbd   : > { %952 = vmatpush.msra.mxu1 %v469_v57  ;;  %2171 = vmatpush.msra.mxu3 %v1121_v58  ;;  %v1697_v25 = vld [vmem:[#allocation6 + $0x16c0] sm:$0xff] }
  0xbe   : > { %934 = vmatpush.msra.mxu0 %v307_v59  ;;  %2151 = vmatpush.msra.mxu2 %v993_v61  ;;  %v1433_v26 = vld [vmem:[#allocation6 + $0xe80] sm:$0xff] }
  0xbf   : > { %953 = vmatpush.msra.mxu1 %v460_v62  ;;  %2172 = vmatpush.msra.mxu3 %v1113_v63  ;;  %v1577_v27 = vld [vmem:[#allocation6 + $0x1300] sm:$0xff] }
  0xc0   : > { %935 = vmatpush.msra.mxu0 %v298_v0  ;;  %2152 = vmatpush.msra.mxu2 %v985_v2  ;;  %v1289_v28 = vld [vmem:[#allocation6 + $0xa00] sm:$0xff] }
  0xc1   : > { %954 = vmatpush.msra.mxu1 %v451_v1  ;;  %936 = vmatmul.f32.vlgmr.msra.gmra.mxu0 %v4013_v54  ;;  %v1457_v54 = vld [vmem:[#allocation6 + $0xf40] sm:$0xff] }
  0xc2   : > { %2179 = vmatpush.msrb.mxu0 %v1345_v3  ;;  %2173 = vmatpush.msra.mxu3 %v1105_v4  ;;  %v1689_v29 = vld [vmem:[#allocation6 + $0x1680] sm:$0xff] }
  0xc3   : > { %955 = vmatpush.msra.mxu1 %v442_v5  ;;  %2153 = vmatpush.msra.mxu2 %v977_v6  ;;  %v1425_v30 = vld [vmem:[#allocation6 + $0xe40] sm:$0xff] }
  0xc4   : > { %956 = vmatmul.f32.vlgmr.msra.gmra.mxu1 %v4016_v60  ;;  %2180 = vmatpush.msrb.mxu0 %v1337_v7  ;;  %v1305_v60 = vld [vmem:[#allocation6 + $0xa80] sm:$0xff] }
  0xc5   : > { %2174 = vmatpush.msra.mxu3 %v1097_v8  ;;  %2199 = vmatpush.msrb.mxu1 %v1473_v9  ;;  %v1569_v31 = vld [vmem:[#allocation6 + $0x12c0] sm:$0xff] }
  0xc6   : > { %2181 = vmatpush.msrb.mxu0 %v1329_v10  ;;  %2154 = vmatpush.msra.mxu2 %v969_v13  ;;  %v1281_v32 = vld [vmem:[#allocation6 + $0x9c0] sm:$0xff] }
  0xc7   : > { %2239 = vmatpush.msrb.mxu3 %v1729_v11  ;;  %2200 = vmatpush.msrb.mxu1 %v1465_v12  ;;  %v1681_v33 = vld [vmem:[#allocation6 + $0x1640] sm:$0xff] }
  0xc8   : > { %2182 = vmatpush.msrb.mxu0 %v1321_v14  ;;  %2219 = vmatpush.msrb.mxu2 %v1601_v16  ;;  %v1417_v34 = vld [vmem:[#allocation6 + $0xe00] sm:$0xff] }
  0xc9   : > { %2240 = vmatpush.msrb.mxu3 %v1721_v15  ;;  %2201 = vmatpush.msrb.mxu1 %v1457_v54  ;;  %v1561_v35 = vld [vmem:[#allocation6 + $0x1280] sm:$0xff] }
  0xca   : > { %2183 = vmatpush.msrb.mxu0 %v1313_v17  ;;  %2220 = vmatpush.msrb.mxu2 %v1593_v20  ;;  %v1273_v36 = vld [vmem:[#allocation6 + $0x980] sm:$0xff] }
  0xcb   : > { %2241 = vmatpush.msrb.mxu3 %v1713_v18  ;;  %2202 = vmatpush.msrb.mxu1 %v1449_v19  ;;  %v1673_v37 = vld [vmem:[#allocation6 + $0x1600] sm:$0xff]  ;;  %v584_v18 = vperm.slane %v4035_v42, 2 }
  0xcc   : > { %2184 = vmatpush.msrb.mxu0 %v1305_v60  ;;  %2221 = vmatpush.msrb.mxu2 %v1585_v23  ;;  %v1409_v38 = vld [vmem:[#allocation6 + $0xdc0] sm:$0xff]  ;;  %v585_v60 = vperm.slane %v4035_v42, 3 }
  0xcd   : > { %2242 = vmatpush.msrb.mxu3 %v1705_v21  ;;  %2203 = vmatpush.msrb.mxu1 %v1441_v22  ;;  %v1553_v39 = vld [vmem:[#allocation6 + $0x1240] sm:$0xff]  ;;  %v1090_v22 = vld [vmem:[#allocation6 + $0x3c8] sm:$0xff] }
  0xce   : > { %2185 = vmatpush.msrb.mxu0 %v1297_v24  ;;  %2222 = vmatpush.msrb.mxu2 %v1577_v27  ;;  %v1265_v40 = vld [vmem:[#allocation6 + $0x940] sm:$0xff]  ;;  %v1082_v27 = vld [vmem:[#allocation6 + $0x388] sm:$0xff] }
  0xcf   : > { %2243 = vmatpush.msrb.mxu3 %v1697_v25  ;;  %2204 = vmatpush.msrb.mxu1 %v1433_v26  ;;  %v1665_v41 = vld [vmem:[#allocation6 + $0x15c0] sm:$0xff] }
  0xd0   : > { %2186 = vmatpush.msrb.mxu0 %v1289_v28  ;;  %2223 = vmatpush.msrb.mxu2 %v1569_v31  ;;  %v1401_v43 = vld [vmem:[#allocation6 + $0xd80] sm:$0xff] }
  0xd1   : > { %2244 = vmatpush.msrb.mxu3 %v1689_v29  ;;  %2205 = vmatpush.msrb.mxu1 %v1425_v30  ;;  %v1545_v44 = vld [vmem:[#allocation6 + $0x1200] sm:$0xff] }
  0xd2   : > { %2187 = vmatpush.msrb.mxu0 %v1281_v32  ;;  %2224 = vmatpush.msrb.mxu2 %v1561_v35  ;;  %v1257_v45 = vld [vmem:[#allocation6 + $0x900] sm:$0xff]  ;;  %v1074_v35 = vld [vmem:[#allocation6 + $0x348] sm:$0xff] }
  0xd3   : > { %2245 = vmatpush.msrb.mxu3 %v1681_v33  ;;  %2206 = vmatpush.msrb.mxu1 %v1417_v34  ;;  %v1657_v46 = vld [vmem:[#allocation6 + $0x1580] sm:$0xff] }
  0xd4   : > { %2188 = vmatpush.msrb.mxu0 %v1273_v36  ;;  %2225 = vmatpush.msrb.mxu2 %v1553_v39  ;;  %v1393_v48 = vld [vmem:[#allocation6 + $0xd40] sm:$0xff] }
  0xd5   : > { %2246 = vmatpush.msrb.mxu3 %v1673_v37  ;;  %2207 = vmatpush.msrb.mxu1 %v1409_v38  ;;  %v1537_v49 = vld [vmem:[#allocation6 + $0x11c0] sm:$0xff] }
  0xd6   : > { %2189 = vmatpush.msrb.mxu0 %v1265_v40  ;;  %v1249_v50 = vld [vmem:[#allocation6 + $0x8c0] sm:$0xff]  ;;  %2226 = vmatpush.msrb.mxu2 %v1545_v44 }
  0xd7   : > { %2247 = vmatpush.msrb.mxu3 %v1665_v41  ;;  %2208 = vmatpush.msrb.mxu1 %v1401_v43  ;;  %v1649_v52 = vld [vmem:[#allocation6 + $0x1540] sm:$0xff] }
  0xd8   : > { %2190 = vmatpush.msrb.mxu0 %v1257_v45  ;;  %v1385_v53 = vld [vmem:[#allocation6 + $0xd00] sm:$0xff]  ;;  %2227 = vmatpush.msrb.mxu2 %v1537_v49  ;;  %v1066_v45 = vld [vmem:[#allocation6 + $0x308] sm:$0xff] }
  0xd9   : > { %2248 = vmatpush.msrb.mxu3 %v1657_v46  ;;  %v1529_v55 = vld [vmem:[#allocation6 + $0x1180] sm:$0xff]  ;;  %v617_v56 = vpop.f32.mrf.mxu0  ;;  %2209 = vmatpush.msrb.mxu1 %v1393_v48 }
  0xda   : > { %v1241_v57 = vld [vmem:[#allocation6 + $0x880] sm:$0xff]  ;;  %v618_v59 = vadd.f32 %v617_v56, %v582_v47  ;;  %2191 = vmatpush.msrb.mxu0 %v1249_v50  ;;  %v657_v61 = vpop.f32.mrf.mxu2  ;;  %2228 = vmatpush.msrb.mxu2 %v1529_v55  ;;  %v1058_v50 = vld [vmem:[#allocation6 + $0x2c8] sm:$0xff] }
  0xdb   : > { %v1641_v58 = vld [vmem:[#allocation6 + $0x1500] sm:$0xff]  ;;  %2249 = vmatpush.msrb.mxu3 %v1649_v52  ;;  %v637_v0 = vpop.f32.mrf.mxu1  ;;  %v658_v1 = vadd.f32 %v657_v61, %v583_v51  ;;  %2210 = vmatpush.msrb.mxu1 %v1385_v53  ;;  %v1050_v55 = vld [vmem:[#allocation6 + $0x288] sm:$0xff] }
  0xdc   : > { %v1377_v62 = vld [vmem:[#allocation6 + $0xcc0] sm:$0xff]  ;;  %v638_v4 = vadd.f32 %v637_v0, %v618_v59  ;;  %2192 = vmatpush.msrb.mxu0 %v1241_v57  ;;  %v1042_v59 = vld [vmem:[#allocation6 + $0x248] sm:$0xff] }
  0xdd   : > { %v1521_v63 = vld [vmem:[#allocation6 + $0x1140] sm:$0xff]  ;;  %2250 = vmatpush.msrb.mxu3 %v1641_v58  ;;  %v677_v7 = vpop.f32.mrf.mxu3  ;;  %2211 = vmatpush.msrb.mxu1 %v1377_v62  ;;  %v1034_v0 = vld [vmem:[#allocation6 + $0x208] sm:$0xff] }
  0xde   : > { %v1233_v2 = vld [vmem:[#allocation6 + $0x840] sm:$0xff]  ;;  %2229 = vmatpush.msrb.mxu2 %v1521_v63  ;;  %v4039_v9 = vmax.f32 %v638_v4, 0.0  ;;  %v678_v10 = vadd.f32 %v677_v7, %v658_v1  ;;  %v1026_v4 = vld [vmem:[#allocation6 + $0x1c8] sm:$0xff] }
  0xdf   : > { %v1633_v3 = vld [vmem:[#allocation6 + $0x14c0] sm:$0xff]  ;;  %2193 = vmatpush.msrb.mxu0 %v1233_v2 }
  0xe0   : > { %v1369_v5 = vld [vmem:[#allocation6 + $0xc80] sm:$0xff]  ;;  %2251 = vmatpush.msrb.mxu3 %v1633_v3  ;;  %v4041_v14 = vmax.f32 %v678_v10, 0.0  ;;  %2155 = vmatmul.f32.vlgmr.msra.gmra.mxu2 %v4039_v9 }
  0xe1   : > { %v1513_v6 = vld [vmem:[#allocation6 + $0x1100] sm:$0xff]  ;;  %2212 = vmatpush.msrb.mxu1 %v1369_v5 }
  0xe2   : > { %v1225_v8 = vld [vmem:[#allocation6 + $0x800] sm:$0xff]  ;;  %2230 = vmatpush.msrb.mxu2 %v1513_v6  ;;  %2175 = vmatmul.f32.vlgmr.msra.gmra.mxu3 %v4041_v14 }
  0xe3   : > { %v1857_v11 = vld [vmem:[#allocation6 + $0x1bc0] sm:$0xff]  ;;  %2194 = vmatpush.msrb.mxu0 %v1225_v8  ;;  %v1018_v8 = vld [vmem:[#allocation6 + $0x188] sm:$0xff] }
  0xe4   : > { %v1625_v12 = vld [vmem:[#allocation6 + $0x1480] sm:$0xff] }
  0xe5   : > { %v1361_v13 = vld [vmem:[#allocation6 + $0xc40] sm:$0xff]  ;;  %2259 = vmatpush.msra.mxu0 %v1857_v11  ;;  %2252 = vmatpush.msrb.mxu3 %v1625_v12  ;;  %v697_v25 = vpop.f32.mrf.mxu0 }
  0xe6   : > { %v1849_v15 = vld [vmem:[#allocation6 + $0x1b80] sm:$0xff]  ;;  %2213 = vmatpush.msrb.mxu1 %v1361_v13  ;;  %v698_v28 = vadd.f32 %v697_v25, %v584_v18  ;;  %v737_v29 = vpop.f32.mrf.mxu2  ;;  %v586_v13 = vperm.slane %v4035_v42, 4  ;;  %v1002_v18 = vld [vmem:[#allocation6 + $0x108] sm:$0xff] }
  0xe7   : > { %v1617_v54 = vld [vmem:[#allocation6 + $0x1440] sm:$0xff]  ;;  %2260 = vmatpush.msra.mxu0 %v1849_v15  ;;  %v717_v32 = vpop.f32.mrf.mxu1  ;;  %v738_v33 = vadd.f32 %v737_v29, %v585_v60  ;;  %v1010_v15 = vld [vmem:[#allocation6 + $0x148] sm:$0xff] }
  0xe8   : > { %v1353_v16 = vld [vmem:[#allocation6 + $0xc00] sm:$0xff]  ;;  %2253 = vmatpush.msrb.mxu3 %v1617_v54  ;;  %v718_v36 = vadd.f32 %v717_v32, %v698_v28  ;;  %v587_v28 = vperm.slane %v4035_v42, 5  ;;  %v986_v29 = vld [vmem:[#allocation6 + $0x88] sm:$0xff] }
  0xe9   : > { %v1505_v17 = vld [vmem:[#allocation6 + $0x10c0] sm:$0xff]  ;;  %2214 = vmatpush.msrb.mxu1 %v1353_v16  ;;  %v757_v39 = vpop.f32.mrf.mxu3 }
  0xea   : > { %v1841_v19 = vld [vmem:[#allocation6 + $0x1b40] sm:$0xff]  ;;  %2231 = vmatpush.msrb.mxu2 %v1505_v17  ;;  %v4047_v41 = vmax.f32 %v718_v36, 0.0  ;;  %v758_v43 = vadd.f32 %v757_v39, %v738_v33 }
  0xeb   : > { %v1609_v20 = vld [vmem:[#allocation6 + $0x1400] sm:$0xff]  ;;  %2261 = vmatpush.msra.mxu0 %v1841_v19 }
  0xec   : > { %v1985_v21 = vld [vmem:[#allocation6 + $0x1fc0] sm:$0xff]  ;;  %2254 = vmatpush.msrb.mxu3 %v1609_v20  ;;  %v4049_v47 = vmax.f32 %v758_v43, 0.0  ;;  %2195 = vmatmul.f32.vlgmr.msrb.gmra.mxu0 %v4047_v41  ;;  %v1346_v43 = vld [vmem:[#allocation6 + $0xbc8] sm:$0xff] }
  0xed   : > { %v1833_v23 = vld [vmem:[#allocation6 + $0x1b00] sm:$0xff]  ;;  %2279 = vmatpush.msra.mxu1 %v1985_v21 }
  0xee   : > { %v1497_v24 = vld [vmem:[#allocation6 + $0x1080] sm:$0xff]  ;;  %2319 = vmatpush.msra.mxu3 %v1090_v22  ;;  %2262 = vmatpush.msra.mxu0 %v1833_v23  ;;  %v994_v23 = vld [vmem:[#allocation6 + $0xc8] sm:$0xff] }
  0xef   : > { %v1977_v26 = vld [vmem:[#allocation6 + $0x1f80] sm:$0xff]  ;;  %2232 = vmatpush.msrb.mxu2 %v1497_v24  ;;  %2215 = vmatmul.f32.vlgmr.msrb.gmra.mxu1 %v4049_v47  ;;  %v1218_v24 = vld [vmem:[#allocation6 + $0x7c8] sm:$0xff] }
  0xf0   : > { %v1825_v30 = vld [vmem:[#allocation6 + $0x1ac0] sm:$0xff]  ;;  %2280 = vmatpush.msra.mxu1 %v1977_v26  ;;  %2320 = vmatpush.msra.mxu3 %v1082_v27 }
  0xf1   : > { %v1489_v31 = vld [vmem:[#allocation6 + $0x1040] sm:$0xff]  ;;  %2263 = vmatpush.msra.mxu0 %v1825_v30  ;;  %v1210_v30 = vld [vmem:[#allocation6 + $0x788] sm:$0xff] }
  0xf2   : > { %v1969_v34 = vld [vmem:[#allocation6 + $0x1f40] sm:$0xff]  ;;  %2233 = vmatpush.msrb.mxu2 %v1489_v31  ;;  %2321 = vmatpush.msra.mxu3 %v1074_v35 }
  0xf3   : > { %v1817_v37 = vld [vmem:[#allocation6 + $0x1a80] sm:$0xff]  ;;  %2281 = vmatpush.msra.mxu1 %v1969_v34  ;;  %v978_v34 = vld [vmem:[#allocation6 + $0x48] sm:$0xff] }
  0xf4   : > { %v1481_v38 = vld [vmem:[#allocation6 + $0x1000] sm:$0xff]  ;;  %2264 = vmatpush.msra.mxu0 %v1817_v37  ;;  %2322 = vmatpush.msra.mxu3 %v1066_v45  ;;  %v1202_v37 = vld [vmem:[#allocation6 + $0x748] sm:$0xff] }
  0xf5   : > { %v1961_v40 = vld [vmem:[#allocation6 + $0x1f00] sm:$0xff]  ;;  %2234 = vmatpush.msrb.mxu2 %v1481_v38 }
  0xf6   : > { %v1809_v44 = vld [vmem:[#allocation6 + $0x1a40] sm:$0xff]  ;;  %2282 = vmatpush.msra.mxu1 %v1961_v40  ;;  %2323 = vmatpush.msra.mxu3 %v1058_v50  ;;  %v970_v40 = vld [vmem:[#allocation6 + $0x8] sm:$0xff] }
  0xf7   : > { %v2113_v46 = vld [vmem:[#allocation6 + $0x23c0] sm:$0xff]  ;;  %2265 = vmatpush.msra.mxu0 %v1809_v44  ;;  %v1194_v44 = vld [vmem:[#allocation6 + $0x708] sm:$0xff] }
  0xf8   : > { %v1801_v48 = vld [vmem:[#allocation6 + $0x1a00] sm:$0xff]  ;;  %2299 = vmatpush.msra.mxu2 %v2113_v46  ;;  %2324 = vmatpush.msra.mxu3 %v1050_v55  ;;  %v1186_v50 = vld [vmem:[#allocation6 + $0x6c8] sm:$0xff] }
  0xf9   : > { %v1953_v49 = vld [vmem:[#allocation6 + $0x1ec0] sm:$0xff]  ;;  %2266 = vmatpush.msra.mxu0 %v1801_v48  ;;  %v1338_v48 = vld [vmem:[#allocation6 + $0xb88] sm:$0xff] }
  0xfa   : > { %v2105_v51 = vld [vmem:[#allocation6 + $0x2380] sm:$0xff]  ;;  %2283 = vmatpush.msra.mxu1 %v1953_v49  ;;  %2325 = vmatpush.msra.mxu3 %v1042_v59  ;;  %v1602_v55 = vld [vmem:[#allocation6 + $0x13c8] sm:$0xff] }
  0xfb   : > { %v1793_v52 = vld [vmem:[#allocation6 + $0x19c0] sm:$0xff]  ;;  %2300 = vmatpush.msra.mxu2 %v2105_v51  ;;  %v1594_v59 = vld [vmem:[#allocation6 + $0x1388] sm:$0xff] }
  0xfc   : > { %v1945_v53 = vld [vmem:[#allocation6 + $0x1e80] sm:$0xff]  ;;  %2267 = vmatpush.msra.mxu0 %v1793_v52  ;;  %2326 = vmatpush.msra.mxu3 %v1034_v0  ;;  %v777_v20 = vpop.f32.mrf.mxu0  ;;  %v1330_v52 = vld [vmem:[#allocation6 + $0xb48] sm:$0xff] }
  0xfd   : > { %v2097_v56 = vld [vmem:[#allocation6 + $0x2340] sm:$0xff]  ;;  %2284 = vmatpush.msra.mxu1 %v1945_v53  ;;  %v778_v22 = vadd.f32 %v777_v20, %v586_v13  ;;  %v1586_v0 = vld [vmem:[#allocation6 + $0x1348] sm:$0xff] }
  0xfe   : > { %v1785_v57 = vld [vmem:[#allocation6 + $0x1980] sm:$0xff]  ;;  %2301 = vmatpush.msra.mxu2 %v2097_v56  ;;  %2327 = vmatpush.msra.mxu3 %v1026_v4  ;;  %v1178_v56 = vld [vmem:[#allocation6 + $0x688] sm:$0xff] }
  0xff   : > { %v1937_v58 = vld [vmem:[#allocation6 + $0x1e40] sm:$0xff]  ;;  %2268 = vmatpush.msra.mxu0 %v1785_v57  ;;  %v797_v27 = vpop.f32.mrf.mxu1  ;;  %v1322_v57 = vld [vmem:[#allocation6 + $0xb08] sm:$0xff] }
 0x100   : > { %v2089_v61 = vld [vmem:[#allocation6 + $0x2300] sm:$0xff]  ;;  %2285 = vmatpush.msra.mxu1 %v1937_v58  ;;  %2328 = vmatpush.msra.mxu3 %v1018_v8  ;;  %v798_v31 = vadd.f32 %v797_v27, %v778_v22  ;;  %v1578_v4 = vld [vmem:[#allocation6 + $0x1308] sm:$0xff] }
 0x101   : > { %v1777_v62 = vld [vmem:[#allocation6 + $0x1940] sm:$0xff]  ;;  %2302 = vmatpush.msra.mxu2 %v2089_v61  ;;  %v1170_v61 = vld [vmem:[#allocation6 + $0x648] sm:$0xff] }
 0x102   : > { %v1929_v63 = vld [vmem:[#allocation6 + $0x1e00] sm:$0xff]  ;;  %2269 = vmatpush.msra.mxu0 %v1777_v62  ;;  %2329 = vmatpush.msra.mxu3 %v1010_v15  ;;  %v4055_v35 = vmax.f32 %v798_v31, 0.0  ;;  %v817_v36 = vpop.f32.mrf.mxu2  ;;  %v1314_v62 = vld [vmem:[#allocation6 + $0xac8] sm:$0xff] }
 0x103   : > { %v2081_v1 = vld [vmem:[#allocation6 + $0x22c0] sm:$0xff]  ;;  %2286 = vmatpush.msra.mxu1 %v1929_v63  ;;  %v818_v39 = vadd.f32 %v817_v36, %v587_v28  ;;  %v1146_v8 = vld [vmem:[#allocation6 + $0x588] sm:$0xff] }
 0x104   : > { %v1769_v2 = vld [vmem:[#allocation6 + $0x1900] sm:$0xff]  ;;  %2303 = vmatpush.msra.mxu2 %v2081_v1  ;;  %2330 = vmatpush.msra.mxu3 %v1002_v18  ;;  %v1162_v1 = vld [vmem:[#allocation6 + $0x608] sm:$0xff] }
 0x105   : > { %v1921_v3 = vld [vmem:[#allocation6 + $0x1dc0] sm:$0xff]  ;;  %2270 = vmatpush.msra.mxu0 %v1769_v2  ;;  %2235 = vmatmul.f32.vlgmr.msrb.gmra.mxu2 %v4055_v35  ;;  %v837_v46 = vpop.f32.mrf.mxu3  ;;  %v1306_v2 = vld [vmem:[#allocation6 + $0xa88] sm:$0xff] }
 0x106   : > { %v2073_v5 = vld [vmem:[#allocation6 + $0x2280] sm:$0xff]  ;;  %2287 = vmatpush.msra.mxu1 %v1921_v3  ;;  %2331 = vmatpush.msra.mxu3 %v994_v23  ;;  %v838_v49 = vadd.f32 %v837_v46, %v818_v39  ;;  %v1138_v13 = vld [vmem:[#allocation6 + $0x548] sm:$0xff] }
 0x107   : > { %v1761_v6 = vld [vmem:[#allocation6 + $0x18c0] sm:$0xff]  ;;  %2304 = vmatpush.msra.mxu2 %v2073_v5  ;;  %v1154_v5 = vld [vmem:[#allocation6 + $0x5c8] sm:$0xff] }
 0x108   : > { %v1913_v7 = vld [vmem:[#allocation6 + $0x1d80] sm:$0xff]  ;;  %2271 = vmatpush.msra.mxu0 %v1761_v6  ;;  %2332 = vmatpush.msra.mxu3 %v986_v29  ;;  %v4058_v53 = vmax.f32 %v838_v49, 0.0  ;;  %v1298_v6 = vld [vmem:[#allocation6 + $0xa48] sm:$0xff]  ;;  %v588_v29 = vperm.slane %v4035_v42, 6 }
 0x109   : > { %v2065_v10 = vld [vmem:[#allocation6 + $0x2240] sm:$0xff]  ;;  %2288 = vmatpush.msra.mxu1 %v1913_v7  ;;  %v1570_v7 = vld [vmem:[#allocation6 + $0x12c8] sm:$0xff] }
 0x10a   : > { %v1753_v11 = vld [vmem:[#allocation6 + $0x1880] sm:$0xff]  ;;  %2305 = vmatpush.msra.mxu2 %v2065_v10  ;;  %2333 = vmatpush.msra.mxu3 %v978_v34  ;;  %v1290_v10 = vld [vmem:[#allocation6 + $0xa08] sm:$0xff] }
 0x10b   : > { %v1905_v12 = vld [vmem:[#allocation6 + $0x1d40] sm:$0xff]  ;;  %2272 = vmatpush.msra.mxu0 %v1753_v11  ;;  %2255 = vmatmul.f32.vlgmr.msrb.gmra.mxu3 %v4058_v53  ;;  %v1474_v11 = vld [vmem:[#allocation6 + $0xfc8] sm:$0xff] }
 0x10c   : > { %v2057_v54 = vld [vmem:[#allocation6 + $0x2200] sm:$0xff]  ;;  %2289 = vmatpush.msra.mxu1 %v1905_v12  ;;  %2334 = vmatpush.msra.mxu3 %v970_v40  ;;  %v1562_v12 = vld [vmem:[#allocation6 + $0x1288] sm:$0xff] }
 0x10d   : > { %v1745_v16 = vld [vmem:[#allocation6 + $0x1840] sm:$0xff]  ;;  %2306 = vmatpush.msra.mxu2 %v2057_v54  ;;  %v1282_v15 = vld [vmem:[#allocation6 + $0x9c8] sm:$0xff] }
 0x10e   : > { %v1897_v17 = vld [vmem:[#allocation6 + $0x1d00] sm:$0xff]  ;;  %2273 = vmatpush.msra.mxu0 %v1745_v16  ;;  %2399 = vmatpush.msrb.mxu3 %v1602_v55  ;;  %v1466_v54 = vld [vmem:[#allocation6 + $0xf88] sm:$0xff] }
 0x10f   : > { %v2049_v19 = vld [vmem:[#allocation6 + $0x21c0] sm:$0xff]  ;;  %2290 = vmatpush.msra.mxu1 %v1897_v17  ;;  %v1554_v16 = vld [vmem:[#allocation6 + $0x1248] sm:$0xff] }
 0x110   : > { %v1737_v60 = vld [vmem:[#allocation6 + $0x1800] sm:$0xff]  ;;  %2307 = vmatpush.msra.mxu2 %v2049_v19  ;;  %2400 = vmatpush.msrb.mxu3 %v1594_v59  ;;  %v1130_v17 = vld [vmem:[#allocation6 + $0x508] sm:$0xff] }
 0x111   : > { %v1889_v21 = vld [vmem:[#allocation6 + $0x1cc0] sm:$0xff]  ;;  %2274 = vmatpush.msra.mxu0 %v1737_v60  ;;  %v1274_v18 = vld [vmem:[#allocation6 + $0x988] sm:$0xff] }
 0x112   : > { %v1881_v25 = vld [vmem:[#allocation6 + $0x1c80] sm:$0xff]  ;;  %2291 = vmatpush.msra.mxu1 %v1889_v21  ;;  %2401 = vmatpush.msrb.mxu3 %v1586_v0  ;;  %v1458_v19 = vld [vmem:[#allocation6 + $0xf48] sm:$0xff] }
 0x113   : > { %v2041_v26 = vld [vmem:[#allocation6 + $0x2180] sm:$0xff]  ;;  %2339 = vmatpush.msrb.mxu0 %v1218_v24  ;;  %2335 = vmatmul.f32.vlgmr.msra.gmra.mxu3 %v4039_v9  ;;  %v1546_v20 = vld [vmem:[#allocation6 + $0x1208] sm:$0xff] }
 0x114   : > { %v1873_v32 = vld [vmem:[#allocation6 + $0x1c40] sm:$0xff]  ;;  %2292 = vmatpush.msra.mxu1 %v1881_v25  ;;  %2308 = vmatpush.msra.mxu2 %v2041_v26  ;;  %v1122_v60 = vld [vmem:[#allocation6 + $0x4c8] sm:$0xff] }
 0x115   : > { %v2033_v33 = vld [vmem:[#allocation6 + $0x2140] sm:$0xff]  ;;  %2340 = vmatpush.msrb.mxu0 %v1210_v30  ;;  %2402 = vmatpush.msrb.mxu3 %v1578_v4  ;;  %v1266_v21 = vld [vmem:[#allocation6 + $0x948] sm:$0xff] }
 0x116   : > { %v1865_v38 = vld [vmem:[#allocation6 + $0x1c00] sm:$0xff]  ;;  %2293 = vmatpush.msra.mxu1 %v1873_v32  ;;  %2309 = vmatpush.msra.mxu2 %v2033_v33  ;;  %v1450_v22 = vld [vmem:[#allocation6 + $0xf08] sm:$0xff] }
 0x117   : > { %v2025_v45 = vld [vmem:[#allocation6 + $0x2100] sm:$0xff]  ;;  %2341 = vmatpush.msrb.mxu0 %v1202_v37  ;;  %2403 = vmatpush.msrb.mxu3 %v1570_v7  ;;  %v1538_v23 = vld [vmem:[#allocation6 + $0x11c8] sm:$0xff] }
 0x118   : > { %2294 = vmatpush.msra.mxu1 %v1865_v38  ;;  %v2017_v51 = vld [vmem:[#allocation6 + $0x20c0] sm:$0xff]  ;;  %2310 = vmatpush.msra.mxu2 %v2025_v45  ;;  %v1114_v24 = vld [vmem:[#allocation6 + $0x488] sm:$0xff] }
 0x119   : > { %2342 = vmatpush.msrb.mxu0 %v1194_v44  ;;  %v2009_v58 = vld [vmem:[#allocation6 + $0x2080] sm:$0xff]  ;;  %2404 = vmatpush.msrb.mxu3 %v1562_v12  ;;  %v1258_v25 = vld [vmem:[#allocation6 + $0x908] sm:$0xff] }
 0x11a   : > { %2359 = vmatpush.msrb.mxu1 %v1346_v43  ;;  %2311 = vmatpush.msra.mxu2 %v2017_v51  ;;  %v2001_v63 = vld [vmem:[#allocation6 + $0x2040] sm:$0xff]  ;;  %v1442_v26 = vld [vmem:[#allocation6 + $0xec8] sm:$0xff] }
 0x11b   : > { %2343 = vmatpush.msrb.mxu0 %v1186_v50  ;;  %v1993_v3 = vld [vmem:[#allocation6 + $0x2000] sm:$0xff]  ;;  %2405 = vmatpush.msrb.mxu3 %v1554_v16  ;;  %v1530_v27 = vld [vmem:[#allocation6 + $0x1188] sm:$0xff] }
 0x11c   : > { %2360 = vmatpush.msrb.mxu1 %v1338_v48  ;;  %2312 = vmatpush.msra.mxu2 %v2009_v58  ;;  %v1106_v28 = vld [vmem:[#allocation6 + $0x448] sm:$0xff]  ;;  %v589_v48 = vperm.slane %v4035_v42, 7 }
 0x11d   : > { %2344 = vmatpush.msrb.mxu0 %v1178_v56  ;;  %2406 = vmatpush.msrb.mxu3 %v1546_v20  ;;  %v1250_v30 = vld [vmem:[#allocation6 + $0x8c8] sm:$0xff] }
 0x11e   : > { %2361 = vmatpush.msrb.mxu1 %v1330_v52  ;;  %2313 = vmatpush.msra.mxu2 %v2001_v63  ;;  %v1434_v31 = vld [vmem:[#allocation6 + $0xe88] sm:$0xff]  ;;  %v857_v37 = vpop.f32.mrf.mxu0 }
 0x11f   : > { %2345 = vmatpush.msrb.mxu0 %v1170_v61  ;;  %2407 = vmatpush.msrb.mxu3 %v1538_v23  ;;  %v1522_v32 = vld [vmem:[#allocation6 + $0x1148] sm:$0xff]  ;;  %v858_v39 = vadd.f32 %v857_v37, %v588_v29 }
 0x120   : > { %2362 = vmatpush.msrb.mxu1 %v1322_v57  ;;  %2314 = vmatpush.msra.mxu2 %v1993_v3  ;;  %v1098_v33 = vld [vmem:[#allocation6 + $0x408] sm:$0xff]  ;;  %v877_v44 = vpop.f32.mrf.mxu1 }
 0x121   : > { %2346 = vmatpush.msrb.mxu0 %v1162_v1  ;;  %2408 = vmatpush.msrb.mxu3 %v1530_v27  ;;  %v1242_v34 = vld [vmem:[#allocation6 + $0x888] sm:$0xff]  ;;  %v878_v46 = vadd.f32 %v877_v44, %v858_v39 }
 0x122   : > { %2363 = vmatpush.msrb.mxu1 %v1314_v62  ;;  %2379 = vmatpush.msrb.mxu2 %v1474_v11  ;;  %v1426_v36 = vld [vmem:[#allocation6 + $0xe48] sm:$0xff] }
 0x123   : > { %2347 = vmatpush.msrb.mxu0 %v1154_v5  ;;  %v1514_v38 = vld [vmem:[#allocation6 + $0x1108] sm:$0xff]  ;;  %2409 = vmatpush.msrb.mxu3 %v1522_v32  ;;  %v4064_v52 = vmax.f32 %v878_v46, 0.0 }
 0x124   : > { %2364 = vmatpush.msrb.mxu1 %v1306_v2  ;;  %2380 = vmatpush.msrb.mxu2 %v1466_v54  ;;  %v1234_v40 = vld [vmem:[#allocation6 + $0x848] sm:$0xff]  ;;  %v897_v57 = vpop.f32.mrf.mxu2 }
 0x125   : > { %2348 = vmatpush.msrb.mxu0 %v1146_v8  ;;  %v1418_v43 = vld [vmem:[#allocation6 + $0xe08] sm:$0xff]  ;;  %2410 = vmatpush.msrb.mxu3 %v1514_v38  ;;  %v898_v59 = vadd.f32 %v897_v57, %v589_v48 }
 0x126   : > { %2365 = vmatpush.msrb.mxu1 %v1298_v6  ;;  %2381 = vmatpush.msrb.mxu2 %v1458_v19  ;;  %v1506_v45 = vld [vmem:[#allocation6 + $0x10c8] sm:$0xff] }
 0x127   : > { %2349 = vmatpush.msrb.mxu0 %v1138_v13  ;;  %v1226_v49 = vld [vmem:[#allocation6 + $0x808] sm:$0xff]  ;;  %2411 = vmatpush.msrb.mxu3 %v1506_v45  ;;  %v917_v63 = vpop.f32.mrf.mxu3 }
 0x128   : > { %2366 = vmatpush.msrb.mxu1 %v1290_v10  ;;  %2382 = vmatpush.msrb.mxu2 %v1450_v22  ;;  %v1410_v50 = vld [vmem:[#allocation6 + $0xdc8] sm:$0xff]  ;;  %v918_v1 = vadd.f32 %v917_v63, %v898_v59 }
 0x129   : > { %2350 = vmatpush.msrb.mxu0 %v1130_v17  ;;  %v1498_v51 = vld [vmem:[#allocation6 + $0x1088] sm:$0xff] }
 0x12a   : > { %2367 = vmatpush.msrb.mxu1 %v1282_v15  ;;  %2383 = vmatpush.msrb.mxu2 %v1442_v26  ;;  %v1730_v55 = vld [vmem:[#allocation6 + $0x17c8] sm:$0xff]  ;;  %v4067_v5 = vmax.f32 %v918_v1, 0.0  ;;  %v1083_v1 = vld [vmem:[#allocation6 + $0x390] sm:$0xff] }
 0x12b   : > { %2351 = vmatpush.msrb.mxu0 %v1122_v60  ;;  %v1402_v56 = vld [vmem:[#allocation6 + $0xd88] sm:$0xff]  ;;  %2412 = vmatpush.msrb.mxu3 %v1498_v51 }
 0x12c   : > { %2368 = vmatpush.msrb.mxu1 %v1274_v18  ;;  %2384 = vmatpush.msrb.mxu2 %v1434_v31  ;;  %v1490_v58 = vld [vmem:[#allocation6 + $0x1048] sm:$0xff] }
 0x12d   : > { %2352 = vmatpush.msrb.mxu0 %v1114_v24  ;;  %v1722_v61 = vld [vmem:[#allocation6 + $0x1788] sm:$0xff]  ;;  %2413 = vmatpush.msrb.mxu3 %v1490_v58 }
 0x12e   : > { %2369 = vmatpush.msrb.mxu1 %v1266_v21  ;;  %2385 = vmatpush.msrb.mxu2 %v1426_v36  ;;  %v1394_v42 = vld [vmem:[#allocation6 + $0xd48] sm:$0xff]  ;;  %v3765_v36 = vld [vmem:[#allocation4 + $0x8] ss:$0 sm:$0xff] }
 0x12f   : > { %2353 = vmatpush.msrb.mxu0 %v1106_v28  ;;  %v1482_v62 = vld [vmem:[#allocation6 + $0x1008] sm:$0xff]  ;;  %2295 = vmatmul.f32.vlgmr.msra.gmra.mxu1 %v4067_v5 }
 0x130   : > { %2370 = vmatpush.msrb.mxu1 %v1258_v25  ;;  %2386 = vmatpush.msrb.mxu2 %v1418_v43  ;;  %v1714_v0 = vld [vmem:[#allocation6 + $0x1748] sm:$0xff] }
 0x131   : > { %2354 = vmatpush.msrb.mxu0 %v1098_v33  ;;  %v2114_v2 = vld [vmem:[#allocation6 + $0x23c8] sm:$0xff]  ;;  %2414 = vmatpush.msrb.mxu3 %v1482_v62 }
 0x132   : > { %2371 = vmatpush.msrb.mxu1 %v1250_v30  ;;  %2387 = vmatpush.msrb.mxu2 %v1410_v50  ;;  %v1386_v3 = vld [vmem:[#allocation6 + $0xd08] sm:$0xff] }
 0x133   : > { %2275 = vmatmul.f32.vlgmr.msra.gmra.mxu0 %v4064_v52  ;;  %v1706_v4 = vld [vmem:[#allocation6 + $0x1708] sm:$0xff]  ;;  %2415 = vmatmul.f32.vlgmr.msrb.gmra.mxu3 %v4055_v35 }
 0x134   : > { %2372 = vmatpush.msrb.mxu1 %v1242_v34  ;;  %2419 = vmatpush.msra.mxu0 %v1730_v55  ;;  %v1858_v6 = vld [vmem:[#allocation6 + $0x1bc8] sm:$0xff] }
 0x135   : > { %2388 = vmatpush.msrb.mxu2 %v1402_v56  ;;  %2479 = vmatpush.msra.mxu3 %v2114_v2  ;;  %v1698_v7 = vld [vmem:[#allocation6 + $0x16c8] sm:$0xff] }
 0x136   : > { %2373 = vmatpush.msrb.mxu1 %v1234_v40  ;;  %2420 = vmatpush.msra.mxu0 %v1722_v61  ;;  %v2106_v8 = vld [vmem:[#allocation6 + $0x2388] sm:$0xff] }
 0x137   : > { %2389 = vmatpush.msrb.mxu2 %v1394_v42  ;;  %v1850_v10 = vld [vmem:[#allocation6 + $0x1b88] sm:$0xff]  ;;  %2480 = vmatpush.msra.mxu3 %v2106_v8  ;;  %v1091_v42 = vld [vmem:[#allocation6 + $0x3d0] sm:$0xff] }
 0x138   : > { %2374 = vmatpush.msrb.mxu1 %v1226_v49  ;;  %2421 = vmatpush.msra.mxu0 %v1714_v0  ;;  %v1378_v11 = vld [vmem:[#allocation6 + $0xcc8] sm:$0xff] }
 0x139   : > { %2390 = vmatpush.msrb.mxu2 %v1386_v3  ;;  %v1690_v12 = vld [vmem:[#allocation6 + $0x1688] sm:$0xff]  ;;  %2375 = vmatmul.f32.vlgmr.msrb.gmra.mxu1 %v4047_v41 }
 0x13a   : > { %2422 = vmatpush.msra.mxu0 %v1706_v4  ;;  %2439 = vmatpush.msra.mxu1 %v1858_v6  ;;  %v2098_v13 = vld [vmem:[#allocation6 + $0x2348] sm:$0xff]  ;;  %v1075_v6 = vld [vmem:[#allocation6 + $0x350] sm:$0xff] }
 0x13b   : > { %2355 = vmatmul.f32.vlgmr.msrb.gmra.mxu0 %v4041_v14  ;;  %v1842_v15 = vld [vmem:[#allocation6 + $0x1b48] sm:$0xff]  ;;  %2391 = vmatpush.msrb.mxu2 %v1378_v11  ;;  %v1067_v11 = vld [vmem:[#allocation6 + $0x310] sm:$0xff] }
 0x13c   : > { %2423 = vmatpush.msra.mxu0 %v1698_v7  ;;  %v1370_v54 = vld [vmem:[#allocation6 + $0xc88] sm:$0xff]  ;;  %2440 = vmatpush.msra.mxu1 %v1850_v10 }
 0x13d   : > { %v1682_v16 = vld [vmem:[#allocation6 + $0x1648] sm:$0xff]  ;;  %2481 = vmatpush.msra.mxu3 %v2098_v13  ;;  %2392 = vmatpush.msrb.mxu2 %v1370_v54  ;;  %v1475_v13 = vld [vmem:[#allocation6 + $0xfd0] sm:$0xff] }
 0x13e   : > { %v2090_v17 = vld [vmem:[#allocation6 + $0x2308] sm:$0xff]  ;;  %2424 = vmatpush.msra.mxu0 %v1690_v12  ;;  %2441 = vmatpush.msra.mxu1 %v1842_v15  ;;  %v937_v43 = vpop.f32.mrf.mxu0  ;;  %v1219_v12 = vld [vmem:[#allocation6 + $0x7d0] sm:$0xff] }
 0x13f   : > { %v1834_v18 = vld [vmem:[#allocation6 + $0x1b08] sm:$0xff]  ;;  %2482 = vmatpush.msra.mxu3 %v2090_v17  ;;  %v938_v46 = vadd.f32 %v3765_v36, %v937_v43  ;;  %v1059_v15 = vld [vmem:[#allocation6 + $0x2d0] sm:$0xff] }
 0x140   : > { %v1362_v19 = vld [vmem:[#allocation6 + $0xc48] sm:$0xff]  ;;  %2425 = vmatpush.msra.mxu0 %v1682_v16  ;;  %2442 = vmatpush.msra.mxu1 %v1834_v18  ;;  %v1211_v16 = vld [vmem:[#allocation6 + $0x790] sm:$0xff] }
 0x141   : > { %v1674_v20 = vld [vmem:[#allocation6 + $0x1608] sm:$0xff]  ;;  %2393 = vmatpush.msrb.mxu2 %v1362_v19  ;;  %v957_v51 = vpop.f32.mrf.mxu1  ;;  %v1467_v17 = vld [vmem:[#allocation6 + $0xf90] sm:$0xff] }
 0x142   : > { %v1826_v60 = vld [vmem:[#allocation6 + $0x1ac8] sm:$0xff]  ;;  %2426 = vmatpush.msra.mxu0 %v1674_v20  ;;  %v958_v56 = vadd.f32 %v957_v51, %v938_v46  ;;  %v1051_v18 = vld [vmem:[#allocation6 + $0x290] sm:$0xff] }
 0x143   : > { %v2082_v21 = vld [vmem:[#allocation6 + $0x22c8] sm:$0xff]  ;;  %2443 = vmatpush.msra.mxu1 %v1826_v60  ;;  %v1203_v20 = vld [vmem:[#allocation6 + $0x750] sm:$0xff] }
 0x144   : > { %v1666_v22 = vld [vmem:[#allocation6 + $0x15c8] sm:$0xff]  ;;  %2483 = vmatpush.msra.mxu3 %v2082_v21  ;;  %v4073_v59 = vmax.f32 %v958_v56, 0.0  ;;  %v1459_v60 = vld [vmem:[#allocation6 + $0xf50] sm:$0xff] }
 0x145   : > { %v1354_v23 = vld [vmem:[#allocation6 + $0xc08] sm:$0xff]  ;;  %2427 = vmatpush.msra.mxu0 %v1666_v22  ;;  %v1043_v21 = vld [vmem:[#allocation6 + $0x250] sm:$0xff] }
 0x146   : > { %v1818_v24 = vld [vmem:[#allocation6 + $0x1a88] sm:$0xff]  ;;  %2394 = vmatpush.msrb.mxu2 %v1354_v23  ;;  %v1195_v23 = vld [vmem:[#allocation6 + $0x710] sm:$0xff] }
 0x147   : > { %v2074_v25 = vld [vmem:[#allocation6 + $0x2288] sm:$0xff]  ;;  %2444 = vmatpush.msra.mxu1 %v1818_v24  ;;  %2315 = vmatmul.f32.vlgmr.msra.gmra.mxu2 %v4073_v59  ;;  %v1451_v24 = vld [vmem:[#allocation6 + $0xf10] sm:$0xff] }
 0x148   : > { %v1658_v26 = vld [vmem:[#allocation6 + $0x1588] sm:$0xff]  ;;  %2484 = vmatpush.msra.mxu3 %v2074_v25  ;;  %v1035_v25 = vld [vmem:[#allocation6 + $0x210] sm:$0xff] }
 0x149   : > { %v1810_v27 = vld [vmem:[#allocation6 + $0x1a48] sm:$0xff]  ;;  %2428 = vmatpush.msra.mxu0 %v1658_v26  ;;  %v1171_v36 = vld [vmem:[#allocation6 + $0x650] sm:$0xff] }
 0x14a   : > { %v2066_v28 = vld [vmem:[#allocation6 + $0x2248] sm:$0xff]  ;;  %2445 = vmatpush.msra.mxu1 %v1810_v27  ;;  %v1187_v27 = vld [vmem:[#allocation6 + $0x6d0] sm:$0xff] }
 0x14b   : > { %v1650_v29 = vld [vmem:[#allocation6 + $0x1548] sm:$0xff]  ;;  %2485 = vmatpush.msra.mxu3 %v2066_v28  ;;  %v1443_v28 = vld [vmem:[#allocation6 + $0xed0] sm:$0xff] }
 0x14c   : > { %v1802_v30 = vld [vmem:[#allocation6 + $0x1a08] sm:$0xff]  ;;  %2429 = vmatpush.msra.mxu0 %v1650_v29  ;;  %v1027_v29 = vld [vmem:[#allocation6 + $0x1d0] sm:$0xff] }
 0x14d   : > { %v2058_v31 = vld [vmem:[#allocation6 + $0x2208] sm:$0xff]  ;;  %2446 = vmatpush.msra.mxu1 %v1802_v30  ;;  %v1419_v43 = vld [vmem:[#allocation6 + $0xe10] sm:$0xff] }
 0x14e   : > { %v1642_v32 = vld [vmem:[#allocation6 + $0x1508] sm:$0xff]  ;;  %2486 = vmatpush.msra.mxu3 %v2058_v31  ;;  %v1179_v31 = vld [vmem:[#allocation6 + $0x690] sm:$0xff] }
 0x14f   : > { %v1794_v33 = vld [vmem:[#allocation6 + $0x19c8] sm:$0xff]  ;;  %2430 = vmatpush.msra.mxu0 %v1642_v32  ;;  %2395 = vmatmul.f32.vlgmr.msrb.gmra.mxu2 %v4049_v47  ;;  %v1435_v32 = vld [vmem:[#allocation6 + $0xe90] sm:$0xff] }
 0x150   : > { %v2050_v34 = vld [vmem:[#allocation6 + $0x21c8] sm:$0xff]  ;;  %2447 = vmatpush.msra.mxu1 %v1794_v33  ;;  %v1019_v33 = vld [vmem:[#allocation6 + $0x190] sm:$0xff] }
 0x151   : > { %v1634_v37 = vld [vmem:[#allocation6 + $0x14c8] sm:$0xff]  ;;  %2487 = vmatpush.msra.mxu3 %v2050_v34  ;;  %v1155_v46 = vld [vmem:[#allocation6 + $0x5d0] sm:$0xff] }
 0x152   : > { %v1786_v38 = vld [vmem:[#allocation6 + $0x1988] sm:$0xff]  ;;  %2431 = vmatpush.msra.mxu0 %v1634_v37  ;;  %v1427_v37 = vld [vmem:[#allocation6 + $0xe50] sm:$0xff] }
 0x153   : > { %v2042_v39 = vld [vmem:[#allocation6 + $0x2188] sm:$0xff]  ;;  %2448 = vmatpush.msra.mxu1 %v1786_v38  ;;  %v1011_v38 = vld [vmem:[#allocation6 + $0x150] sm:$0xff] }
 0x154   : > { %v1626_v40 = vld [vmem:[#allocation6 + $0x1488] sm:$0xff]  ;;  %2488 = vmatpush.msra.mxu3 %v2042_v39  ;;  %v1147_v51 = vld [vmem:[#allocation6 + $0x590] sm:$0xff] }
 0x155   : > { %v1778_v44 = vld [vmem:[#allocation6 + $0x1948] sm:$0xff]  ;;  %2432 = vmatpush.msra.mxu0 %v1626_v40  ;;  %v1163_v40 = vld [vmem:[#allocation6 + $0x610] sm:$0xff] }
 0x156   : > { %v2034_v45 = vld [vmem:[#allocation6 + $0x2148] sm:$0xff]  ;;  %2449 = vmatpush.msra.mxu1 %v1778_v44  ;;  %v1003_v44 = vld [vmem:[#allocation6 + $0x110] sm:$0xff] }
 0x157   : > { %v1618_v48 = vld [vmem:[#allocation6 + $0x1448] sm:$0xff]  ;;  %2489 = vmatpush.msra.mxu3 %v2034_v45  ;;  %v987_v56 = vld [vmem:[#allocation6 + $0x90] sm:$0xff] }
 0x158   : > { %v1770_v49 = vld [vmem:[#allocation6 + $0x1908] sm:$0xff]  ;;  %2433 = vmatpush.msra.mxu0 %v1618_v48  ;;  %v1411_v48 = vld [vmem:[#allocation6 + $0xdd0] sm:$0xff] }
 0x159   : > { %v2026_v50 = vld [vmem:[#allocation6 + $0x2108] sm:$0xff]  ;;  %2450 = vmatpush.msra.mxu1 %v1770_v49  ;;  %v995_v49 = vld [vmem:[#allocation6 + $0xd0] sm:$0xff] }
 0x15a   : > { %v1610_v55 = vld [vmem:[#allocation6 + $0x1408] sm:$0xff]  ;;  %2490 = vmatpush.msra.mxu3 %v2026_v50 }
 0x15b   : > { %v1762_v57 = vld [vmem:[#allocation6 + $0x18c8] sm:$0xff]  ;;  %2434 = vmatpush.msra.mxu0 %v1610_v55  ;;  %v1403_v55 = vld [vmem:[#allocation6 + $0xd90] sm:$0xff] }
 0x15c   : > { %v2018_v58 = vld [vmem:[#allocation6 + $0x20c8] sm:$0xff]  ;;  %2451 = vmatpush.msra.mxu1 %v1762_v57  ;;  %2435 = vmatmul.f32.vlgmr.msra.gmra.mxu0 %v4058_v53 }
 0x15d   : > { %v1986_v61 = vld [vmem:[#allocation6 + $0x1fc8] sm:$0xff]  ;;  %2491 = vmatpush.msra.mxu3 %v2018_v58  ;;  %2499 = vmatpush.msrb.mxu0 %v1091_v42  ;;  %v1139_v58 = vld [vmem:[#allocation6 + $0x550] sm:$0xff] }
 0x15e   : > { %v1754_v62 = vld [vmem:[#allocation6 + $0x1888] sm:$0xff]  ;;  %2459 = vmatpush.msra.mxu2 %v1986_v61  ;;  %v1395_v61 = vld [vmem:[#allocation6 + $0xd50] sm:$0xff] }
 0x15f   : > { %v2010_v63 = vld [vmem:[#allocation6 + $0x2088] sm:$0xff]  ;;  %2452 = vmatpush.msra.mxu1 %v1754_v62  ;;  %2500 = vmatpush.msrb.mxu0 %v1083_v1  ;;  %v979_v42 = vld [vmem:[#allocation6 + $0x50] sm:$0xff] }
 0x160   : > { %v1978_v0 = vld [vmem:[#allocation6 + $0x1f88] sm:$0xff]  ;;  %2492 = vmatpush.msra.mxu3 %v2010_v63  ;;  %v1131_v63 = vld [vmem:[#allocation6 + $0x510] sm:$0xff] }
 0x161   : > { %v1746_v2 = vld [vmem:[#allocation6 + $0x1848] sm:$0xff]  ;;  %2460 = vmatpush.msra.mxu2 %v1978_v0  ;;  %2501 = vmatpush.msrb.mxu0 %v1075_v6  ;;  %v1387_v0 = vld [vmem:[#allocation6 + $0xd10] sm:$0xff] }
 0x162   : > { %v2002_v3 = vld [vmem:[#allocation6 + $0x2048] sm:$0xff]  ;;  %2453 = vmatpush.msra.mxu1 %v1746_v2  ;;  %v971_v1 = vld [vmem:[#allocation6 + $0x10] sm:$0xff] }
 0x163   : > { %v1970_v4 = vld [vmem:[#allocation6 + $0x1f48] sm:$0xff]  ;;  %2493 = vmatpush.msra.mxu3 %v2002_v3  ;;  %2502 = vmatpush.msrb.mxu0 %v1067_v11  ;;  %v1123_v3 = vld [vmem:[#allocation6 + $0x4d0] sm:$0xff] }
 0x164   : > { %v1738_v7 = vld [vmem:[#allocation6 + $0x1808] sm:$0xff]  ;;  %2461 = vmatpush.msra.mxu2 %v1970_v4  ;;  %v1379_v4 = vld [vmem:[#allocation6 + $0xcd0] sm:$0xff] }
 0x165   : > { %v1994_v8 = vld [vmem:[#allocation6 + $0x2008] sm:$0xff]  ;;  %2454 = vmatpush.msra.mxu1 %v1738_v7  ;;  %2503 = vmatpush.msrb.mxu0 %v1059_v15  ;;  %v1347_v6 = vld [vmem:[#allocation6 + $0xbd0] sm:$0xff] }
 0x166   : > { %v1962_v10 = vld [vmem:[#allocation6 + $0x1f08] sm:$0xff]  ;;  %2494 = vmatpush.msra.mxu3 %v1994_v8  ;;  %2455 = vmatmul.f32.vlgmr.msra.gmra.mxu1 %v4064_v52  ;;  %v1603_v7 = vld [vmem:[#allocation6 + $0x13d0] sm:$0xff] }
 0x167   : > { %2462 = vmatpush.msra.mxu2 %v1962_v10  ;;  %2495 = vmatmul.f32.vlgmr.msra.gmra.mxu3 %v4073_v59  ;;  %v1954_v54 = vld [vmem:[#allocation6 + $0x1ec8] sm:$0xff]  ;;  %v1115_v8 = vld [vmem:[#allocation6 + $0x490] sm:$0xff] }
 0x168   : > { %2519 = vmatpush.msrb.mxu1 %v1219_v12  ;;  %2559 = vmatpush.msrb.mxu3 %v1475_v13  ;;  %v1946_v19 = vld [vmem:[#allocation6 + $0x1e88] sm:$0xff]  ;;  %v1371_v10 = vld [vmem:[#allocation6 + $0xc90] sm:$0xff] }
 0x169   : > { %2463 = vmatpush.msra.mxu2 %v1954_v54  ;;  %2504 = vmatpush.msrb.mxu0 %v1051_v18  ;;  %v1938_v22 = vld [vmem:[#allocation6 + $0x1e48] sm:$0xff]  ;;  %v1339_v11 = vld [vmem:[#allocation6 + $0xb90] sm:$0xff] }
 0x16a   : > { %2520 = vmatpush.msrb.mxu1 %v1211_v16  ;;  %2560 = vmatpush.msrb.mxu3 %v1467_v17  ;;  %v1930_v26 = vld [vmem:[#allocation6 + $0x1e08] sm:$0xff]  ;;  %v1595_v12 = vld [vmem:[#allocation6 + $0x1390] sm:$0xff] }
 0x16b   : > { %2464 = vmatpush.msra.mxu2 %v1946_v19  ;;  %2505 = vmatpush.msrb.mxu0 %v1043_v21  ;;  %v1922_v30 = vld [vmem:[#allocation6 + $0x1dc8] sm:$0xff]  ;;  %v1107_v13 = vld [vmem:[#allocation6 + $0x450] sm:$0xff] }
 0x16c   : > { %2521 = vmatpush.msrb.mxu1 %v1203_v20  ;;  %2561 = vmatpush.msrb.mxu3 %v1459_v60  ;;  %v1914_v34 = vld [vmem:[#allocation6 + $0x1d88] sm:$0xff]  ;;  %v1363_v15 = vld [vmem:[#allocation6 + $0xc50] sm:$0xff] }
 0x16d   : > { %2465 = vmatpush.msra.mxu2 %v1938_v22  ;;  %2506 = vmatpush.msrb.mxu0 %v1035_v25  ;;  %v1906_v39 = vld [vmem:[#allocation6 + $0x1d48] sm:$0xff]  ;;  %v1331_v54 = vld [vmem:[#allocation6 + $0xb50] sm:$0xff] }
 0x16e   : > { %2522 = vmatpush.msrb.mxu1 %v1195_v23  ;;  %2562 = vmatpush.msrb.mxu3 %v1451_v24  ;;  %v1898_v45 = vld [vmem:[#allocation6 + $0x1d08] sm:$0xff]  ;;  %v1587_v16 = vld [vmem:[#allocation6 + $0x1350] sm:$0xff] }
 0x16f   : > { %2466 = vmatpush.msra.mxu2 %v1930_v26  ;;  %2507 = vmatpush.msrb.mxu0 %v1027_v29  ;;  %v1890_v50 = vld [vmem:[#allocation6 + $0x1cc8] sm:$0xff]  ;;  %v1099_v17 = vld [vmem:[#allocation6 + $0x410] sm:$0xff] }
 0x170   : > { %2523 = vmatpush.msrb.mxu1 %v1187_v27  ;;  %2563 = vmatpush.msrb.mxu3 %v1443_v28  ;;  %v1882_v57 = vld [vmem:[#allocation6 + $0x1c88] sm:$0xff]  ;;  %v1355_v18 = vld [vmem:[#allocation6 + $0xc10] sm:$0xff] }
 0x171   : > { %2467 = vmatpush.msra.mxu2 %v1922_v30  ;;  %2508 = vmatpush.msrb.mxu0 %v1019_v33  ;;  %v1874_v62 = vld [vmem:[#allocation6 + $0x1c48] sm:$0xff]  ;;  %v1323_v19 = vld [vmem:[#allocation6 + $0xb10] sm:$0xff] }
 0x172   : > { %2524 = vmatpush.msrb.mxu1 %v1179_v31  ;;  %2564 = vmatpush.msrb.mxu3 %v1435_v32  ;;  %v1866_v2 = vld [vmem:[#allocation6 + $0x1c08] sm:$0xff]  ;;  %v1579_v20 = vld [vmem:[#allocation6 + $0x1310] sm:$0xff] }
 0x173   : > { %2468 = vmatpush.msra.mxu2 %v1914_v34  ;;  %2509 = vmatpush.msrb.mxu0 %v1011_v38  ;;  %v1731_v60 = vld [vmem:[#allocation6 + $0x17d0] sm:$0xff] }
 0x174   : > { %2525 = vmatpush.msrb.mxu1 %v1171_v36  ;;  %2565 = vmatpush.msrb.mxu3 %v1427_v37  ;;  %v1987_v21 = vld [vmem:[#allocation6 + $0x1fd0] sm:$0xff] }
 0x175   : > { %2469 = vmatpush.msra.mxu2 %v1906_v39  ;;  %2510 = vmatpush.msrb.mxu0 %v1003_v44  ;;  %v1315_v22 = vld [vmem:[#allocation6 + $0xad0] sm:$0xff] }
 0x176   : > { %2526 = vmatpush.msrb.mxu1 %v1163_v40  ;;  %2566 = vmatpush.msrb.mxu3 %v1419_v43  ;;  %v1571_v23 = vld [vmem:[#allocation6 + $0x12d0] sm:$0xff] }
 0x177   : > { %2470 = vmatpush.msra.mxu2 %v1898_v45  ;;  %2511 = vmatpush.msrb.mxu0 %v995_v49  ;;  %v1723_v24 = vld [vmem:[#allocation6 + $0x1790] sm:$0xff] }
 0x178   : > { %2527 = vmatpush.msrb.mxu1 %v1155_v46  ;;  %2567 = vmatpush.msrb.mxu3 %v1411_v48  ;;  %v1979_v25 = vld [vmem:[#allocation6 + $0x1f90] sm:$0xff] }
 0x179   : > { %2471 = vmatpush.msra.mxu2 %v1890_v50  ;;  %2512 = vmatpush.msrb.mxu0 %v987_v56  ;;  %v1307_v26 = vld [vmem:[#allocation6 + $0xa90] sm:$0xff] }
 0x17a   : > { %2528 = vmatpush.msrb.mxu1 %v1147_v51  ;;  %2568 = vmatpush.msrb.mxu3 %v1403_v55  ;;  %v1563_v27 = vld [vmem:[#allocation6 + $0x1290] sm:$0xff] }
 0x17b   : > { %2472 = vmatpush.msra.mxu2 %v1882_v57  ;;  %2513 = vmatpush.msrb.mxu0 %v979_v42  ;;  %v1715_v28 = vld [vmem:[#allocation6 + $0x1750] sm:$0xff] }
 0x17c   : > { %2529 = vmatpush.msrb.mxu1 %v1139_v58  ;;  %2569 = vmatpush.msrb.mxu3 %v1395_v61  ;;  %v1971_v29 = vld [vmem:[#allocation6 + $0x1f50] sm:$0xff] }
 0x17d   : > { %2473 = vmatpush.msra.mxu2 %v1874_v62  ;;  %2514 = vmatpush.msrb.mxu0 %v971_v1  ;;  %v1299_v30 = vld [vmem:[#allocation6 + $0xa50] sm:$0xff] }
 0x17e   : > { %2530 = vmatpush.msrb.mxu1 %v1131_v63  ;;  %2570 = vmatpush.msrb.mxu3 %v1387_v0  ;;  %v1555_v31 = vld [vmem:[#allocation6 + $0x1250] sm:$0xff] }
 0x17f   : > { %2474 = vmatpush.msra.mxu2 %v1866_v2  ;;  %2515 = vmatmul.f32.vlgmr.msrb.gmra.mxu0 %v4039_v9  ;;  %v1707_v32 = vld [vmem:[#allocation6 + $0x1710] sm:$0xff] }
 0x180   : > { %2531 = vmatpush.msrb.mxu1 %v1123_v3  ;;  %2571 = vmatpush.msrb.mxu3 %v1379_v4  ;;  %v1963_v33 = vld [vmem:[#allocation6 + $0x1f10] sm:$0xff] }
 0x181   : > { %2475 = vmatmul.f32.vlgmr.msra.gmra.mxu2 %v4067_v5  ;;  %2579 = vmatpush.msra.mxu0 %v1603_v7  ;;  %v1291_v34 = vld [vmem:[#allocation6 + $0xa10] sm:$0xff] }
 0x182   : > { %2539 = vmatpush.msrb.mxu2 %v1347_v6  ;;  %2532 = vmatpush.msrb.mxu1 %v1115_v8  ;;  %v1547_v36 = vld [vmem:[#allocation6 + $0x1210] sm:$0xff] }
 0x183   : > { %2572 = vmatpush.msrb.mxu3 %v1371_v10  ;;  %2580 = vmatpush.msra.mxu0 %v1595_v12  ;;  %v1699_v37 = vld [vmem:[#allocation6 + $0x16d0] sm:$0xff] }
 0x184   : > { %2540 = vmatpush.msrb.mxu2 %v1339_v11  ;;  %2533 = vmatpush.msrb.mxu1 %v1107_v13  ;;  %v1955_v38 = vld [vmem:[#allocation6 + $0x1ed0] sm:$0xff] }
 0x185   : > { %2573 = vmatpush.msrb.mxu3 %v1363_v15  ;;  %2581 = vmatpush.msra.mxu0 %v1587_v16  ;;  %v1283_v39 = vld [vmem:[#allocation6 + $0x9d0] sm:$0xff] }
 0x186   : > { %2541 = vmatpush.msrb.mxu2 %v1331_v54  ;;  %2534 = vmatpush.msrb.mxu1 %v1099_v17  ;;  %v1539_v40 = vld [vmem:[#allocation6 + $0x11d0] sm:$0xff] }
 0x187   : > { %2574 = vmatpush.msrb.mxu3 %v1355_v18  ;;  %2535 = vmatmul.f32.vlgmr.msrb.gmra.mxu1 %v4041_v14  ;;  %v1691_v43 = vld [vmem:[#allocation6 + $0x1690] sm:$0xff] }
 0x188   : > { %2542 = vmatpush.msrb.mxu2 %v1323_v19  ;;  %2575 = vmatmul.f32.vlgmr.msrb.gmra.mxu3 %v4049_v47  ;;  %v1947_v44 = vld [vmem:[#allocation6 + $0x1e90] sm:$0xff] }
 0x189   : > { %2582 = vmatpush.msra.mxu0 %v1579_v20  ;;  %2599 = vmatpush.msra.mxu1 %v1731_v60  ;;  %v1275_v45 = vld [vmem:[#allocation6 + $0x990] sm:$0xff] }
 0x18a   : > { %2639 = vmatpush.msra.mxu3 %v1987_v21  ;;  %2543 = vmatpush.msrb.mxu2 %v1315_v22  ;;  %v1531_v46 = vld [vmem:[#allocation6 + $0x1190] sm:$0xff] }
 0x18b   : > { %2583 = vmatpush.msra.mxu0 %v1571_v23  ;;  %2600 = vmatpush.msra.mxu1 %v1723_v24  ;;  %v1683_v48 = vld [vmem:[#allocation6 + $0x1650] sm:$0xff] }
 0x18c   : > { %2640 = vmatpush.msra.mxu3 %v1979_v25  ;;  %2544 = vmatpush.msrb.mxu2 %v1307_v26  ;;  %v1939_v49 = vld [vmem:[#allocation6 + $0x1e50] sm:$0xff] }
 0x18d   : > { %2584 = vmatpush.msra.mxu0 %v1563_v27  ;;  %2601 = vmatpush.msra.mxu1 %v1715_v28  ;;  %v1267_v50 = vld [vmem:[#allocation6 + $0x950] sm:$0xff] }
 0x18e   : > { %2641 = vmatpush.msra.mxu3 %v1971_v29  ;;  %2545 = vmatpush.msrb.mxu2 %v1299_v30  ;;  %v1523_v51 = vld [vmem:[#allocation6 + $0x1150] sm:$0xff]  ;;  %v1092_v29 = vld [vmem:[#allocation6 + $0x3d8] sm:$0xff] }
 0x18f   : > { %2585 = vmatpush.msra.mxu0 %v1555_v31  ;;  %2602 = vmatpush.msra.mxu1 %v1707_v32  ;;  %v1675_v55 = vld [vmem:[#allocation6 + $0x1610] sm:$0xff]  ;;  %v1348_v30 = vld [vmem:[#allocation6 + $0xbd8] sm:$0xff] }
 0x190   : > { %2642 = vmatpush.msra.mxu3 %v1963_v33  ;;  %2546 = vmatpush.msrb.mxu2 %v1291_v34  ;;  %v1931_v56 = vld [vmem:[#allocation6 + $0x1e10] sm:$0xff]  ;;  %v1084_v33 = vld [vmem:[#allocation6 + $0x398] sm:$0xff] }
 0x191   : > { %2586 = vmatpush.msra.mxu0 %v1547_v36  ;;  %2603 = vmatpush.msra.mxu1 %v1699_v37  ;;  %v1259_v57 = vld [vmem:[#allocation6 + $0x910] sm:$0xff]  ;;  %v1340_v34 = vld [vmem:[#allocation6 + $0xb98] sm:$0xff] }
 0x192   : > { %2643 = vmatpush.msra.mxu3 %v1955_v38  ;;  %2547 = vmatpush.msrb.mxu2 %v1283_v39  ;;  %v1515_v58 = vld [vmem:[#allocation6 + $0x1110] sm:$0xff]  ;;  %v1076_v38 = vld [vmem:[#allocation6 + $0x358] sm:$0xff] }
 0x193   : > { %2587 = vmatpush.msra.mxu0 %v1539_v40  ;;  %2604 = vmatpush.msra.mxu1 %v1691_v43  ;;  %v1667_v61 = vld [vmem:[#allocation6 + $0x15d0] sm:$0xff]  ;;  %v1332_v39 = vld [vmem:[#allocation6 + $0xb58] sm:$0xff] }
 0x194   : > { %2644 = vmatpush.msra.mxu3 %v1947_v44  ;;  %2548 = vmatpush.msrb.mxu2 %v1275_v45  ;;  %v1923_v42 = vld [vmem:[#allocation6 + $0x1dd0] sm:$0xff]  ;;  %v1068_v44 = vld [vmem:[#allocation6 + $0x318] sm:$0xff] }
 0x195   : > { %2588 = vmatpush.msra.mxu0 %v1531_v46  ;;  %2605 = vmatpush.msra.mxu1 %v1683_v48  ;;  %v1251_v62 = vld [vmem:[#allocation6 + $0x8d0] sm:$0xff]  ;;  %v1324_v45 = vld [vmem:[#allocation6 + $0xb18] sm:$0xff] }
 0x196   : > { %2645 = vmatpush.msra.mxu3 %v1939_v49  ;;  %2549 = vmatpush.msrb.mxu2 %v1267_v50  ;;  %v1507_v63 = vld [vmem:[#allocation6 + $0x10d0] sm:$0xff]  ;;  %v1060_v49 = vld [vmem:[#allocation6 + $0x2d8] sm:$0xff] }
 0x197   : > { %2589 = vmatpush.msra.mxu0 %v1523_v51  ;;  %2606 = vmatpush.msra.mxu1 %v1675_v55  ;;  %v1659_v0 = vld [vmem:[#allocation6 + $0x1590] sm:$0xff]  ;;  %v1316_v50 = vld [vmem:[#allocation6 + $0xad8] sm:$0xff] }
 0x198   : > { %2646 = vmatpush.msra.mxu3 %v1931_v56  ;;  %2550 = vmatpush.msrb.mxu2 %v1259_v57  ;;  %v1915_v1 = vld [vmem:[#allocation6 + $0x1d90] sm:$0xff]  ;;  %v1052_v56 = vld [vmem:[#allocation6 + $0x298] sm:$0xff] }
 0x199   : > { %2590 = vmatpush.msra.mxu0 %v1515_v58  ;;  %2607 = vmatpush.msra.mxu1 %v1667_v61  ;;  %v1243_v2 = vld [vmem:[#allocation6 + $0x890] sm:$0xff]  ;;  %v1308_v57 = vld [vmem:[#allocation6 + $0xa98] sm:$0xff] }
 0x19a   : > { %2647 = vmatpush.msra.mxu3 %v1923_v42  ;;  %2551 = vmatpush.msrb.mxu2 %v1251_v62  ;;  %v1499_v3 = vld [vmem:[#allocation6 + $0x1090] sm:$0xff]  ;;  %v1044_v42 = vld [vmem:[#allocation6 + $0x258] sm:$0xff] }
 0x19b   : > { %v1651_v4 = vld [vmem:[#allocation6 + $0x1550] sm:$0xff]  ;;  %2591 = vmatpush.msra.mxu0 %v1507_v63  ;;  %2608 = vmatpush.msra.mxu1 %v1659_v0  ;;  %v1300_v62 = vld [vmem:[#allocation6 + $0xa58] sm:$0xff] }
 0x19c   : > { %v1907_v6 = vld [vmem:[#allocation6 + $0x1d50] sm:$0xff]  ;;  %2648 = vmatpush.msra.mxu3 %v1915_v1  ;;  %2552 = vmatpush.msrb.mxu2 %v1243_v2  ;;  %v1036_v1 = vld [vmem:[#allocation6 + $0x218] sm:$0xff] }
 0x19d   : > { %v1235_v7 = vld [vmem:[#allocation6 + $0x850] sm:$0xff]  ;;  %2592 = vmatpush.msra.mxu0 %v1499_v3  ;;  %2609 = vmatpush.msra.mxu1 %v1651_v4  ;;  %v1292_v2 = vld [vmem:[#allocation6 + $0xa18] sm:$0xff] }
 0x19e   : > { %v1491_v8 = vld [vmem:[#allocation6 + $0x1050] sm:$0xff]  ;;  %2649 = vmatpush.msra.mxu3 %v1907_v6  ;;  %2553 = vmatpush.msrb.mxu2 %v1235_v7  ;;  %v1028_v6 = vld [vmem:[#allocation6 + $0x1d8] sm:$0xff] }
 0x19f   : > { %v1643_v10 = vld [vmem:[#allocation6 + $0x1510] sm:$0xff]  ;;  %2593 = vmatpush.msra.mxu0 %v1491_v8  ;;  %v1284_v7 = vld [vmem:[#allocation6 + $0x9d8] sm:$0xff] }
 0x1a0   : > { %v1899_v11 = vld [vmem:[#allocation6 + $0x1d10] sm:$0xff]  ;;  %2610 = vmatpush.msra.mxu1 %v1643_v10 }
 0x1a1   : > { %v1227_v12 = vld [vmem:[#allocation6 + $0x810] sm:$0xff]  ;;  %2650 = vmatpush.msra.mxu3 %v1899_v11  ;;  %v1020_v11 = vld [vmem:[#allocation6 + $0x198] sm:$0xff] }
 0x1a2   : > { %v1483_v13 = vld [vmem:[#allocation6 + $0x1010] sm:$0xff]  ;;  %2554 = vmatpush.msrb.mxu2 %v1227_v12  ;;  %v1276_v12 = vld [vmem:[#allocation6 + $0x998] sm:$0xff] }
 0x1a3   : > { %v1635_v15 = vld [vmem:[#allocation6 + $0x14d0] sm:$0xff]  ;;  %2594 = vmatpush.msra.mxu0 %v1483_v13  ;;  %2555 = vmatmul.f32.vlgmr.msrb.gmra.mxu2 %v4047_v41 }
 0x1a4   : > { %v1891_v54 = vld [vmem:[#allocation6 + $0x1cd0] sm:$0xff]  ;;  %2611 = vmatpush.msra.mxu1 %v1635_v15  ;;  %2595 = vmatmul.f32.vlgmr.msra.gmra.mxu0 %v4055_v35 }
 0x1a5   : > { %v1859_v16 = vld [vmem:[#allocation6 + $0x1bd0] sm:$0xff]  ;;  %2651 = vmatpush.msra.mxu3 %v1891_v54  ;;  %v1012_v54 = vld [vmem:[#allocation6 + $0x158] sm:$0xff] }
 0x1a6   : > { %v2115_v17 = vld [vmem:[#allocation6 + $0x23d0] sm:$0xff]  ;;  %2619 = vmatpush.msra.mxu2 %v1859_v16  ;;  %v1268_v16 = vld [vmem:[#allocation6 + $0x958] sm:$0xff] }
 0x1a7   : > { %v1627_v18 = vld [vmem:[#allocation6 + $0x1490] sm:$0xff]  ;;  %2659 = vmatpush.msrb.mxu0 %v2115_v17 }
 0x1a8   : > { %v1883_v19 = vld [vmem:[#allocation6 + $0x1c90] sm:$0xff]  ;;  %2612 = vmatpush.msra.mxu1 %v1627_v18 }
 0x1a9   : > { %v1851_v20 = vld [vmem:[#allocation6 + $0x1b90] sm:$0xff]  ;;  %2652 = vmatpush.msra.mxu3 %v1883_v19  ;;  %v1004_v19 = vld [vmem:[#allocation6 + $0x118] sm:$0xff] }
 0x1aa   : > { %v2107_v60 = vld [vmem:[#allocation6 + $0x2390] sm:$0xff]  ;;  %2620 = vmatpush.msra.mxu2 %v1851_v20  ;;  %v1260_v20 = vld [vmem:[#allocation6 + $0x918] sm:$0xff] }
 0x1ab   : > { %v1619_v21 = vld [vmem:[#allocation6 + $0x1450] sm:$0xff]  ;;  %2660 = vmatpush.msrb.mxu0 %v2107_v60 }
 0x1ac   : > { %v1875_v22 = vld [vmem:[#allocation6 + $0x1c50] sm:$0xff]  ;;  %2613 = vmatpush.msra.mxu1 %v1619_v21 }
 0x1ad   : > { %v1843_v23 = vld [vmem:[#allocation6 + $0x1b50] sm:$0xff]  ;;  %2653 = vmatpush.msra.mxu3 %v1875_v22  ;;  %v996_v22 = vld [vmem:[#allocation6 + $0xd8] sm:$0xff] }
 0x1ae   : > { %v2099_v24 = vld [vmem:[#allocation6 + $0x2350] sm:$0xff]  ;;  %2621 = vmatpush.msra.mxu2 %v1843_v23  ;;  %v1252_v23 = vld [vmem:[#allocation6 + $0x8d8] sm:$0xff] }
 0x1af   : > { %v1611_v25 = vld [vmem:[#allocation6 + $0x1410] sm:$0xff]  ;;  %2661 = vmatpush.msrb.mxu0 %v2099_v24  ;;  %v1220_v24 = vld [vmem:[#allocation6 + $0x7d8] sm:$0xff] }
 0x1b0   : > { %v1867_v26 = vld [vmem:[#allocation6 + $0x1c10] sm:$0xff]  ;;  %2614 = vmatpush.msra.mxu1 %v1611_v25  ;;  %v1476_v25 = vld [vmem:[#allocation6 + $0xfd8] sm:$0xff] }
 0x1b1   : > { %v1835_v27 = vld [vmem:[#allocation6 + $0x1b10] sm:$0xff]  ;;  %2654 = vmatpush.msra.mxu3 %v1867_v26  ;;  %2615 = vmatmul.f32.vlgmr.msra.gmra.mxu1 %v4058_v53  ;;  %v988_v26 = vld [vmem:[#allocation6 + $0x98] sm:$0xff] }
 0x1b2   : > { %v2091_v28 = vld [vmem:[#allocation6 + $0x2310] sm:$0xff]  ;;  %2622 = vmatpush.msra.mxu2 %v1835_v27  ;;  %2655 = vmatmul.f32.vlgmr.msra.gmra.mxu3 %v4067_v5  ;;  %v1244_v27 = vld [vmem:[#allocation6 + $0x898] sm:$0xff] }
 0x1b3   : > { %v1827_v31 = vld [vmem:[#allocation6 + $0x1ad0] sm:$0xff]  ;;  %2662 = vmatpush.msrb.mxu0 %v2091_v28  ;;  %2679 = vmatpush.msrb.mxu1 %v1092_v29  ;;  %v1212_v28 = vld [vmem:[#allocation6 + $0x798] sm:$0xff]  ;;  %v4089_v29 = vld [vmem:[#allocation7] sm:$0xff] }
 0x1b4   : > { %v2083_v32 = vld [vmem:[#allocation6 + $0x22d0] sm:$0xff]  ;;  %2719 = vmatpush.msrb.mxu3 %v1348_v30  ;;  %2623 = vmatpush.msra.mxu2 %v1827_v31  ;;  %v1468_v30 = vld [vmem:[#allocation6 + $0xf98] sm:$0xff] }
 0x1b5   : > { %v1819_v36 = vld [vmem:[#allocation6 + $0x1a90] sm:$0xff]  ;;  %2663 = vmatpush.msrb.mxu0 %v2083_v32  ;;  %2680 = vmatpush.msrb.mxu1 %v1084_v33  ;;  %v980_v31 = vld [vmem:[#allocation6 + $0x58] sm:$0xff] }
 0x1b6   : > { %v2075_v37 = vld [vmem:[#allocation6 + $0x2290] sm:$0xff]  ;;  %2720 = vmatpush.msrb.mxu3 %v1340_v34  ;;  %2624 = vmatpush.msra.mxu2 %v1819_v36  ;;  %v1236_v32 = vld [vmem:[#allocation6 + $0x858] sm:$0xff] }
 0x1b7   : > { %v1811_v40 = vld [vmem:[#allocation6 + $0x1a50] sm:$0xff]  ;;  %2664 = vmatpush.msrb.mxu0 %v2075_v37  ;;  %2681 = vmatpush.msrb.mxu1 %v1076_v38  ;;  %v1204_v33 = vld [vmem:[#allocation6 + $0x758] sm:$0xff]  ;;  %v2123_v37 = vperm.slane %v4089_v29, 0 }
 0x1b8   : > { %v2067_v43 = vld [vmem:[#allocation6 + $0x2250] sm:$0xff]  ;;  %2721 = vmatpush.msrb.mxu3 %v1332_v39  ;;  %2625 = vmatpush.msra.mxu2 %v1811_v40  ;;  %v1460_v34 = vld [vmem:[#allocation6 + $0xf58] sm:$0xff]  ;;  %v2156_v39 = vpop.f32.mrf.mxu2 }
 0x1b9   : > { %v1803_v46 = vld [vmem:[#allocation6 + $0x1a10] sm:$0xff]  ;;  %2665 = vmatpush.msrb.mxu0 %v2067_v43  ;;  %2682 = vmatpush.msrb.mxu1 %v1068_v44  ;;  %v972_v36 = vld [vmem:[#allocation6 + $0x18] sm:$0xff] }
 0x1ba   : > { %v2059_v48 = vld [vmem:[#allocation6 + $0x2210] sm:$0xff]  ;;  %2722 = vmatpush.msrb.mxu3 %v1324_v45  ;;  %2626 = vmatpush.msra.mxu2 %v1803_v46  ;;  %v1228_v38 = vld [vmem:[#allocation6 + $0x818] sm:$0xff] }
 0x1bb   : > { %v1795_v51 = vld [vmem:[#allocation6 + $0x19d0] sm:$0xff]  ;;  %2666 = vmatpush.msrb.mxu0 %v2059_v48  ;;  %2683 = vmatpush.msrb.mxu1 %v1060_v49  ;;  %v1196_v40 = vld [vmem:[#allocation6 + $0x718] sm:$0xff]  ;;  %v2157_v48 = vadd.f32 %v2156_v39, %v2123_v37 }
 0x1bc   : > { %v2051_v55 = vld [vmem:[#allocation6 + $0x21d0] sm:$0xff]  ;;  %2723 = vmatpush.msrb.mxu3 %v1316_v50  ;;  %2627 = vmatpush.msra.mxu2 %v1795_v51  ;;  %v1452_v43 = vld [vmem:[#allocation6 + $0xf18] sm:$0xff]  ;;  %v2176_v51 = vpop.f32.mrf.mxu3 }
 0x1bd   : > { %v1787_v58 = vld [vmem:[#allocation6 + $0x1990] sm:$0xff]  ;;  %2667 = vmatpush.msrb.mxu0 %v2051_v55  ;;  %2684 = vmatpush.msrb.mxu1 %v1052_v56  ;;  %v1604_v44 = vld [vmem:[#allocation6 + $0x13d8] sm:$0xff] }
 0x1be   : > { %v2043_v61 = vld [vmem:[#allocation6 + $0x2190] sm:$0xff]  ;;  %2724 = vmatpush.msrb.mxu3 %v1308_v57  ;;  %2628 = vmatpush.msra.mxu2 %v1787_v58  ;;  %v1860_v45 = vld [vmem:[#allocation6 + $0x1bd8] sm:$0xff] }
 0x1bf   : > { %v1779_v63 = vld [vmem:[#allocation6 + $0x1950] sm:$0xff]  ;;  %2668 = vmatpush.msrb.mxu0 %v2043_v61  ;;  %2685 = vmatpush.msrb.mxu1 %v1044_v42  ;;  %v1188_v46 = vld [vmem:[#allocation6 + $0x6d8] sm:$0xff] }
 0x1c0   : > { %v2035_v0 = vld [vmem:[#allocation6 + $0x2150] sm:$0xff]  ;;  %2725 = vmatpush.msrb.mxu3 %v1300_v62  ;;  %2629 = vmatpush.msra.mxu2 %v1779_v63  ;;  %v1444_v49 = vld [vmem:[#allocation6 + $0xed8] sm:$0xff]  ;;  %v2177_v62 = vadd.f32 %v2176_v51, %v2157_v48 }
 0x1c1   : > { %v1771_v3 = vld [vmem:[#allocation6 + $0x1910] sm:$0xff]  ;;  %2669 = vmatpush.msrb.mxu0 %v2035_v0  ;;  %2686 = vmatpush.msrb.mxu1 %v1036_v1  ;;  %v1596_v50 = vld [vmem:[#allocation6 + $0x1398] sm:$0xff]  ;;  %v2196_v1 = vpop.f32.mrf.mxu0 }
 0x1c2   : > { %v2027_v4 = vld [vmem:[#allocation6 + $0x2110] sm:$0xff]  ;;  %2726 = vmatpush.msrb.mxu3 %v1292_v2  ;;  %2630 = vmatpush.msra.mxu2 %v1771_v3  ;;  %v1852_v55 = vld [vmem:[#allocation6 + $0x1b98] sm:$0xff] }
 0x1c3   : > { %v1763_v8 = vld [vmem:[#allocation6 + $0x18d0] sm:$0xff]  ;;  %2670 = vmatpush.msrb.mxu0 %v2027_v4  ;;  %2687 = vmatpush.msrb.mxu1 %v1028_v6  ;;  %v1180_v56 = vld [vmem:[#allocation6 + $0x698] sm:$0xff] }
 0x1c4   : > { %v2019_v10 = vld [vmem:[#allocation6 + $0x20d0] sm:$0xff]  ;;  %2727 = vmatpush.msrb.mxu3 %v1284_v7  ;;  %2631 = vmatpush.msra.mxu2 %v1763_v8  ;;  %v1436_v57 = vld [vmem:[#allocation6 + $0xe98] sm:$0xff] }
 0x1c5   : > { %v1755_v13 = vld [vmem:[#allocation6 + $0x1890] sm:$0xff]  ;;  %2671 = vmatpush.msrb.mxu0 %v2019_v10  ;;  %2688 = vmatpush.msrb.mxu1 %v1020_v11  ;;  %v1588_v58 = vld [vmem:[#allocation6 + $0x1358] sm:$0xff]  ;;  %v2197_v10 = vadd.f32 %v2196_v1, %v2177_v62 }
 0x1c6   : > { %v2011_v15 = vld [vmem:[#allocation6 + $0x2090] sm:$0xff]  ;;  %2728 = vmatpush.msrb.mxu3 %v1276_v12  ;;  %2632 = vmatpush.msra.mxu2 %v1755_v13  ;;  %v1844_v61 = vld [vmem:[#allocation6 + $0x1b58] sm:$0xff]  ;;  %v2216_v13 = vpop.f32.mrf.mxu1 }
 0x1c7   : > { %v1747_v17 = vld [vmem:[#allocation6 + $0x1850] sm:$0xff]  ;;  %2672 = vmatpush.msrb.mxu0 %v2011_v15  ;;  %2689 = vmatpush.msrb.mxu1 %v1012_v54  ;;  %v1172_v42 = vld [vmem:[#allocation6 + $0x658] sm:$0xff] }
 0x1c8   : > { %v2003_v18 = vld [vmem:[#allocation6 + $0x2050] sm:$0xff]  ;;  %2729 = vmatpush.msrb.mxu3 %v1268_v16  ;;  %2633 = vmatpush.msra.mxu2 %v1747_v17  ;;  %v1428_v63 = vld [vmem:[#allocation6 + $0xe58] sm:$0xff] }
 0x1c9   : > { %v1739_v60 = vld [vmem:[#allocation6 + $0x1810] sm:$0xff]  ;;  %2673 = vmatpush.msrb.mxu0 %v2003_v18  ;;  %2690 = vmatpush.msrb.mxu1 %v1004_v19  ;;  %v1580_v0 = vld [vmem:[#allocation6 + $0x1318] sm:$0xff]  ;;  %v2236_v18 = vpop.f32.mrf.mxu2 }
 0x1ca   : > { %v1995_v21 = vld [vmem:[#allocation6 + $0x2010] sm:$0xff]  ;;  %2730 = vmatpush.msrb.mxu3 %v1260_v20  ;;  %2634 = vmatpush.msra.mxu2 %v1739_v60  ;;  %v1836_v2 = vld [vmem:[#allocation6 + $0x1b18] sm:$0xff]  ;;  %v2217_v60 = vadd.f32 %v2216_v13, %v2197_v10 }
 0x1cb   : > { %2674 = vmatpush.msrb.mxu0 %v1995_v21  ;;  %2691 = vmatpush.msrb.mxu1 %v996_v22  ;;  %v1164_v3 = vld [vmem:[#allocation6 + $0x618] sm:$0xff] }
 0x1cc   : > { %2731 = vmatpush.msrb.mxu3 %v1252_v23  ;;  %2635 = vmatmul.f32.vlgmr.msra.gmra.mxu2 %v4064_v52  ;;  %v1420_v4 = vld [vmem:[#allocation6 + $0xe18] sm:$0xff]  ;;  %v2256_v23 = vpop.f32.mrf.mxu3 }
 0x1cd   : > { %2675 = vmatmul.f32.vlgmr.msrb.gmra.mxu0 %v4073_v59  ;;  %2699 = vmatpush.msrb.mxu2 %v1220_v24  ;;  %v1572_v6 = vld [vmem:[#allocation6 + $0x12d8] sm:$0xff] }
 0x1ce   : > { %2739 = vmatpush.msra.mxu0 %v1476_v25  ;;  %2692 = vmatpush.msrb.mxu1 %v988_v26  ;;  %v1828_v7 = vld [vmem:[#allocation6 + $0x1ad8] sm:$0xff]  ;;  %v2237_v26 = vadd.f32 %v2236_v18, %v2217_v60  ;;  %v2296_v37 = vpop.f32.mrf.mxu1  ;;  %v1221_v18 = vld [vmem:[#allocation6 + $0x7e0] sm:$0xff] }
 0x1cf   : > { %2732 = vmatpush.msrb.mxu3 %v1244_v27  ;;  %2700 = vmatpush.msrb.mxu2 %v1212_v28  ;;  %v1156_v8 = vld [vmem:[#allocation6 + $0x5d8] sm:$0xff] }
 0x1d0   : > { %2740 = vmatpush.msra.mxu0 %v1468_v30  ;;  %2693 = vmatpush.msrb.mxu1 %v980_v31  ;;  %v1412_v11 = vld [vmem:[#allocation6 + $0xdd8] sm:$0xff]  ;;  %v2276_v30 = vpop.f32.mrf.mxu0 }
 0x1d1   : > { %2733 = vmatpush.msrb.mxu3 %v1236_v32  ;;  %2701 = vmatpush.msrb.mxu2 %v1204_v33  ;;  %v1564_v12 = vld [vmem:[#allocation6 + $0x1298] sm:$0xff]  ;;  %v2257_v33 = vadd.f32 %v2256_v23, %v2237_v26 }
 0x1d2   : > { %2741 = vmatpush.msra.mxu0 %v1460_v34  ;;  %2694 = vmatpush.msrb.mxu1 %v972_v36  ;;  %v1820_v15 = vld [vmem:[#allocation6 + $0x1a98] sm:$0xff] }
 0x1d3   : > { %2734 = vmatpush.msrb.mxu3 %v1228_v38  ;;  %2695 = vmatmul.f32.vlgmr.msrb.gmra.mxu1 %v4039_v9  ;;  %v1148_v54 = vld [vmem:[#allocation6 + $0x598] sm:$0xff] }
 0x1d4   : > { %2702 = vmatpush.msrb.mxu2 %v1196_v40  ;;  %2735 = vmatmul.f32.vlgmr.msrb.gmra.mxu3 %v4047_v41  ;;  %v1404_v16 = vld [vmem:[#allocation6 + $0xd98] sm:$0xff]  ;;  %v2277_v40 = vadd.f32 %v2276_v30, %v2257_v33 }
 0x1d5   : > { %2742 = vmatpush.msra.mxu0 %v1452_v43  ;;  %2759 = vmatpush.msra.mxu1 %v1604_v44  ;;  %v1556_v17 = vld [vmem:[#allocation6 + $0x1258] sm:$0xff] }
 0x1d6   : > { %2799 = vmatpush.msra.mxu3 %v1860_v45  ;;  %2703 = vmatpush.msrb.mxu2 %v1188_v46  ;;  %v1812_v19 = vld [vmem:[#allocation6 + $0x1a58] sm:$0xff]  ;;  %v2297_v48 = vadd.f32 %v2296_v37, %v2277_v40 }
 0x1d7   : > { %2743 = vmatpush.msra.mxu0 %v1444_v49  ;;  %2760 = vmatpush.msra.mxu1 %v1596_v50  ;;  %v1140_v20 = vld [vmem:[#allocation6 + $0x558] sm:$0xff] }
 0x1d8   : > { %2800 = vmatpush.msra.mxu3 %v1852_v55  ;;  %2704 = vmatpush.msrb.mxu2 %v1180_v56  ;;  %v1396_v21 = vld [vmem:[#allocation6 + $0xd58] sm:$0xff]  ;;  %v2316_v56 = vpop.f32.mrf.mxu2 }
 0x1d9   : > { %2744 = vmatpush.msra.mxu0 %v1436_v57  ;;  %2761 = vmatpush.msra.mxu1 %v1588_v58  ;;  %v1548_v22 = vld [vmem:[#allocation6 + $0x1218] sm:$0xff] }
 0x1da   : > { %2801 = vmatpush.msra.mxu3 %v1844_v61  ;;  %2705 = vmatpush.msrb.mxu2 %v1172_v42  ;;  %v1804_v24 = vld [vmem:[#allocation6 + $0x1a18] sm:$0xff]  ;;  %v2317_v61 = vadd.f32 %v2316_v56, %v2297_v48 }
 0x1db   : > { %2745 = vmatpush.msra.mxu0 %v1428_v63  ;;  %2762 = vmatpush.msra.mxu1 %v1580_v0  ;;  %v1132_v25 = vld [vmem:[#allocation6 + $0x518] sm:$0xff] }
 0x1dc   : > { %2802 = vmatpush.msra.mxu3 %v1836_v2  ;;  %2706 = vmatpush.msrb.mxu2 %v1164_v3  ;;  %v1388_v27 = vld [vmem:[#allocation6 + $0xd18] sm:$0xff]  ;;  %v3579_v63 = vmax.f32 %v2317_v61, 0.0 }
 0x1dd   : > { %2746 = vmatpush.msra.mxu0 %v1420_v4  ;;  %2763 = vmatpush.msra.mxu1 %v1572_v6  ;;  %v1540_v28 = vld [vmem:[#allocation6 + $0x11d8] sm:$0xff] }
 0x1de   : > { %2803 = vmatpush.msra.mxu3 %v1828_v7  ;;  %2707 = vmatpush.msrb.mxu2 %v1156_v8  ;;  %v1796_v31 = vld [vmem:[#allocation6 + $0x19d8] sm:$0xff]  ;;  %3587 = vst [vmem:[%s4099_s30] sm:$0xff] %v3579_v63  ;;  %v1165_v63 = vld [vmem:[#allocation6 + $0x620] sm:$0xff] }
 0x1df   : > { %2747 = vmatpush.msra.mxu0 %v1412_v11  ;;  %2764 = vmatpush.msra.mxu1 %v1564_v12  ;;  %v1124_v32 = vld [vmem:[#allocation6 + $0x4d8] sm:$0xff] }
 0x1e0   : > { %2804 = vmatpush.msra.mxu3 %v1820_v15  ;;  %2708 = vmatpush.msrb.mxu2 %v1148_v54  ;;  %v1380_v34 = vld [vmem:[#allocation6 + $0xcd8] sm:$0xff]  ;;  %v2124_v15 = vperm.slane %v4089_v29, 1  ;;  %v2396_v37 = vpop.f32.mrf.mxu2 }
 0x1e1   : > { %2748 = vmatpush.msra.mxu0 %v1404_v16  ;;  %2765 = vmatpush.msra.mxu1 %v1556_v17  ;;  %v1532_v36 = vld [vmem:[#allocation6 + $0x1198] sm:$0xff]  ;;  %v2336_v17 = vpop.f32.mrf.mxu3 }
 0x1e2   : > { %2805 = vmatpush.msra.mxu3 %v1812_v19  ;;  %2709 = vmatpush.msrb.mxu2 %v1140_v20  ;;  %v1788_v38 = vld [vmem:[#allocation6 + $0x1998] sm:$0xff] }
 0x1e3   : > { %2749 = vmatpush.msra.mxu0 %v1396_v21  ;;  %2766 = vmatpush.msra.mxu1 %v1548_v22  ;;  %v1116_v39 = vld [vmem:[#allocation6 + $0x498] sm:$0xff]  ;;  %v2356_v21 = vpop.f32.mrf.mxu0  ;;  %v1213_v22 = vld [vmem:[#allocation6 + $0x7a0] sm:$0xff] }
 0x1e4   : > { %2806 = vmatpush.msra.mxu3 %v1804_v24  ;;  %2710 = vmatpush.msrb.mxu2 %v1132_v25  ;;  %v1372_v43 = vld [vmem:[#allocation6 + $0xc98] sm:$0xff]  ;;  %v2337_v24 = vadd.f32 %v2336_v17, %v2124_v15 }
 0x1e5   : > { %2750 = vmatpush.msra.mxu0 %v1388_v27  ;;  %2767 = vmatpush.msra.mxu1 %v1540_v28  ;;  %v1524_v44 = vld [vmem:[#allocation6 + $0x1158] sm:$0xff]  ;;  %v2376_v27 = vpop.f32.mrf.mxu1  ;;  %v1205_v28 = vld [vmem:[#allocation6 + $0x760] sm:$0xff] }
 0x1e6   : > { %2807 = vmatpush.msra.mxu3 %v1796_v31  ;;  %2711 = vmatpush.msrb.mxu2 %v1124_v32  ;;  %v1780_v45 = vld [vmem:[#allocation6 + $0x1958] sm:$0xff]  ;;  %v2357_v31 = vadd.f32 %v2356_v21, %v2337_v24 }
 0x1e7   : > { %2751 = vmatpush.msra.mxu0 %v1380_v34  ;;  %2768 = vmatpush.msra.mxu1 %v1532_v36  ;;  %v1108_v46 = vld [vmem:[#allocation6 + $0x458] sm:$0xff]  ;;  %v1197_v34 = vld [vmem:[#allocation6 + $0x720] sm:$0xff] }
 0x1e8   : > { %2808 = vmatpush.msra.mxu3 %v1788_v38  ;;  %2712 = vmatpush.msrb.mxu2 %v1116_v39  ;;  %v1364_v49 = vld [vmem:[#allocation6 + $0xc58] sm:$0xff]  ;;  %v2377_v38 = vadd.f32 %v2376_v27, %v2357_v31  ;;  %v1125_v27 = vld [vmem:[#allocation6 + $0x4e0] sm:$0xff] }
 0x1e9   : > { %v1516_v50 = vld [vmem:[#allocation6 + $0x1118] sm:$0xff]  ;;  %2752 = vmatpush.msra.mxu0 %v1372_v43  ;;  %2769 = vmatpush.msra.mxu1 %v1524_v44  ;;  %v1189_v43 = vld [vmem:[#allocation6 + $0x6e0] sm:$0xff]  ;;  %v2416_v56 = vpop.f32.mrf.mxu3 }
 0x1ea   : > { %v1772_v51 = vld [vmem:[#allocation6 + $0x1918] sm:$0xff]  ;;  %2809 = vmatpush.msra.mxu3 %v1780_v45  ;;  %2713 = vmatpush.msrb.mxu2 %v1108_v46  ;;  %v2397_v45 = vadd.f32 %v2396_v37, %v2377_v38  ;;  %v1349_v31 = vld [vmem:[#allocation6 + $0xbe0] sm:$0xff] }
 0x1eb   : > { %v1100_v55 = vld [vmem:[#allocation6 + $0x418] sm:$0xff]  ;;  %2753 = vmatpush.msra.mxu0 %v1364_v49  ;;  %2770 = vmatpush.msra.mxu1 %v1516_v50  ;;  %v1181_v49 = vld [vmem:[#allocation6 + $0x6a0] sm:$0xff] }
 0x1ec   : > { %v1356_v57 = vld [vmem:[#allocation6 + $0xc18] sm:$0xff]  ;;  %2810 = vmatpush.msra.mxu3 %v1772_v51  ;;  %2714 = vmatpush.msrb.mxu2 %v1100_v55  ;;  %v2417_v61 = vadd.f32 %v2416_v56, %v2397_v45  ;;  %v1341_v37 = vld [vmem:[#allocation6 + $0xba0] sm:$0xff] }
 0x1ed   : > { %v1508_v58 = vld [vmem:[#allocation6 + $0x10d8] sm:$0xff]  ;;  %2754 = vmatpush.msra.mxu0 %v1356_v57  ;;  %2715 = vmatmul.f32.vlgmr.msrb.gmra.mxu2 %v4041_v14  ;;  %v1173_v57 = vld [vmem:[#allocation6 + $0x660] sm:$0xff] }
 0x1ee   : > { %v1764_v42 = vld [vmem:[#allocation6 + $0x18d8] sm:$0xff]  ;;  %2771 = vmatpush.msra.mxu1 %v1508_v58  ;;  %2755 = vmatmul.f32.vlgmr.msra.gmra.mxu0 %v4049_v47  ;;  %v1101_v45 = vld [vmem:[#allocation6 + $0x420] sm:$0xff] }
 0x1ef   : > { %v1732_v62 = vld [vmem:[#allocation6 + $0x17d8] sm:$0xff]  ;;  %2811 = vmatpush.msra.mxu3 %v1764_v42  ;;  %v1469_v56 = vld [vmem:[#allocation6 + $0xfa0] sm:$0xff] }
 0x1f0   : > { %v1988_v0 = vld [vmem:[#allocation6 + $0x1fd8] sm:$0xff]  ;;  %2779 = vmatpush.msra.mxu2 %v1732_v62 }
 0x1f1   : > { %v1500_v1 = vld [vmem:[#allocation6 + $0x1098] sm:$0xff]  ;;  %2819 = vmatpush.msrb.mxu0 %v1988_v0 }
 0x1f2   : > { %v1756_v2 = vld [vmem:[#allocation6 + $0x1898] sm:$0xff]  ;;  %2772 = vmatpush.msra.mxu1 %v1500_v1 }
 0x1f3   : > { %v1724_v3 = vld [vmem:[#allocation6 + $0x1798] sm:$0xff]  ;;  %2812 = vmatpush.msra.mxu3 %v1756_v2 }
 0x1f4   : > { %v1980_v4 = vld [vmem:[#allocation6 + $0x1f98] sm:$0xff]  ;;  %2780 = vmatpush.msra.mxu2 %v1724_v3  ;;  %v2436_v3 = vpop.f32.mrf.mxu0 }
 0x1f5   : > { %v1492_v6 = vld [vmem:[#allocation6 + $0x1058] sm:$0xff]  ;;  %2820 = vmatpush.msrb.mxu0 %v1980_v4  ;;  %v1157_v4 = vld [vmem:[#allocation6 + $0x5e0] sm:$0xff] }
 0x1f6   : > { %v1748_v7 = vld [vmem:[#allocation6 + $0x1858] sm:$0xff]  ;;  %2773 = vmatpush.msra.mxu1 %v1492_v6 }
 0x1f7   : > { %v1716_v8 = vld [vmem:[#allocation6 + $0x1758] sm:$0xff]  ;;  %2813 = vmatpush.msra.mxu3 %v1748_v7 }
 0x1f8   : > { %v1972_v10 = vld [vmem:[#allocation6 + $0x1f58] sm:$0xff]  ;;  %2781 = vmatpush.msra.mxu2 %v1716_v8 }
 0x1f9   : > { %v1484_v11 = vld [vmem:[#allocation6 + $0x1018] sm:$0xff]  ;;  %2821 = vmatpush.msrb.mxu0 %v1972_v10  ;;  %v2437_v10 = vadd.f32 %v2436_v3, %v2417_v61  ;;  %v1309_v61 = vld [vmem:[#allocation6 + $0xaa0] sm:$0xff] }
 0x1fa   : > { %v1740_v12 = vld [vmem:[#allocation6 + $0x1818] sm:$0xff]  ;;  %2774 = vmatpush.msra.mxu1 %v1484_v11  ;;  %v1149_v11 = vld [vmem:[#allocation6 + $0x5a0] sm:$0xff] }
 0x1fb   : > { %v1708_v13 = vld [vmem:[#allocation6 + $0x1718] sm:$0xff]  ;;  %2814 = vmatpush.msra.mxu3 %v1740_v12  ;;  %2775 = vmatmul.f32.vlgmr.msra.gmra.mxu1 %v4055_v35  ;;  %v1037_v3 = vld [vmem:[#allocation6 + $0x220] sm:$0xff] }
 0x1fc   : > { %v1964_v54 = vld [vmem:[#allocation6 + $0x1f18] sm:$0xff]  ;;  %2782 = vmatpush.msra.mxu2 %v1708_v13  ;;  %2815 = vmatmul.f32.vlgmr.msra.gmra.mxu3 %v4064_v52 }
 0x1fd   : > { %v2116_v16 = vld [vmem:[#allocation6 + $0x23d8] sm:$0xff]  ;;  %2822 = vmatpush.msrb.mxu0 %v1964_v54  ;;  %2879 = vmatpush.msrb.mxu3 %v1221_v18  ;;  %v2456_v54 = vpop.f32.mrf.mxu1 }
 0x1fe   : > { %v1700_v19 = vld [vmem:[#allocation6 + $0x16d8] sm:$0xff]  ;;  %2839 = vmatpush.msrb.mxu1 %v2116_v16  ;;  %v1141_v16 = vld [vmem:[#allocation6 + $0x560] sm:$0xff] }
 0x1ff   : > { %v1956_v20 = vld [vmem:[#allocation6 + $0x1ed8] sm:$0xff]  ;;  %2783 = vmatpush.msra.mxu2 %v1700_v19  ;;  %2880 = vmatpush.msrb.mxu3 %v1213_v22 }
 0x200   : > { %v2108_v60 = vld [vmem:[#allocation6 + $0x2398] sm:$0xff]  ;;  %2823 = vmatpush.msrb.mxu0 %v1956_v20  ;;  %v2457_v20 = vadd.f32 %v2456_v54, %v2437_v10  ;;  %v1285_v10 = vld [vmem:[#allocation6 + $0x9e0] sm:$0xff] }
 0x201   : > { %v1692_v23 = vld [vmem:[#allocation6 + $0x1698] sm:$0xff]  ;;  %2840 = vmatpush.msrb.mxu1 %v2108_v60  ;;  %2881 = vmatpush.msrb.mxu3 %v1205_v28  ;;  %v1133_v60 = vld [vmem:[#allocation6 + $0x520] sm:$0xff] }
 0x202   : > { %v1948_v25 = vld [vmem:[#allocation6 + $0x1e98] sm:$0xff]  ;;  %2784 = vmatpush.msra.mxu2 %v1692_v23  ;;  %v1093_v28 = vld [vmem:[#allocation6 + $0x3e0] sm:$0xff] }
 0x203   : > { %v2100_v26 = vld [vmem:[#allocation6 + $0x2358] sm:$0xff]  ;;  %2824 = vmatpush.msrb.mxu0 %v1948_v25  ;;  %2882 = vmatpush.msrb.mxu3 %v1197_v34  ;;  %v1085_v34 = vld [vmem:[#allocation6 + $0x3a0] sm:$0xff] }
 0x204   : > { %v1684_v30 = vld [vmem:[#allocation6 + $0x1658] sm:$0xff]  ;;  %2841 = vmatpush.msrb.mxu1 %v2100_v26  ;;  %v2476_v22 = vpop.f32.mrf.mxu2  ;;  %v2496_v26 = vpop.f32.mrf.mxu3  ;;  %v1429_v54 = vld [vmem:[#allocation6 + $0xe60] sm:$0xff] }
 0x205   : > { %v1940_v32 = vld [vmem:[#allocation6 + $0x1e58] sm:$0xff]  ;;  %2785 = vmatpush.msra.mxu2 %v1684_v30  ;;  %2883 = vmatpush.msrb.mxu3 %v1189_v43  ;;  %v2477_v25 = vadd.f32 %v2476_v22, %v2457_v20  ;;  %v1333_v43 = vld [vmem:[#allocation6 + $0xb60] sm:$0xff] }
 0x206   : > { %v2092_v33 = vld [vmem:[#allocation6 + $0x2318] sm:$0xff]  ;;  %2825 = vmatpush.msrb.mxu0 %v1940_v32  ;;  %v1677_v20 = vld [vmem:[#allocation6 + $0x1620] sm:$0xff] }
 0x207   : > { %v1676_v36 = vld [vmem:[#allocation6 + $0x1618] sm:$0xff]  ;;  %2842 = vmatpush.msrb.mxu1 %v2092_v33  ;;  %2884 = vmatpush.msrb.mxu3 %v1181_v49  ;;  %v2497_v30 = vadd.f32 %v2496_v26, %v2477_v25  ;;  %v1117_v33 = vld [vmem:[#allocation6 + $0x4a0] sm:$0xff] }
 0x208   : > { %v1932_v39 = vld [vmem:[#allocation6 + $0x1e18] sm:$0xff]  ;;  %2786 = vmatpush.msra.mxu2 %v1676_v36  ;;  %v1477_v49 = vld [vmem:[#allocation6 + $0xfe0] sm:$0xff] }
 0x209   : > { %v2084_v40 = vld [vmem:[#allocation6 + $0x22d8] sm:$0xff]  ;;  %2826 = vmatpush.msrb.mxu0 %v1932_v39  ;;  %2885 = vmatpush.msrb.mxu3 %v1173_v57  ;;  %v3580_v36 = vmax.f32 %v2497_v30, 0.0  ;;  %v1109_v39 = vld [vmem:[#allocation6 + $0x460] sm:$0xff] }
 0x20a   : > { %v1668_v44 = vld [vmem:[#allocation6 + $0x15d8] sm:$0xff]  ;;  %2843 = vmatpush.msrb.mxu1 %v2084_v40  ;;  %v1077_v40 = vld [vmem:[#allocation6 + $0x360] sm:$0xff] }
 0x20b   : > { %v1924_v46 = vld [vmem:[#allocation6 + $0x1dd8] sm:$0xff]  ;;  %2787 = vmatpush.msra.mxu2 %v1668_v44  ;;  %2886 = vmatpush.msrb.mxu3 %v1165_v63  ;;  %3588 = vst [vmem:[%s4099_s30 + $0x8] sm:$0xff] %v3580_v36  ;;  %v1725_v57 = vld [vmem:[#allocation6 + $0x17a0] sm:$0xff] }
 0x20c   : > { %v2076_v48 = vld [vmem:[#allocation6 + $0x2298] sm:$0xff]  ;;  %2827 = vmatpush.msrb.mxu0 %v1924_v46  ;;  %v1069_v46 = vld [vmem:[#allocation6 + $0x320] sm:$0xff] }
 0x20d   : > { %v1660_v50 = vld [vmem:[#allocation6 + $0x1598] sm:$0xff]  ;;  %2844 = vmatpush.msrb.mxu1 %v2076_v48  ;;  %2887 = vmatpush.msrb.mxu3 %v1157_v4  ;;  %v1325_v48 = vld [vmem:[#allocation6 + $0xb20] sm:$0xff] }
 0x20e   : > { %v1916_v51 = vld [vmem:[#allocation6 + $0x1d98] sm:$0xff]  ;;  %2788 = vmatpush.msra.mxu2 %v1660_v50  ;;  %v1733_v50 = vld [vmem:[#allocation6 + $0x17e0] sm:$0xff] }
 0x20f   : > { %v2068_v55 = vld [vmem:[#allocation6 + $0x2258] sm:$0xff]  ;;  %2828 = vmatpush.msrb.mxu0 %v1916_v51  ;;  %2888 = vmatpush.msrb.mxu3 %v1149_v11  ;;  %v1061_v51 = vld [vmem:[#allocation6 + $0x2e0] sm:$0xff] }
 0x210   : > { %v1652_v58 = vld [vmem:[#allocation6 + $0x1558] sm:$0xff]  ;;  %2845 = vmatpush.msrb.mxu1 %v2068_v55  ;;  %v1317_v55 = vld [vmem:[#allocation6 + $0xae0] sm:$0xff] }
 0x211   : > { %v1908_v42 = vld [vmem:[#allocation6 + $0x1d58] sm:$0xff]  ;;  %2789 = vmatpush.msra.mxu2 %v1652_v58  ;;  %2889 = vmatpush.msrb.mxu3 %v1141_v16  ;;  %v1053_v58 = vld [vmem:[#allocation6 + $0x2a0] sm:$0xff] }
 0x212   : > { %v2060_v62 = vld [vmem:[#allocation6 + $0x2218] sm:$0xff]  ;;  %2829 = vmatpush.msrb.mxu0 %v1908_v42  ;;  %v1461_v42 = vld [vmem:[#allocation6 + $0xf60] sm:$0xff] }
 0x213   : > { %v1644_v0 = vld [vmem:[#allocation6 + $0x1518] sm:$0xff]  ;;  %2846 = vmatpush.msrb.mxu1 %v2060_v62  ;;  %2890 = vmatpush.msrb.mxu3 %v1133_v60  ;;  %v1717_v62 = vld [vmem:[#allocation6 + $0x1760] sm:$0xff] }
 0x214   : > { %v1900_v1 = vld [vmem:[#allocation6 + $0x1d18] sm:$0xff]  ;;  %2790 = vmatpush.msra.mxu2 %v1644_v0  ;;  %v1045_v63 = vld [vmem:[#allocation6 + $0x260] sm:$0xff] }
 0x215   : > { %v2052_v2 = vld [vmem:[#allocation6 + $0x21d8] sm:$0xff]  ;;  %2830 = vmatpush.msrb.mxu0 %v1900_v1  ;;  %2891 = vmatpush.msrb.mxu3 %v1125_v27  ;;  %v1301_v0 = vld [vmem:[#allocation6 + $0xa60] sm:$0xff] }
 0x216   : > { %v1636_v6 = vld [vmem:[#allocation6 + $0x14d8] sm:$0xff]  ;;  %2847 = vmatpush.msrb.mxu1 %v2052_v2  ;;  %v1453_v1 = vld [vmem:[#allocation6 + $0xf20] sm:$0xff] }
 0x217   : > { %v1892_v7 = vld [vmem:[#allocation6 + $0x1cd8] sm:$0xff]  ;;  %2791 = vmatpush.msra.mxu2 %v1636_v6  ;;  %2892 = vmatpush.msrb.mxu3 %v1117_v33  ;;  %v1709_v2 = vld [vmem:[#allocation6 + $0x1720] sm:$0xff] }
 0x218   : > { %v2044_v8 = vld [vmem:[#allocation6 + $0x2198] sm:$0xff]  ;;  %2831 = vmatpush.msrb.mxu0 %v1892_v7  ;;  %v1293_v4 = vld [vmem:[#allocation6 + $0xa20] sm:$0xff] }
 0x219   : > { %v1628_v12 = vld [vmem:[#allocation6 + $0x1498] sm:$0xff]  ;;  %2848 = vmatpush.msrb.mxu1 %v2044_v8  ;;  %2893 = vmatpush.msrb.mxu3 %v1109_v39  ;;  %v1445_v6 = vld [vmem:[#allocation6 + $0xee0] sm:$0xff] }
 0x21a   : > { %v1884_v13 = vld [vmem:[#allocation6 + $0x1c98] sm:$0xff]  ;;  %2792 = vmatpush.msra.mxu2 %v1628_v12  ;;  %v1701_v7 = vld [vmem:[#allocation6 + $0x16e0] sm:$0xff] }
 0x21b   : > { %v2036_v15 = vld [vmem:[#allocation6 + $0x2158] sm:$0xff]  ;;  %2832 = vmatpush.msrb.mxu0 %v1884_v13  ;;  %2894 = vmatpush.msrb.mxu3 %v1101_v45  ;;  %v1029_v8 = vld [vmem:[#allocation6 + $0x1e0] sm:$0xff] }
 0x21c   : > { %v1620_v17 = vld [vmem:[#allocation6 + $0x1458] sm:$0xff]  ;;  %2849 = vmatpush.msrb.mxu1 %v2036_v15  ;;  %2895 = vmatmul.f32.vlgmr.msrb.gmra.mxu3 %v4041_v14  ;;  %v1437_v11 = vld [vmem:[#allocation6 + $0xea0] sm:$0xff] }
 0x21d   : > { %v1876_v18 = vld [vmem:[#allocation6 + $0x1c58] sm:$0xff]  ;;  %2793 = vmatpush.msra.mxu2 %v1620_v17  ;;  %2959 = vmatpush.msra.mxu3 %v1733_v50  ;;  %v1693_v12 = vld [vmem:[#allocation6 + $0x16a0] sm:$0xff] }
 0x21e   : > { %v2028_v19 = vld [vmem:[#allocation6 + $0x2118] sm:$0xff]  ;;  %2833 = vmatpush.msrb.mxu0 %v1876_v18  ;;  %v1021_v13 = vld [vmem:[#allocation6 + $0x1a0] sm:$0xff] }
 0x21f   : > { %v1612_v21 = vld [vmem:[#allocation6 + $0x1418] sm:$0xff]  ;;  %2850 = vmatpush.msrb.mxu1 %v2028_v19  ;;  %2960 = vmatpush.msra.mxu3 %v1725_v57  ;;  %v1277_v15 = vld [vmem:[#allocation6 + $0x9a0] sm:$0xff] }
 0x220   : > { %v1868_v23 = vld [vmem:[#allocation6 + $0x1c18] sm:$0xff]  ;;  %2794 = vmatpush.msra.mxu2 %v1612_v21  ;;  %v1685_v16 = vld [vmem:[#allocation6 + $0x1660] sm:$0xff] }
 0x221   : > { %v2020_v24 = vld [vmem:[#allocation6 + $0x20d8] sm:$0xff]  ;;  %2834 = vmatpush.msrb.mxu0 %v1868_v23  ;;  %2795 = vmatmul.f32.vlgmr.msra.gmra.mxu2 %v4058_v53  ;;  %v1013_v17 = vld [vmem:[#allocation6 + $0x160] sm:$0xff] }
 0x222   : > { %2851 = vmatpush.msrb.mxu1 %v2020_v24  ;;  %v2012_v32 = vld [vmem:[#allocation6 + $0x2098] sm:$0xff]  ;;  %2835 = vmatmul.f32.vlgmr.msrb.gmra.mxu0 %v4067_v5  ;;  %v1269_v18 = vld [vmem:[#allocation6 + $0x960] sm:$0xff] }
 0x223   : > { %2859 = vmatpush.msrb.mxu2 %v1093_v28  ;;  %v2004_v38 = vld [vmem:[#allocation6 + $0x2058] sm:$0xff]  ;;  %2899 = vmatpush.msra.mxu0 %v1349_v31  ;;  %v1421_v19 = vld [vmem:[#allocation6 + $0xe20] sm:$0xff] }
 0x224   : > { %2852 = vmatpush.msrb.mxu1 %v2012_v32  ;;  %v1996_v44 = vld [vmem:[#allocation6 + $0x2018] sm:$0xff]  ;;  %2961 = vmatpush.msra.mxu3 %v1717_v62  ;;  %v1005_v60 = vld [vmem:[#allocation6 + $0x120] sm:$0xff] }
 0x225   : > { %2860 = vmatpush.msrb.mxu2 %v1085_v34  ;;  %2900 = vmatpush.msra.mxu0 %v1341_v37  ;;  %v1261_v21 = vld [vmem:[#allocation6 + $0x920] sm:$0xff] }
 0x226   : > { %2853 = vmatpush.msrb.mxu1 %v2004_v38  ;;  %2962 = vmatpush.msra.mxu3 %v1709_v2  ;;  %v1413_v22 = vld [vmem:[#allocation6 + $0xde0] sm:$0xff]  ;;  %v2125_v2 = vperm.slane %v4089_v29, 2 }
 0x227   : > { %2861 = vmatpush.msrb.mxu2 %v1077_v40  ;;  %2901 = vmatpush.msra.mxu0 %v1333_v43  ;;  %v1669_v23 = vld [vmem:[#allocation6 + $0x15e0] sm:$0xff] }
 0x228   : > { %2854 = vmatpush.msrb.mxu1 %v1996_v44  ;;  %2963 = vmatpush.msra.mxu3 %v1701_v7  ;;  %v997_v24 = vld [vmem:[#allocation6 + $0xe0] sm:$0xff]  ;;  %v1086_v7 = vld [vmem:[#allocation6 + $0x3a8] sm:$0xff] }
 0x229   : > { %2855 = vmatmul.f32.vlgmr.msrb.gmra.mxu1 %v4073_v59  ;;  %2862 = vmatpush.msrb.mxu2 %v1069_v46  ;;  %v1253_v25 = vld [vmem:[#allocation6 + $0x8e0] sm:$0xff] }
 0x22a   : > { %2902 = vmatpush.msra.mxu0 %v1325_v48  ;;  %2919 = vmatpush.msra.mxu1 %v1477_v49  ;;  %v1405_v26 = vld [vmem:[#allocation6 + $0xda0] sm:$0xff] }
 0x22b   : > { %2863 = vmatpush.msrb.mxu2 %v1061_v51  ;;  %2964 = vmatpush.msra.mxu3 %v1693_v12  ;;  %v1661_v27 = vld [vmem:[#allocation6 + $0x15a0] sm:$0xff]  ;;  %v2536_v12 = vpop.f32.mrf.mxu1 }
 0x22c   : > { %2903 = vmatpush.msra.mxu0 %v1317_v55  ;;  %2920 = vmatpush.msra.mxu1 %v1469_v56  ;;  %v989_v28 = vld [vmem:[#allocation6 + $0xa0] sm:$0xff] }
 0x22d   : > { %2864 = vmatpush.msrb.mxu2 %v1053_v58  ;;  %2965 = vmatpush.msra.mxu3 %v1685_v16  ;;  %v1245_v30 = vld [vmem:[#allocation6 + $0x8a0] sm:$0xff] }
 0x22e   : > { %2904 = vmatpush.msra.mxu0 %v1309_v61  ;;  %2921 = vmatpush.msra.mxu1 %v1461_v42  ;;  %v1397_v31 = vld [vmem:[#allocation6 + $0xd60] sm:$0xff] }
 0x22f   : > { %2865 = vmatpush.msrb.mxu2 %v1045_v63  ;;  %2966 = vmatpush.msra.mxu3 %v1677_v20  ;;  %v1653_v32 = vld [vmem:[#allocation6 + $0x1560] sm:$0xff] }
 0x230   : > { %2905 = vmatpush.msra.mxu0 %v1301_v0  ;;  %2922 = vmatpush.msra.mxu1 %v1453_v1  ;;  %v981_v33 = vld [vmem:[#allocation6 + $0x60] sm:$0xff]  ;;  %v1094_v0 = vld [vmem:[#allocation6 + $0x3e8] sm:$0xff] }
 0x231   : > { %2866 = vmatpush.msrb.mxu2 %v1037_v3  ;;  %2967 = vmatpush.msra.mxu3 %v1669_v23  ;;  %v1237_v34 = vld [vmem:[#allocation6 + $0x860] sm:$0xff] }
 0x232   : > { %2906 = vmatpush.msra.mxu0 %v1293_v4  ;;  %2923 = vmatpush.msra.mxu1 %v1445_v6  ;;  %v1389_v36 = vld [vmem:[#allocation6 + $0xd20] sm:$0xff]  ;;  %v2516_v6 = vpop.f32.mrf.mxu0 }
 0x233   : > { %2867 = vmatpush.msrb.mxu2 %v1029_v8  ;;  %2968 = vmatpush.msra.mxu3 %v1661_v27  ;;  %v1645_v37 = vld [vmem:[#allocation6 + $0x1520] sm:$0xff]  ;;  %v2517_v29 = vadd.f32 %v2516_v6, %v2125_v2  ;;  %v1054_v27 = vld [vmem:[#allocation6 + $0x2a8] sm:$0xff] }
 0x234   : > { %2907 = vmatpush.msra.mxu0 %v1285_v10  ;;  %2924 = vmatpush.msra.mxu1 %v1437_v11  ;;  %v973_v38 = vld [vmem:[#allocation6 + $0x20] sm:$0xff]  ;;  %v1006_v2 = vld [vmem:[#allocation6 + $0x128] sm:$0xff] }
 0x235   : > { %2868 = vmatpush.msrb.mxu2 %v1021_v13  ;;  %2969 = vmatpush.msra.mxu3 %v1653_v32  ;;  %v1229_v39 = vld [vmem:[#allocation6 + $0x820] sm:$0xff]  ;;  %v1078_v13 = vld [vmem:[#allocation6 + $0x368] sm:$0xff]  ;;  %v2537_v20 = vadd.f32 %v2536_v12, %v2517_v29  ;;  %v2576_v32 = vpop.f32.mrf.mxu3 }
 0x236   : > { %2908 = vmatpush.msra.mxu0 %v1277_v15  ;;  %2925 = vmatpush.msra.mxu1 %v1429_v54  ;;  %v1381_v40 = vld [vmem:[#allocation6 + $0xce0] sm:$0xff] }
 0x237   : > { %2869 = vmatpush.msrb.mxu2 %v1013_v17  ;;  %v1637_v43 = vld [vmem:[#allocation6 + $0x14e0] sm:$0xff]  ;;  %2970 = vmatpush.msra.mxu3 %v1645_v37  ;;  %v2556_v17 = vpop.f32.mrf.mxu2 }
 0x238   : > { %2909 = vmatpush.msra.mxu0 %v1269_v18  ;;  %2926 = vmatpush.msra.mxu1 %v1421_v19  ;;  %v1605_v44 = vld [vmem:[#allocation6 + $0x13e0] sm:$0xff]  ;;  %v1070_v18 = vld [vmem:[#allocation6 + $0x328] sm:$0xff] }
 0x239   : > { %2870 = vmatpush.msrb.mxu2 %v1005_v60  ;;  %v1861_v45 = vld [vmem:[#allocation6 + $0x1be0] sm:$0xff]  ;;  %2971 = vmatpush.msra.mxu3 %v1637_v43 }
 0x23a   : > { %2910 = vmatpush.msra.mxu0 %v1261_v21  ;;  %2927 = vmatpush.msra.mxu1 %v1413_v22  ;;  %v1373_v46 = vld [vmem:[#allocation6 + $0xca0] sm:$0xff]  ;;  %v1062_v22 = vld [vmem:[#allocation6 + $0x2e8] sm:$0xff] }
 0x23b   : > { %2871 = vmatpush.msrb.mxu2 %v997_v24  ;;  %v1629_v48 = vld [vmem:[#allocation6 + $0x14a0] sm:$0xff]  ;;  %v2557_v24 = vadd.f32 %v2556_v17, %v2537_v20 }
 0x23c   : > { %2911 = vmatpush.msra.mxu0 %v1253_v25  ;;  %2928 = vmatpush.msra.mxu1 %v1405_v26  ;;  %v1597_v49 = vld [vmem:[#allocation6 + $0x13a0] sm:$0xff] }
 0x23d   : > { %2872 = vmatpush.msrb.mxu2 %v989_v28  ;;  %v1853_v50 = vld [vmem:[#allocation6 + $0x1ba0] sm:$0xff]  ;;  %2972 = vmatpush.msra.mxu3 %v1629_v48 }
 0x23e   : > { %2912 = vmatpush.msra.mxu0 %v1245_v30  ;;  %2929 = vmatpush.msra.mxu1 %v1397_v31  ;;  %v1365_v51 = vld [vmem:[#allocation6 + $0xc60] sm:$0xff] }
 0x23f   : > { %2873 = vmatpush.msrb.mxu2 %v981_v33  ;;  %v1621_v55 = vld [vmem:[#allocation6 + $0x1460] sm:$0xff]  ;;  %v1046_v33 = vld [vmem:[#allocation6 + $0x268] sm:$0xff] }
 0x240   : > { %2913 = vmatpush.msra.mxu0 %v1237_v34  ;;  %2930 = vmatpush.msra.mxu1 %v1389_v36  ;;  %v1589_v56 = vld [vmem:[#allocation6 + $0x1360] sm:$0xff]  ;;  %v2577_v36 = vadd.f32 %v2576_v32, %v2557_v24  ;;  %v1190_v32 = vld [vmem:[#allocation6 + $0x6e8] sm:$0xff] }
 0x241   : > { %2874 = vmatpush.msrb.mxu2 %v973_v38  ;;  %v1845_v57 = vld [vmem:[#allocation6 + $0x1b60] sm:$0xff]  ;;  %2973 = vmatpush.msra.mxu3 %v1621_v55  ;;  %v1022_v55 = vld [vmem:[#allocation6 + $0x1a8] sm:$0xff] }
 0x242   : > { %2914 = vmatpush.msra.mxu0 %v1229_v39  ;;  %2931 = vmatpush.msra.mxu1 %v1381_v40  ;;  %v1357_v58 = vld [vmem:[#allocation6 + $0xc20] sm:$0xff]  ;;  %v1038_v39 = vld [vmem:[#allocation6 + $0x228] sm:$0xff] }
 0x243   : > { %2875 = vmatmul.f32.vlgmr.msrb.gmra.mxu2 %v4039_v9  ;;  %2915 = vmatmul.f32.vlgmr.msra.gmra.mxu0 %v4047_v41  ;;  %v1613_v61 = vld [vmem:[#allocation6 + $0x1420] sm:$0xff] }
 0x244   : > { %2939 = vmatpush.msra.mxu2 %v1605_v44  ;;  %2979 = vmatpush.msrb.mxu0 %v1861_v45  ;;  %v1581_v42 = vld [vmem:[#allocation6 + $0x1320] sm:$0xff]  ;;  %v2596_v45 = vpop.f32.mrf.mxu0 }
 0x245   : > { %2932 = vmatpush.msra.mxu1 %v1373_v46  ;;  %v1837_v62 = vld [vmem:[#allocation6 + $0x1b20] sm:$0xff]  ;;  %2974 = vmatpush.msra.mxu3 %v1613_v61  ;;  %v1030_v46 = vld [vmem:[#allocation6 + $0x1e8] sm:$0xff]  ;;  %v2616_v61 = vpop.f32.mrf.mxu1 }
 0x246   : > { %2940 = vmatpush.msra.mxu2 %v1597_v49  ;;  %2980 = vmatpush.msrb.mxu0 %v1853_v50  ;;  %v1989_v63 = vld [vmem:[#allocation6 + $0x1fe0] sm:$0xff]  ;;  %v2597_v49 = vadd.f32 %v2596_v45, %v2577_v36  ;;  %v1582_v45 = vld [vmem:[#allocation6 + $0x1328] sm:$0xff] }
 0x247   : > { %2933 = vmatpush.msra.mxu1 %v1365_v51  ;;  %v1573_v1 = vld [vmem:[#allocation6 + $0x12e0] sm:$0xff]  ;;  %2975 = vmatmul.f32.vlgmr.msra.gmra.mxu3 %v4058_v53 }
 0x248   : > { %2941 = vmatpush.msra.mxu2 %v1589_v56  ;;  %2981 = vmatpush.msrb.mxu0 %v1845_v57  ;;  %v1829_v3 = vld [vmem:[#allocation6 + $0x1ae0] sm:$0xff] }
 0x249   : > { %2934 = vmatpush.msra.mxu1 %v1357_v58  ;;  %v1981_v4 = vld [vmem:[#allocation6 + $0x1fa0] sm:$0xff]  ;;  %3039 = vmatpush.msrb.mxu3 %v1094_v0 }
 0x24a   : > { %2935 = vmatmul.f32.vlgmr.msra.gmra.mxu1 %v4049_v47  ;;  %2942 = vmatpush.msra.mxu2 %v1581_v42  ;;  %v1565_v8 = vld [vmem:[#allocation6 + $0x12a0] sm:$0xff]  ;;  %v1014_v42 = vld [vmem:[#allocation6 + $0x168] sm:$0xff] }
 0x24b   : > { %2982 = vmatpush.msrb.mxu0 %v1837_v62  ;;  %2999 = vmatpush.msrb.mxu1 %v1989_v63  ;;  %v1821_v10 = vld [vmem:[#allocation6 + $0x1aa0] sm:$0xff]  ;;  %v2617_v63 = vadd.f32 %v2616_v61, %v2597_v49  ;;  %v1318_v49 = vld [vmem:[#allocation6 + $0xae8] sm:$0xff] }
 0x24c   : > { %2943 = vmatpush.msra.mxu2 %v1573_v1  ;;  %v1973_v11 = vld [vmem:[#allocation6 + $0x1f60] sm:$0xff]  ;;  %3040 = vmatpush.msrb.mxu3 %v1086_v7  ;;  %v2676_v29 = vpop.f32.mrf.mxu0  ;;  %v1150_v61 = vld [vmem:[#allocation6 + $0x5a8] sm:$0xff] }
 0x24d   : > { %2983 = vmatpush.msrb.mxu0 %v1829_v3  ;;  %3000 = vmatpush.msrb.mxu1 %v1981_v4  ;;  %v1557_v15 = vld [vmem:[#allocation6 + $0x1260] sm:$0xff] }
 0x24e   : > { %2944 = vmatpush.msra.mxu2 %v1565_v8  ;;  %v1813_v54 = vld [vmem:[#allocation6 + $0x1a60] sm:$0xff]  ;;  %3041 = vmatpush.msrb.mxu3 %v1078_v13 }
 0x24f   : > { %v1965_v16 = vld [vmem:[#allocation6 + $0x1f20] sm:$0xff]  ;;  %2984 = vmatpush.msrb.mxu0 %v1821_v10  ;;  %3001 = vmatpush.msrb.mxu1 %v1973_v11  ;;  %v2636_v4 = vpop.f32.mrf.mxu2  ;;  %v2656_v10 = vpop.f32.mrf.mxu3  ;;  %v998_v11 = vld [vmem:[#allocation6 + $0xe8] sm:$0xff] }
 0x250   : > { %v1549_v19 = vld [vmem:[#allocation6 + $0x1220] sm:$0xff]  ;;  %2945 = vmatpush.msra.mxu2 %v1557_v15  ;;  %3042 = vmatpush.msrb.mxu3 %v1070_v18  ;;  %v2637_v8 = vadd.f32 %v2636_v4, %v2617_v63  ;;  %v1222_v15 = vld [vmem:[#allocation6 + $0x7e8] sm:$0xff] }
 0x251   : > { %v1805_v60 = vld [vmem:[#allocation6 + $0x1a20] sm:$0xff]  ;;  %2985 = vmatpush.msrb.mxu0 %v1813_v54  ;;  %3002 = vmatpush.msrb.mxu1 %v1965_v16  ;;  %v990_v16 = vld [vmem:[#allocation6 + $0xa8] sm:$0xff] }
 0x252   : > { %v1957_v21 = vld [vmem:[#allocation6 + $0x1ee0] sm:$0xff]  ;;  %2946 = vmatpush.msra.mxu2 %v1549_v19  ;;  %3043 = vmatpush.msrb.mxu3 %v1062_v22  ;;  %v2657_v13 = vadd.f32 %v2656_v10, %v2637_v8  ;;  %v1214_v19 = vld [vmem:[#allocation6 + $0x7a8] sm:$0xff] }
 0x253   : > { %v1541_v23 = vld [vmem:[#allocation6 + $0x11e0] sm:$0xff]  ;;  %2986 = vmatpush.msrb.mxu0 %v1805_v60  ;;  %3003 = vmatpush.msrb.mxu1 %v1957_v21  ;;  %v982_v60 = vld [vmem:[#allocation6 + $0x68] sm:$0xff] }
 0x254   : > { %v1797_v25 = vld [vmem:[#allocation6 + $0x19e0] sm:$0xff]  ;;  %2947 = vmatpush.msra.mxu2 %v1541_v23  ;;  %3044 = vmatpush.msrb.mxu3 %v1054_v27  ;;  %v2677_v18 = vadd.f32 %v2676_v29, %v2657_v13  ;;  %v1206_v23 = vld [vmem:[#allocation6 + $0x768] sm:$0xff] }
 0x255   : > { %v1949_v26 = vld [vmem:[#allocation6 + $0x1ea0] sm:$0xff]  ;;  %2987 = vmatpush.msrb.mxu0 %v1797_v25  ;;  %v974_v25 = vld [vmem:[#allocation6 + $0x28] sm:$0xff] }
 0x256   : > { %v1533_v28 = vld [vmem:[#allocation6 + $0x11a0] sm:$0xff]  ;;  %3004 = vmatpush.msrb.mxu1 %v1949_v26  ;;  %3045 = vmatpush.msrb.mxu3 %v1046_v33  ;;  %v3581_v22 = vmax.f32 %v2677_v18, 0.0  ;;  %v1198_v27 = vld [vmem:[#allocation6 + $0x728] sm:$0xff] }
 0x257   : > { %v1789_v30 = vld [vmem:[#allocation6 + $0x19a0] sm:$0xff]  ;;  %2948 = vmatpush.msra.mxu2 %v1533_v28  ;;  %v1350_v28 = vld [vmem:[#allocation6 + $0xbe8] sm:$0xff] }
 0x258   : > { %v1941_v31 = vld [vmem:[#allocation6 + $0x1e60] sm:$0xff]  ;;  %2988 = vmatpush.msrb.mxu0 %v1789_v30  ;;  %3046 = vmatpush.msrb.mxu3 %v1038_v39  ;;  %3589 = vst [vmem:[%s4099_s30 + $0x10] sm:$0xff] %v3581_v22  ;;  %v1606_v30 = vld [vmem:[#allocation6 + $0x13e8] sm:$0xff] }
 0x259   : > { %v1525_v34 = vld [vmem:[#allocation6 + $0x1160] sm:$0xff]  ;;  %3005 = vmatpush.msrb.mxu1 %v1941_v31  ;;  %v1342_v33 = vld [vmem:[#allocation6 + $0xba8] sm:$0xff] }
 0x25a   : > { %v1781_v37 = vld [vmem:[#allocation6 + $0x1960] sm:$0xff]  ;;  %2949 = vmatpush.msra.mxu2 %v1525_v34  ;;  %3047 = vmatpush.msrb.mxu3 %v1030_v46  ;;  %v1598_v34 = vld [vmem:[#allocation6 + $0x13a8] sm:$0xff] }
 0x25b   : > { %v1933_v38 = vld [vmem:[#allocation6 + $0x1e20] sm:$0xff]  ;;  %2989 = vmatpush.msrb.mxu0 %v1781_v37  ;;  %v1182_v37 = vld [vmem:[#allocation6 + $0x6a8] sm:$0xff] }
 0x25c   : > { %v1517_v40 = vld [vmem:[#allocation6 + $0x1120] sm:$0xff]  ;;  %3006 = vmatpush.msrb.mxu1 %v1933_v38  ;;  %3048 = vmatpush.msrb.mxu3 %v1022_v55  ;;  %v1334_v38 = vld [vmem:[#allocation6 + $0xb68] sm:$0xff] }
 0x25d   : > { %v1773_v43 = vld [vmem:[#allocation6 + $0x1920] sm:$0xff]  ;;  %2950 = vmatpush.msra.mxu2 %v1517_v40  ;;  %v1590_v39 = vld [vmem:[#allocation6 + $0x1368] sm:$0xff] }
 0x25e   : > { %v1925_v44 = vld [vmem:[#allocation6 + $0x1de0] sm:$0xff]  ;;  %2990 = vmatpush.msrb.mxu0 %v1773_v43  ;;  %3049 = vmatpush.msrb.mxu3 %v1014_v42  ;;  %v1174_v43 = vld [vmem:[#allocation6 + $0x668] sm:$0xff] }
 0x25f   : > { %v1509_v48 = vld [vmem:[#allocation6 + $0x10e0] sm:$0xff]  ;;  %3007 = vmatpush.msrb.mxu1 %v1925_v44  ;;  %v1326_v44 = vld [vmem:[#allocation6 + $0xb28] sm:$0xff] }
 0x260   : > { %v1765_v50 = vld [vmem:[#allocation6 + $0x18e0] sm:$0xff]  ;;  %2951 = vmatpush.msra.mxu2 %v1509_v48  ;;  %3050 = vmatpush.msrb.mxu3 %v1006_v2  ;;  %v1166_v48 = vld [vmem:[#allocation6 + $0x628] sm:$0xff] }
 0x261   : > { %v1917_v51 = vld [vmem:[#allocation6 + $0x1da0] sm:$0xff]  ;;  %2991 = vmatpush.msrb.mxu0 %v1765_v50  ;;  %v1574_v50 = vld [vmem:[#allocation6 + $0x12e8] sm:$0xff] }
 0x262   : > { %v1501_v56 = vld [vmem:[#allocation6 + $0x10a0] sm:$0xff]  ;;  %3008 = vmatpush.msrb.mxu1 %v1917_v51  ;;  %3051 = vmatpush.msrb.mxu3 %v998_v11  ;;  %v1158_v55 = vld [vmem:[#allocation6 + $0x5e8] sm:$0xff] }
 0x263   : > { %v1757_v57 = vld [vmem:[#allocation6 + $0x18a0] sm:$0xff]  ;;  %2952 = vmatpush.msra.mxu2 %v1501_v56  ;;  %v1310_v56 = vld [vmem:[#allocation6 + $0xaa8] sm:$0xff] }
 0x264   : > { %v1909_v58 = vld [vmem:[#allocation6 + $0x1d60] sm:$0xff]  ;;  %2992 = vmatpush.msrb.mxu0 %v1757_v57  ;;  %3052 = vmatpush.msrb.mxu3 %v990_v16  ;;  %v1566_v57 = vld [vmem:[#allocation6 + $0x12a8] sm:$0xff] }
 0x265   : > { %v1493_v62 = vld [vmem:[#allocation6 + $0x1060] sm:$0xff]  ;;  %3009 = vmatpush.msrb.mxu1 %v1909_v58  ;;  %v1302_v42 = vld [vmem:[#allocation6 + $0xa68] sm:$0xff] }
 0x266   : > { %v1749_v0 = vld [vmem:[#allocation6 + $0x1860] sm:$0xff]  ;;  %2953 = vmatpush.msra.mxu2 %v1493_v62  ;;  %3053 = vmatpush.msrb.mxu3 %v982_v60  ;;  %v1558_v62 = vld [vmem:[#allocation6 + $0x1268] sm:$0xff] }
 0x267   : > { %v1901_v1 = vld [vmem:[#allocation6 + $0x1d20] sm:$0xff]  ;;  %2993 = vmatpush.msrb.mxu0 %v1749_v0  ;;  %v1142_v0 = vld [vmem:[#allocation6 + $0x568] sm:$0xff] }
 0x268   : > { %v1485_v3 = vld [vmem:[#allocation6 + $0x1020] sm:$0xff]  ;;  %3010 = vmatpush.msrb.mxu1 %v1901_v1  ;;  %3054 = vmatpush.msrb.mxu3 %v974_v25  ;;  %v1294_v1 = vld [vmem:[#allocation6 + $0xa28] sm:$0xff] }
 0x269   : > { %v1741_v6 = vld [vmem:[#allocation6 + $0x1820] sm:$0xff]  ;;  %2954 = vmatpush.msra.mxu2 %v1485_v3  ;;  %3055 = vmatmul.f32.vlgmr.msrb.gmra.mxu3 %v4039_v9  ;;  %v1550_v2 = vld [vmem:[#allocation6 + $0x1228] sm:$0xff] }
 0x26a   : > { %v1893_v7 = vld [vmem:[#allocation6 + $0x1ce0] sm:$0xff]  ;;  %2994 = vmatpush.msrb.mxu0 %v1741_v6  ;;  %2955 = vmatmul.f32.vlgmr.msra.gmra.mxu2 %v4055_v35  ;;  %v1134_v4 = vld [vmem:[#allocation6 + $0x528] sm:$0xff] }
 0x26b   : > { %v2117_v12 = vld [vmem:[#allocation6 + $0x23e0] sm:$0xff]  ;;  %3011 = vmatpush.msrb.mxu1 %v1893_v7  ;;  %2995 = vmatmul.f32.vlgmr.msrb.gmra.mxu0 %v4064_v52  ;;  %v1286_v6 = vld [vmem:[#allocation6 + $0x9e8] sm:$0xff] }
 0x26c   : > { %v1885_v54 = vld [vmem:[#allocation6 + $0x1ca0] sm:$0xff]  ;;  %3019 = vmatpush.msrb.mxu2 %v2117_v12  ;;  %3059 = vmatpush.msra.mxu0 %v1222_v15  ;;  %v1542_v7 = vld [vmem:[#allocation6 + $0x11e8] sm:$0xff] }
 0x26d   : > { %v2109_v17 = vld [vmem:[#allocation6 + $0x23a0] sm:$0xff]  ;;  %3012 = vmatpush.msrb.mxu1 %v1885_v54  ;;  %3119 = vmatpush.msra.mxu3 %v1606_v30  ;;  %v1126_v10 = vld [vmem:[#allocation6 + $0x4e8] sm:$0xff] }
 0x26e   : > { %v1877_v20 = vld [vmem:[#allocation6 + $0x1c60] sm:$0xff]  ;;  %3020 = vmatpush.msrb.mxu2 %v2109_v17  ;;  %3060 = vmatpush.msra.mxu0 %v1214_v19  ;;  %v1278_v11 = vld [vmem:[#allocation6 + $0x9a8] sm:$0xff] }
 0x26f   : > { %v2101_v21 = vld [vmem:[#allocation6 + $0x2360] sm:$0xff]  ;;  %3013 = vmatpush.msrb.mxu1 %v1877_v20  ;;  %3120 = vmatpush.msra.mxu3 %v1598_v34  ;;  %v1534_v12 = vld [vmem:[#allocation6 + $0x11a8] sm:$0xff] }
 0x270   : > { %v1869_v24 = vld [vmem:[#allocation6 + $0x1c20] sm:$0xff]  ;;  %3021 = vmatpush.msrb.mxu2 %v2101_v21  ;;  %3061 = vmatpush.msra.mxu0 %v1206_v23  ;;  %v1118_v15 = vld [vmem:[#allocation6 + $0x4a8] sm:$0xff] }
 0x271   : > { %v2093_v26 = vld [vmem:[#allocation6 + $0x2320] sm:$0xff]  ;;  %3014 = vmatpush.msrb.mxu1 %v1869_v24  ;;  %3121 = vmatpush.msra.mxu3 %v1590_v39  ;;  %v1270_v29 = vld [vmem:[#allocation6 + $0x968] sm:$0xff] }
 0x272   : > { %3015 = vmatmul.f32.vlgmr.msrb.gmra.mxu1 %v4067_v5  ;;  %v2085_v31 = vld [vmem:[#allocation6 + $0x22e0] sm:$0xff]  ;;  %3022 = vmatpush.msrb.mxu2 %v2093_v26  ;;  %v1526_v54 = vld [vmem:[#allocation6 + $0x1168] sm:$0xff] }
 0x273   : > { %3062 = vmatpush.msra.mxu0 %v1198_v27  ;;  %3079 = vmatpush.msra.mxu1 %v1350_v28  ;;  %v2077_v36 = vld [vmem:[#allocation6 + $0x22a0] sm:$0xff]  ;;  %v1110_v17 = vld [vmem:[#allocation6 + $0x468] sm:$0xff] }
 0x274   : > { %3023 = vmatpush.msrb.mxu2 %v2085_v31  ;;  %v2069_v40 = vld [vmem:[#allocation6 + $0x2260] sm:$0xff]  ;;  %3122 = vmatpush.msra.mxu3 %v1582_v45  ;;  %v1262_v18 = vld [vmem:[#allocation6 + $0x928] sm:$0xff] }
 0x275   : > { %3063 = vmatpush.msra.mxu0 %v1190_v32  ;;  %3080 = vmatpush.msra.mxu1 %v1342_v33  ;;  %v2061_v46 = vld [vmem:[#allocation6 + $0x2220] sm:$0xff]  ;;  %v1518_v19 = vld [vmem:[#allocation6 + $0x1128] sm:$0xff] }
 0x276   : > { %3024 = vmatpush.msrb.mxu2 %v2077_v36  ;;  %v2053_v51 = vld [vmem:[#allocation6 + $0x21e0] sm:$0xff]  ;;  %3123 = vmatpush.msra.mxu3 %v1574_v50  ;;  %v1102_v60 = vld [vmem:[#allocation6 + $0x428] sm:$0xff] }
 0x277   : > { %3064 = vmatpush.msra.mxu0 %v1182_v37  ;;  %3081 = vmatpush.msra.mxu1 %v1334_v38  ;;  %v2045_v58 = vld [vmem:[#allocation6 + $0x21a0] sm:$0xff]  ;;  %v1254_v21 = vld [vmem:[#allocation6 + $0x8e8] sm:$0xff] }
 0x278   : > { %3025 = vmatpush.msrb.mxu2 %v2069_v40  ;;  %v2037_v63 = vld [vmem:[#allocation6 + $0x2160] sm:$0xff]  ;;  %3124 = vmatpush.msra.mxu3 %v1566_v57  ;;  %v1510_v22 = vld [vmem:[#allocation6 + $0x10e8] sm:$0xff] }
 0x279   : > { %3065 = vmatpush.msra.mxu0 %v1174_v43  ;;  %3082 = vmatpush.msra.mxu1 %v1326_v44  ;;  %v2029_v3 = vld [vmem:[#allocation6 + $0x2120] sm:$0xff]  ;;  %v1478_v23 = vld [vmem:[#allocation6 + $0xfe8] sm:$0xff] }
 0x27a   : > { %3026 = vmatpush.msrb.mxu2 %v2061_v46  ;;  %3125 = vmatpush.msra.mxu3 %v1558_v62  ;;  %v2021_v8 = vld [vmem:[#allocation6 + $0x20e0] sm:$0xff]  ;;  %v1734_v24 = vld [vmem:[#allocation6 + $0x17e8] sm:$0xff]  ;;  %v2716_v62 = vpop.f32.mrf.mxu2 }
 0x27b   : > { %3066 = vmatpush.msra.mxu0 %v1166_v48  ;;  %3083 = vmatpush.msra.mxu1 %v1318_v49  ;;  %v2013_v13 = vld [vmem:[#allocation6 + $0x20a0] sm:$0xff]  ;;  %v1246_v25 = vld [vmem:[#allocation6 + $0x8a8] sm:$0xff] }
 0x27c   : > { %3027 = vmatpush.msrb.mxu2 %v2053_v51  ;;  %3126 = vmatpush.msra.mxu3 %v1550_v2  ;;  %v2005_v16 = vld [vmem:[#allocation6 + $0x2060] sm:$0xff]  ;;  %v1502_v26 = vld [vmem:[#allocation6 + $0x10a8] sm:$0xff] }
 0x27d   : > { %3067 = vmatpush.msra.mxu0 %v1158_v55  ;;  %3084 = vmatpush.msra.mxu1 %v1310_v56  ;;  %v1997_v20 = vld [vmem:[#allocation6 + $0x2020] sm:$0xff]  ;;  %v1470_v27 = vld [vmem:[#allocation6 + $0xfa8] sm:$0xff]  ;;  %v2696_v56 = vpop.f32.mrf.mxu1 }
 0x27e   : > { %3028 = vmatpush.msrb.mxu2 %v2045_v58  ;;  %3127 = vmatpush.msra.mxu3 %v1542_v7  ;;  %v1726_v28 = vld [vmem:[#allocation6 + $0x17a8] sm:$0xff]  ;;  %v4126_v49 = vld [vmem:[#allocation7] sm:$0xff] }
 0x27f   : > { %3068 = vmatpush.msra.mxu0 %v1150_v61  ;;  %3085 = vmatpush.msra.mxu1 %v1302_v42  ;;  %v1238_v30 = vld [vmem:[#allocation6 + $0x868] sm:$0xff]  ;;  %v2126_v50 = vperm.slane %v4126_v49, 3 }
 0x280   : > { %3029 = vmatpush.msrb.mxu2 %v2037_v63  ;;  %3128 = vmatpush.msra.mxu3 %v1534_v12  ;;  %v1494_v31 = vld [vmem:[#allocation6 + $0x1068] sm:$0xff] }
 0x281   : > { %3069 = vmatpush.msra.mxu0 %v1142_v0  ;;  %3086 = vmatpush.msra.mxu1 %v1294_v1  ;;  %v1462_v32 = vld [vmem:[#allocation6 + $0xf68] sm:$0xff]  ;;  %v2697_v1 = vadd.f32 %v2696_v56, %v2126_v50 }
 0x282   : > { %3030 = vmatpush.msrb.mxu2 %v2029_v3  ;;  %3129 = vmatpush.msra.mxu3 %v1526_v54  ;;  %v1718_v33 = vld [vmem:[#allocation6 + $0x1768] sm:$0xff] }
 0x283   : > { %3070 = vmatpush.msra.mxu0 %v1134_v4  ;;  %3087 = vmatpush.msra.mxu1 %v1286_v6  ;;  %v1230_v34 = vld [vmem:[#allocation6 + $0x828] sm:$0xff]  ;;  %v2717_v7 = vadd.f32 %v2716_v62, %v2697_v1  ;;  %v1087_v1 = vld [vmem:[#allocation6 + $0x3b0] sm:$0xff] }
 0x284   : > { %3031 = vmatpush.msrb.mxu2 %v2021_v8  ;;  %3130 = vmatpush.msra.mxu3 %v1518_v19  ;;  %v1486_v36 = vld [vmem:[#allocation6 + $0x1028] sm:$0xff] }
 0x285   : > { %3071 = vmatpush.msra.mxu0 %v1126_v10  ;;  %3088 = vmatpush.msra.mxu1 %v1278_v11  ;;  %v1454_v37 = vld [vmem:[#allocation6 + $0xf28] sm:$0xff] }
 0x286   : > { %3032 = vmatpush.msrb.mxu2 %v2013_v13  ;;  %3131 = vmatpush.msra.mxu3 %v1510_v22  ;;  %v1710_v38 = vld [vmem:[#allocation6 + $0x1728] sm:$0xff] }
 0x287   : > { %3072 = vmatpush.msra.mxu0 %v1118_v15  ;;  %3089 = vmatpush.msra.mxu1 %v1270_v29  ;;  %v1862_v39 = vld [vmem:[#allocation6 + $0x1be8] sm:$0xff]  ;;  %v2736_v29 = vpop.f32.mrf.mxu3 }
 0x288   : > { %3033 = vmatpush.msrb.mxu2 %v2005_v16  ;;  %3132 = vmatpush.msra.mxu3 %v1502_v26  ;;  %v2118_v40 = vld [vmem:[#allocation6 + $0x23e8] sm:$0xff] }
 0x289   : > { %3073 = vmatpush.msra.mxu0 %v1110_v17  ;;  %3090 = vmatpush.msra.mxu1 %v1262_v18  ;;  %v1446_v43 = vld [vmem:[#allocation6 + $0xee8] sm:$0xff]  ;;  %v2737_v17 = vadd.f32 %v2736_v29, %v2717_v7  ;;  %v1223_v29 = vld [vmem:[#allocation6 + $0x7f0] sm:$0xff] }
 0x28a   : > { %3034 = vmatpush.msrb.mxu2 %v1997_v20  ;;  %3133 = vmatpush.msra.mxu3 %v1494_v31  ;;  %v1702_v44 = vld [vmem:[#allocation6 + $0x16e8] sm:$0xff] }
 0x28b   : > { %3074 = vmatpush.msra.mxu0 %v1102_v60  ;;  %3091 = vmatpush.msra.mxu1 %v1254_v21  ;;  %v1854_v45 = vld [vmem:[#allocation6 + $0x1ba8] sm:$0xff] }
 0x28c   : > { %3035 = vmatmul.f32.vlgmr.msrb.gmra.mxu2 %v4073_v59  ;;  %3075 = vmatmul.f32.vlgmr.msra.gmra.mxu0 %v4041_v14  ;;  %v2110_v46 = vld [vmem:[#allocation6 + $0x23a8] sm:$0xff] }
 0x28d   : > { %3099 = vmatpush.msra.mxu2 %v1478_v23  ;;  %3139 = vmatpush.msrb.mxu0 %v1734_v24  ;;  %v1438_v48 = vld [vmem:[#allocation6 + $0xea8] sm:$0xff]  ;;  %v2756_v23 = vpop.f32.mrf.mxu0 }
 0x28e   : > { %3092 = vmatpush.msra.mxu1 %v1246_v25  ;;  %3134 = vmatpush.msra.mxu3 %v1486_v36  ;;  %v1694_v51 = vld [vmem:[#allocation6 + $0x16a8] sm:$0xff]  ;;  %v2757_v26 = vadd.f32 %v2756_v23, %v2737_v17  ;;  %v1063_v17 = vld [vmem:[#allocation6 + $0x2f0] sm:$0xff] }
 0x28f   : > { %3100 = vmatpush.msra.mxu2 %v1470_v27  ;;  %3140 = vmatpush.msrb.mxu0 %v1726_v28  ;;  %v1846_v55 = vld [vmem:[#allocation6 + $0x1b68] sm:$0xff] }
 0x290   : > { %3093 = vmatpush.msra.mxu1 %v1238_v30  ;;  %3135 = vmatmul.f32.vlgmr.msra.gmra.mxu3 %v4055_v35  ;;  %v2102_v57 = vld [vmem:[#allocation6 + $0x2368] sm:$0xff] }
 0x291   : > { %3101 = vmatpush.msra.mxu2 %v1462_v32  ;;  %3141 = vmatpush.msrb.mxu0 %v1718_v33  ;;  %v1430_v58 = vld [vmem:[#allocation6 + $0xe68] sm:$0xff] }
 0x292   : > { %3094 = vmatpush.msra.mxu1 %v1230_v34  ;;  %3199 = vmatpush.msrb.mxu3 %v2118_v40  ;;  %v1686_v61 = vld [vmem:[#allocation6 + $0x1668] sm:$0xff]  ;;  %v2776_v34 = vpop.f32.mrf.mxu1 }
 0x293   : > { %3095 = vmatmul.f32.vlgmr.msra.gmra.mxu1 %v4047_v41  ;;  %3102 = vmatpush.msra.mxu2 %v1454_v37  ;;  %v1838_v42 = vld [vmem:[#allocation6 + $0x1b28] sm:$0xff] }
 0x294   : > { %3142 = vmatpush.msrb.mxu0 %v1710_v38  ;;  %3159 = vmatpush.msrb.mxu1 %v1862_v39  ;;  %v2094_v63 = vld [vmem:[#allocation6 + $0x2328] sm:$0xff]  ;;  %v2777_v38 = vadd.f32 %v2776_v34, %v2757_v26  ;;  %v1455_v26 = vld [vmem:[#allocation6 + $0xf30] sm:$0xff] }
 0x295   : > { %3103 = vmatpush.msra.mxu2 %v1446_v43  ;;  %3200 = vmatpush.msrb.mxu3 %v2110_v46  ;;  %v1422_v0 = vld [vmem:[#allocation6 + $0xe28] sm:$0xff]  ;;  %v1183_v34 = vld [vmem:[#allocation6 + $0x6b0] sm:$0xff] }
 0x296   : > { %3143 = vmatpush.msrb.mxu0 %v1702_v44  ;;  %3160 = vmatpush.msrb.mxu1 %v1854_v45  ;;  %v1678_v2 = vld [vmem:[#allocation6 + $0x1628] sm:$0xff] }
 0x297   : > { %3104 = vmatpush.msra.mxu2 %v1438_v48  ;;  %3201 = vmatpush.msrb.mxu3 %v2102_v57  ;;  %v1830_v3 = vld [vmem:[#allocation6 + $0x1ae8] sm:$0xff] }
 0x298   : > { %3144 = vmatpush.msrb.mxu0 %v1694_v51  ;;  %3161 = vmatpush.msrb.mxu1 %v1846_v55  ;;  %v2086_v4 = vld [vmem:[#allocation6 + $0x22e8] sm:$0xff]  ;;  %v2816_v51 = vpop.f32.mrf.mxu3 }
 0x299   : > { %3105 = vmatpush.msra.mxu2 %v1430_v58  ;;  %v1414_v6 = vld [vmem:[#allocation6 + $0xde8] sm:$0xff]  ;;  %3202 = vmatpush.msrb.mxu3 %v2094_v63  ;;  %v1095_v58 = vld [vmem:[#allocation6 + $0x3f0] sm:$0xff] }
 0x29a   : > { %3145 = vmatpush.msrb.mxu0 %v1686_v61  ;;  %3162 = vmatpush.msrb.mxu1 %v1838_v42  ;;  %v1670_v8 = vld [vmem:[#allocation6 + $0x15e8] sm:$0xff] }
 0x29b   : > { %3106 = vmatpush.msra.mxu2 %v1422_v0  ;;  %v1822_v10 = vld [vmem:[#allocation6 + $0x1aa8] sm:$0xff]  ;;  %3203 = vmatpush.msrb.mxu3 %v2086_v4 }
 0x29c   : > { %3146 = vmatpush.msrb.mxu0 %v1678_v2  ;;  %3163 = vmatpush.msrb.mxu1 %v1830_v3  ;;  %v2078_v11 = vld [vmem:[#allocation6 + $0x22a8] sm:$0xff] }
 0x29d   : > { %v1406_v12 = vld [vmem:[#allocation6 + $0xda8] sm:$0xff]  ;;  %3107 = vmatpush.msra.mxu2 %v1414_v6  ;;  %3204 = vmatpush.msrb.mxu3 %v2078_v11 }
 0x29e   : > { %v1662_v13 = vld [vmem:[#allocation6 + $0x15a8] sm:$0xff]  ;;  %3147 = vmatpush.msrb.mxu0 %v1670_v8  ;;  %3164 = vmatpush.msrb.mxu1 %v1822_v10  ;;  %v1079_v8 = vld [vmem:[#allocation6 + $0x370] sm:$0xff] }
 0x29f   : > { %v1814_v15 = vld [vmem:[#allocation6 + $0x1a68] sm:$0xff]  ;;  %3108 = vmatpush.msra.mxu2 %v1406_v12  ;;  %v2836_v61 = vpop.f32.mrf.mxu0 }
 0x2a0   : > { %v2070_v54 = vld [vmem:[#allocation6 + $0x2268] sm:$0xff]  ;;  %3148 = vmatpush.msrb.mxu0 %v1662_v13  ;;  %3165 = vmatpush.msrb.mxu1 %v1814_v15  ;;  %v1071_v15 = vld [vmem:[#allocation6 + $0x330] sm:$0xff] }
 0x2a1   : > { %v1398_v16 = vld [vmem:[#allocation6 + $0xd68] sm:$0xff]  ;;  %3205 = vmatpush.msrb.mxu3 %v2070_v54  ;;  %v1479_v54 = vld [vmem:[#allocation6 + $0xff0] sm:$0xff] }
 0x2a2   : > { %v1654_v18 = vld [vmem:[#allocation6 + $0x1568] sm:$0xff]  ;;  %3109 = vmatpush.msra.mxu2 %v1398_v16 }
 0x2a3   : > { %v1806_v19 = vld [vmem:[#allocation6 + $0x1a28] sm:$0xff]  ;;  %3149 = vmatpush.msrb.mxu0 %v1654_v18  ;;  %v1215_v18 = vld [vmem:[#allocation6 + $0x7b0] sm:$0xff] }
 0x2a4   : > { %v2062_v20 = vld [vmem:[#allocation6 + $0x2228] sm:$0xff]  ;;  %3166 = vmatpush.msrb.mxu1 %v1806_v19  ;;  %v2796_v45 = vpop.f32.mrf.mxu2  ;;  %v1471_v19 = vld [vmem:[#allocation6 + $0xfb0] sm:$0xff] }
 0x2a5   : > { %v1390_v60 = vld [vmem:[#allocation6 + $0xd28] sm:$0xff]  ;;  %3206 = vmatpush.msrb.mxu3 %v2062_v20  ;;  %v2797_v50 = vadd.f32 %v2796_v45, %v2777_v38  ;;  %v1023_v38 = vld [vmem:[#allocation6 + $0x1b0] sm:$0xff] }
 0x2a6   : > { %v1646_v21 = vld [vmem:[#allocation6 + $0x1528] sm:$0xff]  ;;  %3110 = vmatpush.msra.mxu2 %v1390_v60  ;;  %v2856_v3 = vpop.f32.mrf.mxu1  ;;  %v1055_v60 = vld [vmem:[#allocation6 + $0x2b0] sm:$0xff] }
 0x2a7   : > { %v1798_v22 = vld [vmem:[#allocation6 + $0x19e8] sm:$0xff]  ;;  %3150 = vmatpush.msrb.mxu0 %v1646_v21  ;;  %v2817_v57 = vadd.f32 %v2816_v51, %v2797_v50  ;;  %v1207_v21 = vld [vmem:[#allocation6 + $0x770] sm:$0xff] }
 0x2a8   : > { %v2054_v24 = vld [vmem:[#allocation6 + $0x21e8] sm:$0xff]  ;;  %3167 = vmatpush.msrb.mxu1 %v1798_v22  ;;  %v1463_v22 = vld [vmem:[#allocation6 + $0xf70] sm:$0xff] }
 0x2a9   : > { %v1382_v25 = vld [vmem:[#allocation6 + $0xce8] sm:$0xff]  ;;  %3207 = vmatpush.msrb.mxu3 %v2054_v24  ;;  %v2837_v0 = vadd.f32 %v2836_v61, %v2817_v57  ;;  %v1047_v24 = vld [vmem:[#allocation6 + $0x270] sm:$0xff] }
 0x2aa   : > { %v1638_v27 = vld [vmem:[#allocation6 + $0x14e8] sm:$0xff]  ;;  %3111 = vmatpush.msra.mxu2 %v1382_v25  ;;  %v1199_v25 = vld [vmem:[#allocation6 + $0x730] sm:$0xff] }
 0x2ab   : > { %v1790_v28 = vld [vmem:[#allocation6 + $0x19a8] sm:$0xff]  ;;  %3151 = vmatpush.msrb.mxu0 %v1638_v27  ;;  %v2857_v7 = vadd.f32 %v2856_v3, %v2837_v0  ;;  %v1167_v45 = vld [vmem:[#allocation6 + $0x630] sm:$0xff] }
 0x2ac   : > { %v2046_v30 = vld [vmem:[#allocation6 + $0x21a8] sm:$0xff]  ;;  %3168 = vmatpush.msrb.mxu1 %v1790_v28  ;;  %v1039_v28 = vld [vmem:[#allocation6 + $0x230] sm:$0xff] }
 0x2ad   : > { %v1374_v31 = vld [vmem:[#allocation6 + $0xca8] sm:$0xff]  ;;  %3208 = vmatpush.msrb.mxu3 %v2046_v30  ;;  %v3582_v12 = vmax.f32 %v2857_v7, 0.0  ;;  %v1191_v30 = vld [vmem:[#allocation6 + $0x6f0] sm:$0xff] }
 0x2ae   : > { %v1630_v32 = vld [vmem:[#allocation6 + $0x14a8] sm:$0xff]  ;;  %3112 = vmatpush.msra.mxu2 %v1374_v31  ;;  %v1447_v31 = vld [vmem:[#allocation6 + $0xef0] sm:$0xff] }
 0x2af   : > { %v1782_v33 = vld [vmem:[#allocation6 + $0x1968] sm:$0xff]  ;;  %3152 = vmatpush.msrb.mxu0 %v1630_v32  ;;  %3590 = vst [vmem:[%s4099_s30 + $0x18] sm:$0xff] %v3582_v12  ;;  %v1007_v50 = vld [vmem:[#allocation6 + $0x130] sm:$0xff] }
 0x2b0   : > { %v2038_v36 = vld [vmem:[#allocation6 + $0x2168] sm:$0xff]  ;;  %3169 = vmatpush.msrb.mxu1 %v1782_v33  ;;  %v1031_v33 = vld [vmem:[#allocation6 + $0x1f0] sm:$0xff] }
 0x2b1   : > { %v1366_v37 = vld [vmem:[#allocation6 + $0xc68] sm:$0xff]  ;;  %3209 = vmatpush.msrb.mxu3 %v2038_v36  ;;  %v1439_v36 = vld [vmem:[#allocation6 + $0xeb0] sm:$0xff] }
 0x2b2   : > { %v1622_v39 = vld [vmem:[#allocation6 + $0x1468] sm:$0xff]  ;;  %3113 = vmatpush.msra.mxu2 %v1366_v37  ;;  %v1159_v51 = vld [vmem:[#allocation6 + $0x5f0] sm:$0xff] }
 0x2b3   : > { %v1774_v40 = vld [vmem:[#allocation6 + $0x1928] sm:$0xff]  ;;  %3153 = vmatpush.msrb.mxu0 %v1622_v39  ;;  %v1175_v39 = vld [vmem:[#allocation6 + $0x670] sm:$0xff] }
 0x2b4   : > { %v2030_v43 = vld [vmem:[#allocation6 + $0x2128] sm:$0xff]  ;;  %3170 = vmatpush.msrb.mxu1 %v1774_v40  ;;  %v1431_v40 = vld [vmem:[#allocation6 + $0xe70] sm:$0xff] }
 0x2b5   : > { %v1358_v44 = vld [vmem:[#allocation6 + $0xc28] sm:$0xff]  ;;  %3210 = vmatpush.msrb.mxu3 %v2030_v43  ;;  %v999_v57 = vld [vmem:[#allocation6 + $0xf0] sm:$0xff] }
 0x2b6   : > { %v1614_v46 = vld [vmem:[#allocation6 + $0x1428] sm:$0xff]  ;;  %3114 = vmatpush.msra.mxu2 %v1358_v44  ;;  %v1015_v44 = vld [vmem:[#allocation6 + $0x170] sm:$0xff] }
 0x2b7   : > { %v1766_v48 = vld [vmem:[#allocation6 + $0x18e8] sm:$0xff]  ;;  %3154 = vmatpush.msrb.mxu0 %v1614_v46  ;;  %3115 = vmatmul.f32.vlgmr.msra.gmra.mxu2 %v4049_v47  ;;  %v1423_v46 = vld [vmem:[#allocation6 + $0xe30] sm:$0xff] }
 0x2b8   : > { %v2022_v55 = vld [vmem:[#allocation6 + $0x20e8] sm:$0xff]  ;;  %3171 = vmatpush.msrb.mxu1 %v1766_v48  ;;  %3155 = vmatmul.f32.vlgmr.msrb.gmra.mxu0 %v4058_v53  ;;  %v1407_v61 = vld [vmem:[#allocation6 + $0xdb0] sm:$0xff] }
 0x2b9   : > { %v1990_v56 = vld [vmem:[#allocation6 + $0x1fe8] sm:$0xff]  ;;  %3211 = vmatpush.msrb.mxu3 %v2022_v55  ;;  %3219 = vmatpush.msra.mxu0 %v1095_v58  ;;  %v1415_v55 = vld [vmem:[#allocation6 + $0xdf0] sm:$0xff] }
 0x2ba   : > { %v1758_v42 = vld [vmem:[#allocation6 + $0x18a8] sm:$0xff]  ;;  %3179 = vmatpush.msrb.mxu2 %v1990_v56  ;;  %v1151_v58 = vld [vmem:[#allocation6 + $0x5b0] sm:$0xff] }
 0x2bb   : > { %v2014_v62 = vld [vmem:[#allocation6 + $0x20a8] sm:$0xff]  ;;  %3172 = vmatpush.msrb.mxu1 %v1758_v42  ;;  %3220 = vmatpush.msra.mxu0 %v1087_v1  ;;  %v1399_v0 = vld [vmem:[#allocation6 + $0xd70] sm:$0xff] }
 0x2bc   : > { %v1982_v63 = vld [vmem:[#allocation6 + $0x1fa8] sm:$0xff]  ;;  %3212 = vmatpush.msrb.mxu3 %v2014_v62  ;;  %v991_v62 = vld [vmem:[#allocation6 + $0xb0] sm:$0xff] }
 0x2bd   : > { %v1750_v2 = vld [vmem:[#allocation6 + $0x1868] sm:$0xff]  ;;  %3180 = vmatpush.msrb.mxu2 %v1982_v63  ;;  %3221 = vmatpush.msra.mxu0 %v1079_v8  ;;  %v1143_v63 = vld [vmem:[#allocation6 + $0x570] sm:$0xff] }
 0x2be   : > { %v2006_v4 = vld [vmem:[#allocation6 + $0x2068] sm:$0xff]  ;;  %3173 = vmatpush.msrb.mxu1 %v1750_v2  ;;  %v983_v2 = vld [vmem:[#allocation6 + $0x70] sm:$0xff] }
 0x2bf   : > { %v1974_v6 = vld [vmem:[#allocation6 + $0x1f68] sm:$0xff]  ;;  %3213 = vmatpush.msrb.mxu3 %v2006_v4  ;;  %3222 = vmatpush.msra.mxu0 %v1071_v15  ;;  %v1135_v3 = vld [vmem:[#allocation6 + $0x530] sm:$0xff] }
 0x2c0   : > { %v1742_v10 = vld [vmem:[#allocation6 + $0x1828] sm:$0xff]  ;;  %3181 = vmatpush.msrb.mxu2 %v1974_v6  ;;  %v1391_v4 = vld [vmem:[#allocation6 + $0xd30] sm:$0xff] }
 0x2c1   : > { %v1998_v11 = vld [vmem:[#allocation6 + $0x2028] sm:$0xff]  ;;  %3174 = vmatpush.msrb.mxu1 %v1742_v10  ;;  %3223 = vmatpush.msra.mxu0 %v1063_v17  ;;  %v975_v7 = vld [vmem:[#allocation6 + $0x30] sm:$0xff] }
 0x2c2   : > { %v1966_v13 = vld [vmem:[#allocation6 + $0x1f28] sm:$0xff]  ;;  %3214 = vmatpush.msrb.mxu3 %v1998_v11  ;;  %3175 = vmatmul.f32.vlgmr.msrb.gmra.mxu1 %v4064_v52  ;;  %v1127_v8 = vld [vmem:[#allocation6 + $0x4f0] sm:$0xff] }
 0x2c3   : > { %v1958_v16 = vld [vmem:[#allocation6 + $0x1ee8] sm:$0xff]  ;;  %3182 = vmatpush.msrb.mxu2 %v1966_v13  ;;  %3215 = vmatmul.f32.vlgmr.msrb.gmra.mxu3 %v4073_v59  ;;  %v1383_v10 = vld [vmem:[#allocation6 + $0xcf0] sm:$0xff] }
 0x2c4   : > { %3239 = vmatpush.msra.mxu1 %v1223_v29  ;;  %v1950_v20 = vld [vmem:[#allocation6 + $0x1ea8] sm:$0xff]  ;;  %3279 = vmatpush.msra.mxu3 %v1479_v54  ;;  %v1351_v11 = vld [vmem:[#allocation6 + $0xbf0] sm:$0xff] }
 0x2c5   : > { %3183 = vmatpush.msrb.mxu2 %v1958_v16  ;;  %v1942_v23 = vld [vmem:[#allocation6 + $0x1e68] sm:$0xff]  ;;  %3224 = vmatpush.msra.mxu0 %v1055_v60  ;;  %v1607_v12 = vld [vmem:[#allocation6 + $0x13f0] sm:$0xff] }
 0x2c6   : > { %3240 = vmatpush.msra.mxu1 %v1215_v18  ;;  %3280 = vmatpush.msra.mxu3 %v1471_v19  ;;  %v1934_v27 = vld [vmem:[#allocation6 + $0x1e28] sm:$0xff]  ;;  %v1119_v13 = vld [vmem:[#allocation6 + $0x4b0] sm:$0xff] }
 0x2c7   : > { %3184 = vmatpush.msrb.mxu2 %v1950_v20  ;;  %3225 = vmatpush.msra.mxu0 %v1047_v24  ;;  %v1926_v32 = vld [vmem:[#allocation6 + $0x1de8] sm:$0xff]  ;;  %v1375_v15 = vld [vmem:[#allocation6 + $0xcb0] sm:$0xff] }
 0x2c8   : > { %3241 = vmatpush.msra.mxu1 %v1207_v21  ;;  %3281 = vmatpush.msra.mxu3 %v1463_v22  ;;  %v1918_v37 = vld [vmem:[#allocation6 + $0x1da8] sm:$0xff]  ;;  %v1343_v29 = vld [vmem:[#allocation6 + $0xbb0] sm:$0xff] }
 0x2c9   : > { %3185 = vmatpush.msrb.mxu2 %v1942_v23  ;;  %3226 = vmatpush.msra.mxu0 %v1039_v28  ;;  %v1910_v43 = vld [vmem:[#allocation6 + $0x1d68] sm:$0xff]  ;;  %v1599_v54 = vld [vmem:[#allocation6 + $0x13b0] sm:$0xff] }
 0x2ca   : > { %3242 = vmatpush.msra.mxu1 %v1199_v25  ;;  %3282 = vmatpush.msra.mxu3 %v1455_v26  ;;  %v1902_v48 = vld [vmem:[#allocation6 + $0x1d28] sm:$0xff]  ;;  %v1111_v16 = vld [vmem:[#allocation6 + $0x470] sm:$0xff] }
 0x2cb   : > { %3186 = vmatpush.msrb.mxu2 %v1934_v27  ;;  %3227 = vmatpush.msra.mxu0 %v1031_v33  ;;  %v1894_v56 = vld [vmem:[#allocation6 + $0x1ce8] sm:$0xff]  ;;  %v1367_v17 = vld [vmem:[#allocation6 + $0xc70] sm:$0xff] }
 0x2cc   : > { %3243 = vmatpush.msra.mxu1 %v1191_v30  ;;  %3283 = vmatpush.msra.mxu3 %v1447_v31  ;;  %v1886_v42 = vld [vmem:[#allocation6 + $0x1ca8] sm:$0xff]  ;;  %v1335_v18 = vld [vmem:[#allocation6 + $0xb70] sm:$0xff] }
 0x2cd   : > { %3187 = vmatpush.msrb.mxu2 %v1926_v32  ;;  %3228 = vmatpush.msra.mxu0 %v1023_v38  ;;  %v1878_v1 = vld [vmem:[#allocation6 + $0x1c68] sm:$0xff]  ;;  %v1591_v19 = vld [vmem:[#allocation6 + $0x1370] sm:$0xff] }
 0x2ce   : > { %3244 = vmatpush.msra.mxu1 %v1183_v34  ;;  %3284 = vmatpush.msra.mxu3 %v1439_v36  ;;  %v1870_v6 = vld [vmem:[#allocation6 + $0x1c28] sm:$0xff]  ;;  %v1103_v20 = vld [vmem:[#allocation6 + $0x430] sm:$0xff] }
 0x2cf   : > { %3188 = vmatpush.msrb.mxu2 %v1918_v37  ;;  %3229 = vmatpush.msra.mxu0 %v1015_v44  ;;  %v1359_v60 = vld [vmem:[#allocation6 + $0xc30] sm:$0xff] }
 0x2d0   : > { %3245 = vmatpush.msra.mxu1 %v1175_v39  ;;  %3285 = vmatpush.msra.mxu3 %v1431_v40  ;;  %v1327_v21 = vld [vmem:[#allocation6 + $0xb30] sm:$0xff] }
 0x2d1   : > { %3189 = vmatpush.msrb.mxu2 %v1910_v43  ;;  %3230 = vmatpush.msra.mxu0 %v1007_v50  ;;  %v1583_v22 = vld [vmem:[#allocation6 + $0x1330] sm:$0xff] }
 0x2d2   : > { %3246 = vmatpush.msra.mxu1 %v1167_v45  ;;  %3286 = vmatpush.msra.mxu3 %v1423_v46  ;;  %v1735_v23 = vld [vmem:[#allocation6 + $0x17f0] sm:$0xff] }
 0x2d3   : > { %3190 = vmatpush.msrb.mxu2 %v1902_v48  ;;  %3231 = vmatpush.msra.mxu0 %v999_v57  ;;  %v1991_v24 = vld [vmem:[#allocation6 + $0x1ff0] sm:$0xff] }
 0x2d4   : > { %3247 = vmatpush.msra.mxu1 %v1159_v51  ;;  %3287 = vmatpush.msra.mxu3 %v1415_v55  ;;  %v1319_v25 = vld [vmem:[#allocation6 + $0xaf0] sm:$0xff] }
 0x2d5   : > { %3191 = vmatpush.msrb.mxu2 %v1894_v56  ;;  %3232 = vmatpush.msra.mxu0 %v991_v62  ;;  %v1575_v26 = vld [vmem:[#allocation6 + $0x12f0] sm:$0xff] }
 0x2d6   : > { %3248 = vmatpush.msra.mxu1 %v1151_v58  ;;  %3288 = vmatpush.msra.mxu3 %v1407_v61  ;;  %v1727_v27 = vld [vmem:[#allocation6 + $0x17b0] sm:$0xff] }
 0x2d7   : > { %3192 = vmatpush.msrb.mxu2 %v1886_v42  ;;  %3233 = vmatpush.msra.mxu0 %v983_v2  ;;  %v1983_v28 = vld [vmem:[#allocation6 + $0x1fb0] sm:$0xff] }
 0x2d8   : > { %3249 = vmatpush.msra.mxu1 %v1143_v63  ;;  %3289 = vmatpush.msra.mxu3 %v1399_v0  ;;  %v1311_v30 = vld [vmem:[#allocation6 + $0xab0] sm:$0xff] }
 0x2d9   : > { %3193 = vmatpush.msrb.mxu2 %v1878_v1  ;;  %3234 = vmatpush.msra.mxu0 %v975_v7  ;;  %v1567_v31 = vld [vmem:[#allocation6 + $0x12b0] sm:$0xff] }
 0x2da   : > { %3250 = vmatpush.msra.mxu1 %v1135_v3  ;;  %3290 = vmatpush.msra.mxu3 %v1391_v4  ;;  %v1719_v32 = vld [vmem:[#allocation6 + $0x1770] sm:$0xff] }
 0x2db   : > { %3194 = vmatpush.msrb.mxu2 %v1870_v6  ;;  %3235 = vmatmul.f32.vlgmr.msra.gmra.mxu0 %v4039_v9  ;;  %v1975_v33 = vld [vmem:[#allocation6 + $0x1f70] sm:$0xff] }
 0x2dc   : > { %3251 = vmatpush.msra.mxu1 %v1127_v8  ;;  %3291 = vmatpush.msra.mxu3 %v1383_v10  ;;  %v1303_v34 = vld [vmem:[#allocation6 + $0xa70] sm:$0xff] }
 0x2dd   : > { %3195 = vmatmul.f32.vlgmr.msrb.gmra.mxu2 %v4067_v5  ;;  %3299 = vmatpush.msrb.mxu0 %v1607_v12  ;;  %v1559_v36 = vld [vmem:[#allocation6 + $0x1270] sm:$0xff] }
 0x2de   : > { %3259 = vmatpush.msra.mxu2 %v1351_v11  ;;  %3252 = vmatpush.msra.mxu1 %v1119_v13  ;;  %v1711_v37 = vld [vmem:[#allocation6 + $0x1730] sm:$0xff] }
 0x2df   : > { %3292 = vmatpush.msra.mxu3 %v1375_v15  ;;  %3300 = vmatpush.msrb.mxu0 %v1599_v54  ;;  %v1967_v38 = vld [vmem:[#allocation6 + $0x1f30] sm:$0xff] }
 0x2e0   : > { %3260 = vmatpush.msra.mxu2 %v1343_v29  ;;  %3253 = vmatpush.msra.mxu1 %v1111_v16  ;;  %v1295_v39 = vld [vmem:[#allocation6 + $0xa30] sm:$0xff] }
 0x2e1   : > { %3293 = vmatpush.msra.mxu3 %v1367_v17  ;;  %3301 = vmatpush.msrb.mxu0 %v1591_v19  ;;  %v1551_v40 = vld [vmem:[#allocation6 + $0x1230] sm:$0xff] }
 0x2e2   : > { %3261 = vmatpush.msra.mxu2 %v1335_v18  ;;  %3254 = vmatpush.msra.mxu1 %v1103_v20  ;;  %v1703_v43 = vld [vmem:[#allocation6 + $0x16f0] sm:$0xff]  ;;  %v2127_v20 = vperm.slane %v4126_v49, 4 }
 0x2e3   : > { %3294 = vmatpush.msra.mxu3 %v1359_v60  ;;  %3255 = vmatmul.f32.vlgmr.msra.gmra.mxu1 %v4041_v14  ;;  %v1959_v44 = vld [vmem:[#allocation6 + $0x1ef0] sm:$0xff] }
 0x2e4   : > { %3262 = vmatpush.msra.mxu2 %v1327_v21  ;;  %3295 = vmatmul.f32.vlgmr.msra.gmra.mxu3 %v4049_v47  ;;  %v1287_v45 = vld [vmem:[#allocation6 + $0x9f0] sm:$0xff]  ;;  %v2876_v21 = vpop.f32.mrf.mxu2 }
 0x2e5   : > { %3302 = vmatpush.msrb.mxu0 %v1583_v22  ;;  %3319 = vmatpush.msrb.mxu1 %v1735_v23  ;;  %v1543_v46 = vld [vmem:[#allocation6 + $0x11f0] sm:$0xff] }
 0x2e6   : > { %3359 = vmatpush.msrb.mxu3 %v1991_v24  ;;  %3263 = vmatpush.msra.mxu2 %v1319_v25  ;;  %v1695_v48 = vld [vmem:[#allocation6 + $0x16b0] sm:$0xff] }
 0x2e7   : > { %3303 = vmatpush.msrb.mxu0 %v1575_v26  ;;  %3320 = vmatpush.msrb.mxu1 %v1727_v27  ;;  %v1951_v50 = vld [vmem:[#allocation6 + $0x1eb0] sm:$0xff] }
 0x2e8   : > { %3360 = vmatpush.msrb.mxu3 %v1983_v28  ;;  %3264 = vmatpush.msra.mxu2 %v1311_v30  ;;  %v1279_v51 = vld [vmem:[#allocation6 + $0x9b0] sm:$0xff]  ;;  %v2877_v28 = vadd.f32 %v2876_v21, %v2127_v20  ;;  %v1040_v20 = vld [vmem:[#allocation6 + $0x238] sm:$0xff] }
 0x2e9   : > { %3304 = vmatpush.msrb.mxu0 %v1567_v31  ;;  %3321 = vmatpush.msrb.mxu1 %v1719_v32  ;;  %v1535_v55 = vld [vmem:[#allocation6 + $0x11b0] sm:$0xff] }
 0x2ea   : > { %3361 = vmatpush.msrb.mxu3 %v1975_v33  ;;  %3265 = vmatpush.msra.mxu2 %v1303_v34  ;;  %v1687_v56 = vld [vmem:[#allocation6 + $0x1670] sm:$0xff]  ;;  %v2896_v34 = vpop.f32.mrf.mxu3 }
 0x2eb   : > { %3305 = vmatpush.msrb.mxu0 %v1559_v36  ;;  %3322 = vmatpush.msrb.mxu1 %v1711_v37  ;;  %v1943_v57 = vld [vmem:[#allocation6 + $0x1e70] sm:$0xff]  ;;  %v2897_v37 = vadd.f32 %v2896_v34, %v2877_v28 }
 0x2ec   : > { %3362 = vmatpush.msrb.mxu3 %v1967_v38  ;;  %3266 = vmatpush.msra.mxu2 %v1295_v39  ;;  %v1271_v58 = vld [vmem:[#allocation6 + $0x970] sm:$0xff]  ;;  %v1096_v39 = vld [vmem:[#allocation6 + $0x3f8] sm:$0xff] }
 0x2ed   : > { %3306 = vmatpush.msrb.mxu0 %v1551_v40  ;;  %3323 = vmatpush.msrb.mxu1 %v1703_v43  ;;  %v1527_v61 = vld [vmem:[#allocation6 + $0x1170] sm:$0xff]  ;;  %v1352_v40 = vld [vmem:[#allocation6 + $0xbf8] sm:$0xff] }
 0x2ee   : > { %3363 = vmatpush.msrb.mxu3 %v1959_v44  ;;  %3267 = vmatpush.msra.mxu2 %v1287_v45  ;;  %v1679_v42 = vld [vmem:[#allocation6 + $0x1630] sm:$0xff]  ;;  %v1088_v45 = vld [vmem:[#allocation6 + $0x3b8] sm:$0xff] }
 0x2ef   : > { %3307 = vmatpush.msrb.mxu0 %v1543_v46  ;;  %3324 = vmatpush.msrb.mxu1 %v1695_v48  ;;  %v1935_v62 = vld [vmem:[#allocation6 + $0x1e30] sm:$0xff]  ;;  %v2916_v46 = vpop.f32.mrf.mxu0  ;;  %v1344_v48 = vld [vmem:[#allocation6 + $0xbb8] sm:$0xff] }
 0x2f0   : > { %3364 = vmatpush.msrb.mxu3 %v1951_v50  ;;  %3268 = vmatpush.msra.mxu2 %v1279_v51  ;;  %v1263_v63 = vld [vmem:[#allocation6 + $0x930] sm:$0xff]  ;;  %v2917_v51 = vadd.f32 %v2916_v46, %v2897_v37 }
 0x2f1   : > { %3308 = vmatpush.msrb.mxu0 %v1535_v55  ;;  %3325 = vmatpush.msrb.mxu1 %v1687_v56  ;;  %v1519_v0 = vld [vmem:[#allocation6 + $0x1130] sm:$0xff]  ;;  %v1080_v56 = vld [vmem:[#allocation6 + $0x378] sm:$0xff] }
 0x2f2   : > { %3365 = vmatpush.msrb.mxu3 %v1943_v57  ;;  %3269 = vmatpush.msra.mxu2 %v1271_v58  ;;  %v1671_v1 = vld [vmem:[#allocation6 + $0x15f0] sm:$0xff]  ;;  %v1336_v57 = vld [vmem:[#allocation6 + $0xb78] sm:$0xff] }
 0x2f3   : > { %3309 = vmatpush.msrb.mxu0 %v1527_v61  ;;  %3326 = vmatpush.msrb.mxu1 %v1679_v42  ;;  %v1927_v2 = vld [vmem:[#allocation6 + $0x1df0] sm:$0xff]  ;;  %v1072_v42 = vld [vmem:[#allocation6 + $0x338] sm:$0xff] }
 0x2f4   : > { %v1255_v3 = vld [vmem:[#allocation6 + $0x8f0] sm:$0xff]  ;;  %3366 = vmatpush.msrb.mxu3 %v1935_v62  ;;  %3270 = vmatpush.msra.mxu2 %v1263_v63  ;;  %v2936_v62 = vpop.f32.mrf.mxu1  ;;  %v2956_v63 = vpop.f32.mrf.mxu2 }
 0x2f5   : > { %v1511_v4 = vld [vmem:[#allocation6 + $0x10f0] sm:$0xff]  ;;  %3310 = vmatpush.msrb.mxu0 %v1519_v0  ;;  %3327 = vmatpush.msrb.mxu1 %v1671_v1  ;;  %v1328_v0 = vld [vmem:[#allocation6 + $0xb38] sm:$0xff] }
 0x2f6   : > { %v1663_v6 = vld [vmem:[#allocation6 + $0x15b0] sm:$0xff]  ;;  %3367 = vmatpush.msrb.mxu3 %v1927_v2  ;;  %3271 = vmatpush.msra.mxu2 %v1255_v3  ;;  %v2937_v2 = vadd.f32 %v2936_v62, %v2917_v51  ;;  %v1256_v51 = vld [vmem:[#allocation6 + $0x8f8] sm:$0xff] }
 0x2f7   : > { %v1919_v7 = vld [vmem:[#allocation6 + $0x1db0] sm:$0xff]  ;;  %3311 = vmatpush.msrb.mxu0 %v1511_v4  ;;  %3328 = vmatpush.msrb.mxu1 %v1663_v6  ;;  %v1064_v4 = vld [vmem:[#allocation6 + $0x2f8] sm:$0xff] }
 0x2f8   : > { %v1247_v8 = vld [vmem:[#allocation6 + $0x8b0] sm:$0xff]  ;;  %3368 = vmatpush.msrb.mxu3 %v1919_v7  ;;  %v1320_v6 = vld [vmem:[#allocation6 + $0xaf8] sm:$0xff] }
 0x2f9   : > { %v1503_v10 = vld [vmem:[#allocation6 + $0x10b0] sm:$0xff]  ;;  %3272 = vmatpush.msra.mxu2 %v1247_v8  ;;  %v2957_v8 = vadd.f32 %v2956_v63, %v2937_v2  ;;  %v1472_v62 = vld [vmem:[#allocation6 + $0xfb8] sm:$0xff] }
 0x2fa   : > { %v1655_v11 = vld [vmem:[#allocation6 + $0x1570] sm:$0xff]  ;;  %3312 = vmatpush.msrb.mxu0 %v1503_v10  ;;  %v984_v63 = vld [vmem:[#allocation6 + $0x78] sm:$0xff] }
 0x2fb   : > { %v1911_v12 = vld [vmem:[#allocation6 + $0x1d70] sm:$0xff]  ;;  %3329 = vmatpush.msrb.mxu1 %v1655_v11  ;;  %v1056_v11 = vld [vmem:[#allocation6 + $0x2b8] sm:$0xff] }
 0x2fc   : > { %v1239_v13 = vld [vmem:[#allocation6 + $0x870] sm:$0xff]  ;;  %3369 = vmatpush.msrb.mxu3 %v1911_v12  ;;  %v1312_v12 = vld [vmem:[#allocation6 + $0xab8] sm:$0xff]  ;;  %v3016_v34 = vpop.f32.mrf.mxu1 }
 0x2fd   : > { %v1495_v15 = vld [vmem:[#allocation6 + $0x1070] sm:$0xff]  ;;  %3273 = vmatpush.msra.mxu2 %v1239_v13  ;;  %v1464_v2 = vld [vmem:[#allocation6 + $0xf78] sm:$0xff] }
 0x2fe   : > { %v1647_v29 = vld [vmem:[#allocation6 + $0x1530] sm:$0xff]  ;;  %3313 = vmatpush.msrb.mxu0 %v1495_v15 }
 0x2ff   : > { %v1903_v54 = vld [vmem:[#allocation6 + $0x1d30] sm:$0xff]  ;;  %3330 = vmatpush.msrb.mxu1 %v1647_v29  ;;  %v1048_v29 = vld [vmem:[#allocation6 + $0x278] sm:$0xff] }
 0x300   : > { %v1231_v16 = vld [vmem:[#allocation6 + $0x830] sm:$0xff]  ;;  %3370 = vmatpush.msrb.mxu3 %v1903_v54  ;;  %v2976_v54 = vpop.f32.mrf.mxu3 }
 0x301   : > { %v1487_v17 = vld [vmem:[#allocation6 + $0x1030] sm:$0xff]  ;;  %3274 = vmatpush.msra.mxu2 %v1231_v16  ;;  %v1304_v16 = vld [vmem:[#allocation6 + $0xa78] sm:$0xff] }
 0x302   : > { %v1639_v18 = vld [vmem:[#allocation6 + $0x14f0] sm:$0xff]  ;;  %3314 = vmatpush.msrb.mxu0 %v1487_v17  ;;  %3275 = vmatmul.f32.vlgmr.msra.gmra.mxu2 %v4047_v41 }
 0x303   : > { %v1895_v19 = vld [vmem:[#allocation6 + $0x1cf0] sm:$0xff]  ;;  %3331 = vmatpush.msrb.mxu1 %v1639_v18  ;;  %3315 = vmatmul.f32.vlgmr.msrb.gmra.mxu0 %v4055_v35  ;;  %v2977_v18 = vadd.f32 %v2976_v54, %v2957_v8  ;;  %v1608_v8 = vld [vmem:[#allocation6 + $0x13f8] sm:$0xff] }
 0x304   : > { %v1863_v60 = vld [vmem:[#allocation6 + $0x1bf0] sm:$0xff]  ;;  %3371 = vmatpush.msrb.mxu3 %v1895_v19  ;;  %v1440_v54 = vld [vmem:[#allocation6 + $0xeb8] sm:$0xff] }
 0x305   : > { %v2119_v22 = vld [vmem:[#allocation6 + $0x23f0] sm:$0xff]  ;;  %3339 = vmatpush.msrb.mxu2 %v1863_v60  ;;  %v1296_v60 = vld [vmem:[#allocation6 + $0xa38] sm:$0xff] }
 0x306   : > { %v1631_v23 = vld [vmem:[#allocation6 + $0x14b0] sm:$0xff]  ;;  %3379 = vmatpush.msra.mxu0 %v2119_v22 }
 0x307   : > { %v1887_v24 = vld [vmem:[#allocation6 + $0x1cb0] sm:$0xff]  ;;  %3332 = vmatpush.msrb.mxu1 %v1631_v23  ;;  %v1032_v23 = vld [vmem:[#allocation6 + $0x1f8] sm:$0xff] }
 0x308   : > { %v1855_v25 = vld [vmem:[#allocation6 + $0x1bb0] sm:$0xff]  ;;  %3372 = vmatpush.msrb.mxu3 %v1887_v24  ;;  %v2996_v24 = vpop.f32.mrf.mxu0 }
 0x309   : > { %v2111_v26 = vld [vmem:[#allocation6 + $0x23b0] sm:$0xff]  ;;  %3340 = vmatpush.msrb.mxu2 %v1855_v25  ;;  %v1288_v25 = vld [vmem:[#allocation6 + $0x9f8] sm:$0xff] }
 0x30a   : > { %v1623_v27 = vld [vmem:[#allocation6 + $0x1470] sm:$0xff]  ;;  %3380 = vmatpush.msra.mxu0 %v2111_v26 }
 0x30b   : > { %v1879_v49 = vld [vmem:[#allocation6 + $0x1c70] sm:$0xff]  ;;  %3333 = vmatpush.msrb.mxu1 %v1623_v27  ;;  %v2997_v27 = vadd.f32 %v2996_v24, %v2977_v18  ;;  %v1176_v18 = vld [vmem:[#allocation6 + $0x678] sm:$0xff] }
 0x30c   : > { %v1847_v30 = vld [vmem:[#allocation6 + $0x1b70] sm:$0xff]  ;;  %3373 = vmatpush.msrb.mxu3 %v1879_v49  ;;  %v1024_v49 = vld [vmem:[#allocation6 + $0x1b8] sm:$0xff] }
 0x30d   : > { %v2103_v31 = vld [vmem:[#allocation6 + $0x2370] sm:$0xff]  ;;  %3341 = vmatpush.msrb.mxu2 %v1847_v30  ;;  %v1280_v30 = vld [vmem:[#allocation6 + $0x9b8] sm:$0xff] }
 0x30e   : > { %v1615_v32 = vld [vmem:[#allocation6 + $0x1430] sm:$0xff]  ;;  %3381 = vmatpush.msra.mxu0 %v2103_v31  ;;  %v1416_v24 = vld [vmem:[#allocation6 + $0xdf8] sm:$0xff] }
 0x30f   : > { %v1871_v33 = vld [vmem:[#allocation6 + $0x1c30] sm:$0xff]  ;;  %3334 = vmatpush.msrb.mxu1 %v1615_v32 }
 0x310   : > { %v1839_v36 = vld [vmem:[#allocation6 + $0x1b30] sm:$0xff]  ;;  %3374 = vmatpush.msrb.mxu3 %v1871_v33  ;;  %3335 = vmatmul.f32.vlgmr.msrb.gmra.mxu1 %v4058_v53  ;;  %v1016_v33 = vld [vmem:[#allocation6 + $0x178] sm:$0xff] }
 0x311   : > { %v2095_v38 = vld [vmem:[#allocation6 + $0x2330] sm:$0xff]  ;;  %3342 = vmatpush.msrb.mxu2 %v1839_v36  ;;  %3375 = vmatmul.f32.vlgmr.msrb.gmra.mxu3 %v4067_v5  ;;  %v1272_v36 = vld [vmem:[#allocation6 + $0x978] sm:$0xff] }
 0x312   : > { %v1831_v43 = vld [vmem:[#allocation6 + $0x1af0] sm:$0xff]  ;;  %3382 = vmatpush.msra.mxu0 %v2095_v38  ;;  %3399 = vmatpush.msra.mxu1 %v1096_v39  ;;  %v3017_v38 = vadd.f32 %v3016_v34, %v2997_v27  ;;  %v1152_v27 = vld [vmem:[#allocation6 + $0x5b8] sm:$0xff] }
 0x313   : > { %v2087_v44 = vld [vmem:[#allocation6 + $0x22f0] sm:$0xff]  ;;  %3439 = vmatpush.msra.mxu3 %v1352_v40  ;;  %3343 = vmatpush.msrb.mxu2 %v1831_v43  ;;  %v1008_v40 = vld [vmem:[#allocation6 + $0x138] sm:$0xff] }
 0x314   : > { %v1823_v50 = vld [vmem:[#allocation6 + $0x1ab0] sm:$0xff]  ;;  %3383 = vmatpush.msra.mxu0 %v2087_v44  ;;  %3400 = vmatpush.msra.mxu1 %v1088_v45  ;;  %v1264_v43 = vld [vmem:[#allocation6 + $0x938] sm:$0xff]  ;;  %v3036_v45 = vpop.f32.mrf.mxu2 }
 0x315   : > { %v2079_v55 = vld [vmem:[#allocation6 + $0x22b0] sm:$0xff]  ;;  %3440 = vmatpush.msra.mxu3 %v1344_v48  ;;  %3344 = vmatpush.msrb.mxu2 %v1823_v50  ;;  %v1000_v48 = vld [vmem:[#allocation6 + $0xf8] sm:$0xff]  ;;  %v3037_v50 = vadd.f32 %v3036_v45, %v3017_v38 }
 0x316   : > { %v1815_v58 = vld [vmem:[#allocation6 + $0x1a70] sm:$0xff]  ;;  %3384 = vmatpush.msra.mxu0 %v2079_v55  ;;  %3401 = vmatpush.msra.mxu1 %v1080_v56  ;;  %v1224_v55 = vld [vmem:[#allocation6 + $0x7f8] sm:$0xff] }
 0x317   : > { %v2071_v61 = vld [vmem:[#allocation6 + $0x2270] sm:$0xff]  ;;  %3441 = vmatpush.msra.mxu3 %v1336_v57  ;;  %3345 = vmatpush.msrb.mxu2 %v1815_v58  ;;  %v3583_v56 = vmax.f32 %v3037_v50, 0.0  ;;  %v1480_v57 = vld [vmem:[#allocation6 + $0xff8] sm:$0xff] }
 0x318   : > { %v1807_v1 = vld [vmem:[#allocation6 + $0x1a30] sm:$0xff]  ;;  %3385 = vmatpush.msra.mxu0 %v2071_v61  ;;  %3402 = vmatpush.msra.mxu1 %v1072_v42  ;;  %v992_v58 = vld [vmem:[#allocation6 + $0xb8] sm:$0xff] }
 0x319   : > { %v2063_v3 = vld [vmem:[#allocation6 + $0x2230] sm:$0xff]  ;;  %3442 = vmatpush.msra.mxu3 %v1328_v0  ;;  %3346 = vmatpush.msrb.mxu2 %v1807_v1  ;;  %v1248_v61 = vld [vmem:[#allocation6 + $0x8b8] sm:$0xff]  ;;  %3591 = vst [vmem:[%s4099_s30 + $0x20] sm:$0xff] %v3583_v56 }
 0x31a   : > { %v1799_v7 = vld [vmem:[#allocation6 + $0x19f0] sm:$0xff]  ;;  %3386 = vmatpush.msra.mxu0 %v2063_v3  ;;  %3403 = vmatpush.msra.mxu1 %v1064_v4  ;;  %v1216_v42 = vld [vmem:[#allocation6 + $0x7b8] sm:$0xff] }
 0x31b   : > { %v2055_v10 = vld [vmem:[#allocation6 + $0x21f0] sm:$0xff]  ;;  %3443 = vmatpush.msra.mxu3 %v1320_v6  ;;  %3347 = vmatpush.msrb.mxu2 %v1799_v7  ;;  %v1240_v0 = vld [vmem:[#allocation6 + $0x878] sm:$0xff] }
 0x31c   : > { %v1791_v13 = vld [vmem:[#allocation6 + $0x19b0] sm:$0xff]  ;;  %3387 = vmatpush.msra.mxu0 %v2055_v10  ;;  %3404 = vmatpush.msra.mxu1 %v1056_v11  ;;  %v1208_v1 = vld [vmem:[#allocation6 + $0x778] sm:$0xff] }
 0x31d   : > { %v2047_v15 = vld [vmem:[#allocation6 + $0x21b0] sm:$0xff]  ;;  %3444 = vmatpush.msra.mxu3 %v1312_v12  ;;  %3348 = vmatpush.msrb.mxu2 %v1791_v13  ;;  %v976_v3 = vld [vmem:[#allocation6 + $0x38] sm:$0xff] }
 0x31e   : > { %v1783_v17 = vld [vmem:[#allocation6 + $0x1970] sm:$0xff]  ;;  %3388 = vmatpush.msra.mxu0 %v2047_v15  ;;  %3405 = vmatpush.msra.mxu1 %v1048_v29  ;;  %v1232_v4 = vld [vmem:[#allocation6 + $0x838] sm:$0xff] }
 0x31f   : > { %v2039_v19 = vld [vmem:[#allocation6 + $0x2170] sm:$0xff]  ;;  %3445 = vmatpush.msra.mxu3 %v1304_v16  ;;  %3349 = vmatpush.msrb.mxu2 %v1783_v17  ;;  %v1200_v6 = vld [vmem:[#allocation6 + $0x738] sm:$0xff] }
 0x320   : > { %v1775_v21 = vld [vmem:[#allocation6 + $0x1930] sm:$0xff]  ;;  %3389 = vmatpush.msra.mxu0 %v2039_v19  ;;  %3406 = vmatpush.msra.mxu1 %v1040_v20  ;;  %v1456_v7 = vld [vmem:[#allocation6 + $0xf38] sm:$0xff] }
 0x321   : > { %v2031_v22 = vld [vmem:[#allocation6 + $0x2130] sm:$0xff]  ;;  %3446 = vmatpush.msra.mxu3 %v1296_v60  ;;  %3350 = vmatpush.msrb.mxu2 %v1775_v21  ;;  %v1864_v10 = vld [vmem:[#allocation6 + $0x1bf8] sm:$0xff] }
 0x322   : > { %v1767_v26 = vld [vmem:[#allocation6 + $0x18f0] sm:$0xff]  ;;  %3390 = vmatpush.msra.mxu0 %v2031_v22  ;;  %3407 = vmatpush.msra.mxu1 %v1032_v23  ;;  %v1192_v11 = vld [vmem:[#allocation6 + $0x6f8] sm:$0xff] }
 0x323   : > { %v2023_v28 = vld [vmem:[#allocation6 + $0x20f0] sm:$0xff]  ;;  %3447 = vmatpush.msra.mxu3 %v1288_v25  ;;  %3351 = vmatpush.msrb.mxu2 %v1767_v26  ;;  %v1448_v12 = vld [vmem:[#allocation6 + $0xef8] sm:$0xff] }
 0x324   : > { %v1759_v31 = vld [vmem:[#allocation6 + $0x18b0] sm:$0xff]  ;;  %3391 = vmatpush.msra.mxu0 %v2023_v28  ;;  %3408 = vmatpush.msra.mxu1 %v1024_v49  ;;  %v1600_v13 = vld [vmem:[#allocation6 + $0x13b8] sm:$0xff] }
 0x325   : > { %v2015_v32 = vld [vmem:[#allocation6 + $0x20b0] sm:$0xff]  ;;  %3448 = vmatpush.msra.mxu3 %v1280_v30  ;;  %3352 = vmatpush.msrb.mxu2 %v1759_v31  ;;  %v1856_v15 = vld [vmem:[#allocation6 + $0x1bb8] sm:$0xff] }
 0x326   : > { %v1751_v37 = vld [vmem:[#allocation6 + $0x1870] sm:$0xff]  ;;  %3392 = vmatpush.msra.mxu0 %v2015_v32  ;;  %3409 = vmatpush.msra.mxu1 %v1016_v33  ;;  %v1184_v29 = vld [vmem:[#allocation6 + $0x6b8] sm:$0xff] }
 0x327   : > { %v2007_v39 = vld [vmem:[#allocation6 + $0x2070] sm:$0xff]  ;;  %3449 = vmatpush.msra.mxu3 %v1272_v36  ;;  %3353 = vmatpush.msrb.mxu2 %v1751_v37  ;;  %v1592_v16 = vld [vmem:[#allocation6 + $0x1378] sm:$0xff] }
 0x328   : > { %v1743_v44 = vld [vmem:[#allocation6 + $0x1830] sm:$0xff]  ;;  %3393 = vmatpush.msra.mxu0 %v2007_v39  ;;  %3410 = vmatpush.msra.mxu1 %v1008_v40  ;;  %v1848_v17 = vld [vmem:[#allocation6 + $0x1b78] sm:$0xff] }
 0x329   : > { %v1999_v46 = vld [vmem:[#allocation6 + $0x2030] sm:$0xff]  ;;  %3450 = vmatpush.msra.mxu3 %v1264_v43  ;;  %3354 = vmatpush.msrb.mxu2 %v1743_v44  ;;  %v1584_v19 = vld [vmem:[#allocation6 + $0x1338] sm:$0xff] }
 0x32a   : > { %3394 = vmatpush.msra.mxu0 %v1999_v46  ;;  %3411 = vmatpush.msra.mxu1 %v1000_v48  ;;  %v1168_v20 = vld [vmem:[#allocation6 + $0x638] sm:$0xff] }
 0x32b   : > { %3451 = vmatpush.msra.mxu3 %v1256_v51  ;;  %3355 = vmatmul.f32.vlgmr.msrb.gmra.mxu2 %v4064_v52  ;;  %v1424_v60 = vld [vmem:[#allocation6 + $0xe38] sm:$0xff] }
 0x32c   : > { %3395 = vmatmul.f32.vlgmr.msra.gmra.mxu0 %v4073_v59  ;;  %3419 = vmatpush.msra.mxu2 %v1224_v55  ;;  %v1576_v21 = vld [vmem:[#allocation6 + $0x12f8] sm:$0xff] }
 0x32d   : > { %3459 = vmatpush.msrb.mxu0 %v1480_v57  ;;  %3412 = vmatpush.msra.mxu1 %v992_v58  ;;  %v1832_v22 = vld [vmem:[#allocation6 + $0x1af8] sm:$0xff] }
 0x32e   : > { %3452 = vmatpush.msra.mxu3 %v1248_v61  ;;  %3420 = vmatpush.msra.mxu2 %v1216_v42  ;;  %v1160_v23 = vld [vmem:[#allocation6 + $0x5f8] sm:$0xff] }
 0x32f   : > { %3460 = vmatpush.msrb.mxu0 %v1472_v62  ;;  %3413 = vmatpush.msra.mxu1 %v984_v63  ;;  %v1568_v25 = vld [vmem:[#allocation6 + $0x12b8] sm:$0xff] }
 0x330   : > { %3453 = vmatpush.msra.mxu3 %v1240_v0  ;;  %3421 = vmatpush.msra.mxu2 %v1208_v1  ;;  %v1824_v26 = vld [vmem:[#allocation6 + $0x1ab8] sm:$0xff] }
 0x331   : > { %3461 = vmatpush.msrb.mxu0 %v1464_v2  ;;  %3414 = vmatpush.msra.mxu1 %v976_v3  ;;  %v1408_v28 = vld [vmem:[#allocation6 + $0xdb8] sm:$0xff] }
 0x332   : > { %3454 = vmatpush.msra.mxu3 %v1232_v4  ;;  %3415 = vmatmul.f32.vlgmr.msra.gmra.mxu1 %v4039_v9  ;;  %v1432_v9 = vld [vmem:[#allocation6 + $0xe78] sm:$0xff] }
 0x333   : > { %3422 = vmatpush.msra.mxu2 %v1200_v6  ;;  %3455 = vmatmul.f32.vlgmr.msra.gmra.mxu3 %v4047_v41  ;;  %v1840_v41 = vld [vmem:[#allocation6 + $0x1b38] sm:$0xff] }
 0x334   : > { %3462 = vmatpush.msrb.mxu0 %v1456_v7  ;;  %3479 = vmatpush.msrb.mxu1 %v1608_v8  ;;  %v1560_v49 = vld [vmem:[#allocation6 + $0x1278] sm:$0xff] }
 0x335   : > { %3519 = vmatpush.msrb.mxu3 %v1864_v10  ;;  %3423 = vmatpush.msra.mxu2 %v1192_v11  ;;  %v1816_v30 = vld [vmem:[#allocation6 + $0x1a78] sm:$0xff] }
 0x336   : > { %3463 = vmatpush.msrb.mxu0 %v1448_v12  ;;  %3480 = vmatpush.msrb.mxu1 %v1600_v13  ;;  %v1144_v31 = vld [vmem:[#allocation6 + $0x578] sm:$0xff] }
 0x337   : > { %3520 = vmatpush.msrb.mxu3 %v1856_v15  ;;  %3424 = vmatpush.msra.mxu2 %v1184_v29  ;;  %v1400_v32 = vld [vmem:[#allocation6 + $0xd78] sm:$0xff]  ;;  %v4150_v15 = vld [vmem:[#allocation7] sm:$0xff] }
 0x338   : > { %3464 = vmatpush.msrb.mxu0 %v1440_v54  ;;  %3481 = vmatpush.msrb.mxu1 %v1592_v16  ;;  %v1552_v33 = vld [vmem:[#allocation6 + $0x1238] sm:$0xff]  ;;  %v3056_v16 = vpop.f32.mrf.mxu3 }
 0x339   : > { %3521 = vmatpush.msrb.mxu3 %v1848_v17  ;;  %3425 = vmatpush.msra.mxu2 %v1176_v18  ;;  %v1808_v34 = vld [vmem:[#allocation6 + $0x1a38] sm:$0xff] }
 0x33a   : > { %3465 = vmatpush.msrb.mxu0 %v1432_v9  ;;  %3482 = vmatpush.msrb.mxu1 %v1584_v19  ;;  %v1136_v36 = vld [vmem:[#allocation6 + $0x538] sm:$0xff]  ;;  %v3076_v19 = vpop.f32.mrf.mxu0 }
 0x33b   : > { %3522 = vmatpush.msrb.mxu3 %v1840_v41  ;;  %3426 = vmatpush.msra.mxu2 %v1168_v20  ;;  %v1392_v37 = vld [vmem:[#allocation6 + $0xd38] sm:$0xff] }
 0x33c   : > { %3466 = vmatpush.msrb.mxu0 %v1424_v60  ;;  %3483 = vmatpush.msrb.mxu1 %v1576_v21  ;;  %v1544_v38 = vld [vmem:[#allocation6 + $0x11f8] sm:$0xff] }
 0x33d   : > { %3523 = vmatpush.msrb.mxu3 %v1832_v22  ;;  %3427 = vmatpush.msra.mxu2 %v1160_v23  ;;  %v1800_v39 = vld [vmem:[#allocation6 + $0x19f8] sm:$0xff]  ;;  %v3096_v22 = vpop.f32.mrf.mxu1 }
 0x33e   : > { %3467 = vmatpush.msrb.mxu0 %v1416_v24  ;;  %3484 = vmatpush.msrb.mxu1 %v1568_v25  ;;  %v1128_v40 = vld [vmem:[#allocation6 + $0x4f8] sm:$0xff] }
 0x33f   : > { %3524 = vmatpush.msrb.mxu3 %v1824_v26  ;;  %3428 = vmatpush.msra.mxu2 %v1152_v27  ;;  %v1384_v43 = vld [vmem:[#allocation6 + $0xcf8] sm:$0xff]  ;;  %v3116_v26 = vpop.f32.mrf.mxu2 }
 0x340   : > { %3468 = vmatpush.msrb.mxu0 %v1408_v28  ;;  %3485 = vmatpush.msrb.mxu1 %v1560_v49  ;;  %v1536_v44 = vld [vmem:[#allocation6 + $0x11b8] sm:$0xff] }
 0x341   : > { %3525 = vmatpush.msrb.mxu3 %v1816_v30  ;;  %3429 = vmatpush.msra.mxu2 %v1144_v31  ;;  %v1792_v45 = vld [vmem:[#allocation6 + $0x19b8] sm:$0xff] }
 0x342   : > { %3469 = vmatpush.msrb.mxu0 %v1400_v32  ;;  %3486 = vmatpush.msrb.mxu1 %v1552_v33  ;;  %v1120_v46 = vld [vmem:[#allocation6 + $0x4b8] sm:$0xff] }
 0x343   : > { %3526 = vmatpush.msrb.mxu3 %v1808_v34  ;;  %3430 = vmatpush.msra.mxu2 %v1136_v36  ;;  %v1376_v48 = vld [vmem:[#allocation6 + $0xcb8] sm:$0xff] }
 0x344   : > { %3470 = vmatpush.msrb.mxu0 %v1392_v37  ;;  %3487 = vmatpush.msrb.mxu1 %v1544_v38  ;;  %v1528_v50 = vld [vmem:[#allocation6 + $0x1178] sm:$0xff]  ;;  %v3136_v38 = vpop.f32.mrf.mxu3 }
 0x345   : > { %3527 = vmatpush.msrb.mxu3 %v1800_v39  ;;  %3431 = vmatpush.msra.mxu2 %v1128_v40  ;;  %v1784_v51 = vld [vmem:[#allocation6 + $0x1978] sm:$0xff] }
 0x346   : > { %3471 = vmatpush.msrb.mxu0 %v1384_v43  ;;  %3488 = vmatpush.msrb.mxu1 %v1536_v44  ;;  %v1112_v55 = vld [vmem:[#allocation6 + $0x478] sm:$0xff] }
 0x347   : > { %3528 = vmatpush.msrb.mxu3 %v1792_v45  ;;  %3432 = vmatpush.msra.mxu2 %v1120_v46  ;;  %v1368_v56 = vld [vmem:[#allocation6 + $0xc78] sm:$0xff] }
 0x348   : > { %v1520_v57 = vld [vmem:[#allocation6 + $0x1138] sm:$0xff]  ;;  %3472 = vmatpush.msrb.mxu0 %v1376_v48  ;;  %3489 = vmatpush.msrb.mxu1 %v1528_v50  ;;  %v3156_v50 = vpop.f32.mrf.mxu0 }
 0x349   : > { %v1776_v58 = vld [vmem:[#allocation6 + $0x1938] sm:$0xff]  ;;  %3529 = vmatpush.msrb.mxu3 %v1784_v51  ;;  %3433 = vmatpush.msra.mxu2 %v1112_v55 }
 0x34a   : > { %v1104_v61 = vld [vmem:[#allocation6 + $0x438] sm:$0xff]  ;;  %3473 = vmatpush.msrb.mxu0 %v1368_v56  ;;  %3490 = vmatpush.msrb.mxu1 %v1520_v57 }
 0x34b   : > { %v1360_v42 = vld [vmem:[#allocation6 + $0xc38] sm:$0xff]  ;;  %3530 = vmatpush.msrb.mxu3 %v1776_v58  ;;  %3434 = vmatpush.msra.mxu2 %v1104_v61 }
 0x34c   : > { %v1512_v62 = vld [vmem:[#allocation6 + $0x10f8] sm:$0xff]  ;;  %3474 = vmatpush.msrb.mxu0 %v1360_v42  ;;  %3435 = vmatmul.f32.vlgmr.msra.gmra.mxu2 %v4041_v14 }
 0x34d   : > { %v1768_v63 = vld [vmem:[#allocation6 + $0x18f8] sm:$0xff]  ;;  %3491 = vmatpush.msrb.mxu1 %v1512_v62  ;;  %3475 = vmatmul.f32.vlgmr.msrb.gmra.mxu0 %v4049_v47  ;;  %v2128_v47 = vperm.slane %v4150_v15, 5  ;;  %v3176_v62 = vpop.f32.mrf.mxu1 }
 0x34e   : > { %v1736_v0 = vld [vmem:[#allocation6 + $0x17f8] sm:$0xff]  ;;  %3531 = vmatpush.msrb.mxu3 %v1768_v63 }
 0x34f   : > { %v1992_v1 = vld [vmem:[#allocation6 + $0x1ff8] sm:$0xff]  ;;  %3499 = vmatpush.msrb.mxu2 %v1736_v0  ;;  %v3057_v20 = vadd.f32 %v3056_v16, %v2128_v47 }
 0x350   : > { %v1504_v2 = vld [vmem:[#allocation6 + $0x10b8] sm:$0xff]  ;;  %3539 = vmatpush.msra.mxu0 %v1992_v1 }
 0x351   : > { %v1760_v3 = vld [vmem:[#allocation6 + $0x18b8] sm:$0xff]  ;;  %3492 = vmatpush.msrb.mxu1 %v1504_v2  ;;  %v3077_v24 = vadd.f32 %v3076_v19, %v3057_v20 }
 0x352   : > { %v1728_v4 = vld [vmem:[#allocation6 + $0x17b8] sm:$0xff]  ;;  %3532 = vmatpush.msrb.mxu3 %v1760_v3 }
 0x353   : > { %v1984_v6 = vld [vmem:[#allocation6 + $0x1fb8] sm:$0xff]  ;;  %3500 = vmatpush.msrb.mxu2 %v1728_v4  ;;  %v3097_v27 = vadd.f32 %v3096_v22, %v3077_v24 }
 0x354   : > { %v1496_v7 = vld [vmem:[#allocation6 + $0x1078] sm:$0xff]  ;;  %3540 = vmatpush.msra.mxu0 %v1984_v6 }
 0x355   : > { %v1752_v8 = vld [vmem:[#allocation6 + $0x1878] sm:$0xff]  ;;  %3493 = vmatpush.msrb.mxu1 %v1496_v7  ;;  %v3117_v31 = vadd.f32 %v3116_v26, %v3097_v27 }
 0x356   : > { %v1720_v10 = vld [vmem:[#allocation6 + $0x1778] sm:$0xff]  ;;  %3533 = vmatpush.msrb.mxu3 %v1752_v8 }
 0x357   : > { %v1976_v11 = vld [vmem:[#allocation6 + $0x1f78] sm:$0xff]  ;;  %3501 = vmatpush.msrb.mxu2 %v1720_v10  ;;  %v3137_v40 = vadd.f32 %v3136_v38, %v3117_v31  ;;  %v3216_v10 = vpop.f32.mrf.mxu3 }
 0x358   : > { %v1488_v12 = vld [vmem:[#allocation6 + $0x1038] sm:$0xff]  ;;  %3541 = vmatpush.msra.mxu0 %v1976_v11 }
 0x359   : > { %v1744_v13 = vld [vmem:[#allocation6 + $0x1838] sm:$0xff]  ;;  %3494 = vmatpush.msrb.mxu1 %v1488_v12  ;;  %v3157_v55 = vadd.f32 %v3156_v50, %v3137_v40 }
 0x35a   : > { %v1712_v14 = vld [vmem:[#allocation6 + $0x1738] sm:$0xff]  ;;  %3534 = vmatpush.msrb.mxu3 %v1744_v13  ;;  %3495 = vmatmul.f32.vlgmr.msrb.gmra.mxu1 %v4055_v35 }
 0x35b   : > { %v1968_v29 = vld [vmem:[#allocation6 + $0x1f38] sm:$0xff]  ;;  %3502 = vmatpush.msrb.mxu2 %v1712_v14  ;;  %3535 = vmatmul.f32.vlgmr.msrb.gmra.mxu3 %v4064_v52  ;;  %v3177_v0 = vadd.f32 %v3176_v62, %v3157_v55 }
 0x35c   : > { %v2120_v54 = vld [vmem:[#allocation6 + $0x23f8] sm:$0xff]  ;;  %3542 = vmatpush.msra.mxu0 %v1968_v29  ;;  %v2129_v29 = vperm.slane %v4150_v15, 6 }
 0x35d   : > { %v1704_v17 = vld [vmem:[#allocation6 + $0x16f8] sm:$0xff]  ;;  %3559 = vmatpush.msra.mxu1 %v2120_v54  ;;  %v3236_v54 = vpop.f32.mrf.mxu0 }
 0x35e   : > { %v1960_v18 = vld [vmem:[#allocation6 + $0x1ef8] sm:$0xff]  ;;  %3503 = vmatpush.msrb.mxu2 %v1704_v17  ;;  %v3237_v17 = vadd.f32 %v3236_v54, %v2129_v29 }
 0x35f   : > { %v2112_v9 = vld [vmem:[#allocation6 + $0x23b8] sm:$0xff]  ;;  %3543 = vmatpush.msra.mxu0 %v1960_v18 }
 0x360   : > { %v1696_v41 = vld [vmem:[#allocation6 + $0x16b8] sm:$0xff]  ;;  %3560 = vmatpush.msra.mxu1 %v2112_v9  ;;  %v3196_v4 = vpop.f32.mrf.mxu2  ;;  %v3256_v16 = vpop.f32.mrf.mxu1 }
 0x361   : > { %v1952_v60 = vld [vmem:[#allocation6 + $0x1eb8] sm:$0xff]  ;;  %3504 = vmatpush.msrb.mxu2 %v1696_v41  ;;  %v3197_v8 = vadd.f32 %v3196_v4, %v3177_v0  ;;  %v3257_v9 = vadd.f32 %v3256_v16, %v3237_v17 }
 0x362   : > { %v2104_v21 = vld [vmem:[#allocation6 + $0x2378] sm:$0xff]  ;;  %3544 = vmatpush.msra.mxu0 %v1952_v60 }
 0x363   : > { %v1688_v23 = vld [vmem:[#allocation6 + $0x1678] sm:$0xff]  ;;  %3561 = vmatpush.msra.mxu1 %v2104_v21  ;;  %v3217_v12 = vadd.f32 %v3216_v10, %v3197_v8 }
 0x364   : > { %v1944_v35 = vld [vmem:[#allocation6 + $0x1e78] sm:$0xff]  ;;  %3505 = vmatpush.msrb.mxu2 %v1688_v23 }
 0x365   : > { %v2096_v25 = vld [vmem:[#allocation6 + $0x2338] sm:$0xff]  ;;  %3545 = vmatpush.msra.mxu0 %v1944_v35  ;;  %v3584_v14 = vmax.f32 %v3217_v12, 0.0 }
 0x366   : > { %v1680_v52 = vld [vmem:[#allocation6 + $0x1638] sm:$0xff]  ;;  %3562 = vmatpush.msra.mxu1 %v2096_v25 }
 0x367   : > { %v1936_v28 = vld [vmem:[#allocation6 + $0x1e38] sm:$0xff]  ;;  %3506 = vmatpush.msrb.mxu2 %v1680_v52  ;;  %3592 = vst [vmem:[%s4099_s30 + $0x28] sm:$0xff] %v3584_v14  ;;  %v3296_v19 = vpop.f32.mrf.mxu3  ;;  %v2130_v52 = vperm.slane %v4150_v15, 7 }
 0x368   : > { %v2088_v49 = vld [vmem:[#allocation6 + $0x22f8] sm:$0xff]  ;;  %3546 = vmatpush.msra.mxu0 %v1936_v28 }
 0x369   : > { %v1672_v30 = vld [vmem:[#allocation6 + $0x15f8] sm:$0xff]  ;;  %3563 = vmatpush.msra.mxu1 %v2088_v49 }
 0x36a   : > { %v1928_v32 = vld [vmem:[#allocation6 + $0x1df8] sm:$0xff]  ;;  %3507 = vmatpush.msrb.mxu2 %v1672_v30 }
 0x36b   : > { %v2080_v33 = vld [vmem:[#allocation6 + $0x22b8] sm:$0xff]  ;;  %3547 = vmatpush.msra.mxu0 %v1928_v32 }
 0x36c   : > { %v1664_v34 = vld [vmem:[#allocation6 + $0x15b8] sm:$0xff]  ;;  %3564 = vmatpush.msra.mxu1 %v2080_v33 }
 0x36d   : > { %v1920_v36 = vld [vmem:[#allocation6 + $0x1db8] sm:$0xff]  ;;  %3508 = vmatpush.msrb.mxu2 %v1664_v34 }
 0x36e   : > { %v2072_v37 = vld [vmem:[#allocation6 + $0x2278] sm:$0xff]  ;;  %3548 = vmatpush.msra.mxu0 %v1920_v36 }
 0x36f   : > { %v1656_v39 = vld [vmem:[#allocation6 + $0x1578] sm:$0xff]  ;;  %3565 = vmatpush.msra.mxu1 %v2072_v37 }
 0x370   : > { %v1912_v43 = vld [vmem:[#allocation6 + $0x1d78] sm:$0xff]  ;;  %3509 = vmatpush.msrb.mxu2 %v1656_v39 }
 0x371   : > { %v2064_v44 = vld [vmem:[#allocation6 + $0x2238] sm:$0xff]  ;;  %3549 = vmatpush.msra.mxu0 %v1912_v43 }
 0x372   : > { %v1648_v45 = vld [vmem:[#allocation6 + $0x1538] sm:$0xff]  ;;  %3566 = vmatpush.msra.mxu1 %v2064_v44 }
 0x373   : > { %v1904_v46 = vld [vmem:[#allocation6 + $0x1d38] sm:$0xff]  ;;  %3510 = vmatpush.msrb.mxu2 %v1648_v45 }
 0x374   : > { %v2056_v48 = vld [vmem:[#allocation6 + $0x21f8] sm:$0xff]  ;;  %3550 = vmatpush.msra.mxu0 %v1904_v46 }
 0x375   : > { %v1640_v51 = vld [vmem:[#allocation6 + $0x14f8] sm:$0xff]  ;;  %3567 = vmatpush.msra.mxu1 %v2056_v48 }
 0x376   : > { %v1896_v56 = vld [vmem:[#allocation6 + $0x1cf8] sm:$0xff]  ;;  %3511 = vmatpush.msrb.mxu2 %v1640_v51 }
 0x377   : > { %v2048_v57 = vld [vmem:[#allocation6 + $0x21b8] sm:$0xff]  ;;  %3551 = vmatpush.msra.mxu0 %v1896_v56 }
 0x378   : > { %v1632_v58 = vld [vmem:[#allocation6 + $0x14b8] sm:$0xff]  ;;  %3568 = vmatpush.msra.mxu1 %v2048_v57 }
 0x379   : > { %v1888_v61 = vld [vmem:[#allocation6 + $0x1cb8] sm:$0xff]  ;;  %3512 = vmatpush.msrb.mxu2 %v1632_v58 }
 0x37a   : > { %v2040_v42 = vld [vmem:[#allocation6 + $0x2178] sm:$0xff]  ;;  %3552 = vmatpush.msra.mxu0 %v1888_v61 }
 0x37b   : > { %v1624_v63 = vld [vmem:[#allocation6 + $0x1478] sm:$0xff]  ;;  %3569 = vmatpush.msra.mxu1 %v2040_v42 }
 0x37c   : > { %v1880_v1 = vld [vmem:[#allocation6 + $0x1c78] sm:$0xff]  ;;  %3513 = vmatpush.msrb.mxu2 %v1624_v63 }
 0x37d   : > { %v2032_v2 = vld [vmem:[#allocation6 + $0x2138] sm:$0xff]  ;;  %3553 = vmatpush.msra.mxu0 %v1880_v1 }
 0x37e   : > { %v1616_v3 = vld [vmem:[#allocation6 + $0x1438] sm:$0xff]  ;;  %3570 = vmatpush.msra.mxu1 %v2032_v2 }
 0x37f   : > { %v1872_v6 = vld [vmem:[#allocation6 + $0x1c38] sm:$0xff]  ;;  %3514 = vmatpush.msrb.mxu2 %v1616_v3 }
 0x380   : > { %v2024_v7 = vld [vmem:[#allocation6 + $0x20f8] sm:$0xff]  ;;  %3554 = vmatpush.msra.mxu0 %v1872_v6  ;;  %3515 = vmatmul.f32.vlgmr.msrb.gmra.mxu2 %v4058_v53  ;;  %v3316_v41 = vpop.f32.mrf.mxu0 }
 0x381   : > { %v2016_v11 = vld [vmem:[#allocation6 + $0x20b8] sm:$0xff]  ;;  %3571 = vmatpush.msra.mxu1 %v2024_v7  ;;  %3555 = vmatmul.f32.vlgmr.msra.gmra.mxu0 %v4067_v5 }
 0x382   : > { %v2008_v13 = vld [vmem:[#allocation6 + $0x2078] sm:$0xff] }
 0x383   : > { %3572 = vmatpush.msra.mxu1 %v2016_v11  ;;  %v2000_v47 = vld [vmem:[#allocation6 + $0x2038] sm:$0xff] }
 0x385   : > { %3573 = vmatpush.msra.mxu1 %v2008_v13  ;;  %v3276_v18 = vpop.f32.mrf.mxu2 }
 0x386   : > { %v3277_v53 = vadd.f32 %v3276_v18, %v3257_v9 }
 0x387   : > { %3574 = vmatpush.msra.mxu1 %v2000_v47 }
 0x388   : > { %3575 = vmatmul.f32.vlgmr.msra.gmra.mxu1 %v4073_v59  ;;  %v3297_v5 = vadd.f32 %v3296_v19, %v3277_v53 }
 0x38a   : > { %v3317_v20 = vadd.f32 %v3316_v41, %v3297_v5 }
 0x38d   : > { %v3336_v60 = vpop.f32.mrf.mxu1 }
 0x38e   : > { %v3337_v21 = vadd.f32 %v3336_v60, %v3317_v20 }
 0x394   : > { %v3376_v24 = vpop.f32.mrf.mxu3 }
 0x3a9   : > { %v3396_v59 = vpop.f32.mrf.mxu0 }
 0x3ae   : > { %v3356_v22 = vpop.f32.mrf.mxu2 }
 0x3af   : > { %v3357_v23 = vadd.f32 %v3356_v22, %v3337_v21  ;;  %v3416_v27 = vpop.f32.mrf.mxu1 }
 0x3b0   : > { %v3417_v49 = vadd.f32 %v3416_v27, %v2130_v52 }
 0x3b1   : > { %v3377_v35 = vadd.f32 %v3376_v24, %v3357_v23 }
 0x3b3   : > { %v3397_v25 = vadd.f32 %v3396_v59, %v3377_v35 }
 0x3b5   : > { %v3585_v26 = vmax.f32 %v3397_v25, 0.0 }
 0x3b6   : > { %v3456_v31 = vpop.f32.mrf.mxu3 }
 0x3b7   : > { %3593 = vst [vmem:[%s4099_s30 + $0x30] sm:$0xff] %v3585_v26 }
 0x3ca   : > { %v3476_v33 = vpop.f32.mrf.mxu0 }
 0x3cf   : > { %v3436_v28 = vpop.f32.mrf.mxu2 }
 0x3d0   : > { %v3437_v30 = vadd.f32 %v3436_v28, %v3417_v49 }
 0x3d2   : > { %v3457_v32 = vadd.f32 %v3456_v31, %v3437_v30 }
 0x3d4   : > { %v3477_v34 = vadd.f32 %v3476_v33, %v3457_v32 }
 0x3d7   : > { %v3496_v36 = vpop.f32.mrf.mxu1 }
 0x3d8   : > { %v3497_v37 = vadd.f32 %v3496_v36, %v3477_v34 }
 0x3de   : > { %v3536_v40 = vpop.f32.mrf.mxu3 }
 0x3fe   : > { %v3556_v44 = vpop.f32.mrf.mxu0 }
 0x403   : > { %v3516_v38 = vpop.f32.mrf.mxu2 }
 0x404   : > { %v3517_v39 = vadd.f32 %v3516_v38, %v3497_v37 }
 0x405   : > { %v3576_v46 = vpop.f32.mrf.mxu1 }
 0x406   : > { %v3537_v43 = vadd.f32 %v3536_v40, %v3517_v39 }
 0x408   : > { %v3557_v45 = vadd.f32 %v3556_v44, %v3537_v43 }
 0x40a   : > { %v3577_v48 = vadd.f32 %v3576_v46, %v3557_v45 }
 0x40c   : > { %v3586_v15 = vmax.f32 %v3577_v48, 0.0 }
 0x40e   : > { %3594 = vst [vmem:[%s4099_s30 + $0x38] sm:$0xff] %v3586_v15 }
 0x40f PF: > { %s18_s18 = sadd.s32 1, %s3906_s18  }
 0x410   : > { %p15_p7 = scmp.ge.s32.totalorder %s18_s18, 4  }
 0x412   :  { %17 = sbr.rel (!%p15_p7) target bundleno = 3 (0x3), region = 87 }
 0x417   :  { %3616 = vsyncpa [#allocation3], 1 }
 0x418   :  { %3618 = vsyncpa [#allocation3 + $0x1], 1 }
 0x419   :  { %3619 = vsyncpa [#allocation5], 1 }
 0x41a   :  { %3620 = vsyncpa [#allocation8], 1 }

</bundles_post_ra>
